<compile_context>
chip_gen: v6e
topology: v6e:2x2x1
jax: 0.10.0
libtpu: 0.0.40
codegen_flags: <defaults>
</compile_context>

<pallas_src>
import functools
import math

import jax
import jax.numpy as jnp
from jax.experimental import pallas as pl
from jax.experimental.pallas import tpu as pltpu


# ---------------------------------------------------------------------------
# Pallas kernels
# ---------------------------------------------------------------------------
def _mm_act_kernel(a_ref, w_ref, b_ref, o_ref, *, act):
    y = jnp.dot(a_ref[...], w_ref[...], preferred_element_type=jnp.float32)
    y = y + b_ref[...]
    if act == "relu":
        y = jnp.maximum(y, 0.0)
    elif act == "sigmoid":
        y = jax.nn.sigmoid(y)
    elif act == "hardswish":
        y = y * jnp.clip(y + 3.0, 0.0, 6.0) * (1.0 / 6.0)
    o_ref[...] = y.astype(o_ref.dtype)


def mm_act(a, w, b, act="none", out_dtype=jnp.bfloat16):
    """act(a @ w + b); a:(M,K), w:(K,N), b:(N,). bf16 MXU, f32 accumulate."""
    M, K = a.shape
    N = w.shape[1]
    a = a.astype(jnp.bfloat16)
    w = w.astype(jnp.bfloat16)
    b2 = b.astype(jnp.float32).reshape(1, N)
    TM = M if M <= 256 else 256            # 256-row tiles fill the v6e/v7x MXU
    grid = (pl.cdiv(M, TM),)               # edge tile masked by Pallas (no host pad)
    return pl.pallas_call(
        functools.partial(_mm_act_kernel, act=act),
        out_shape=jax.ShapeDtypeStruct((M, N), out_dtype),
        grid=grid,
        in_specs=[pl.BlockSpec((TM, K), lambda i: (i, 0)),
                  pl.BlockSpec((K, N), lambda i: (0, 0)),
                  pl.BlockSpec((1, N), lambda i: (0, 0))],
        out_specs=pl.BlockSpec((TM, N), lambda i: (i, 0)),
        compiler_params=pltpu.CompilerParams(
            dimension_semantics=("parallel",)),
    )(a, w, b2)


def _tcn_s1_kernel(x_ref, w_ref, b_ref, o_ref, *, tw, V, T_out):
    # x_ref: (1, T_pad*V, C) bf16 ; w_ref: (tw, C, C) bf16 ; b_ref: (1, C) f32
    C = w_ref.shape[-1]
    acc = jnp.zeros((T_out * V, C), jnp.float32)
    for tau in range(tw):                  # read tw shifted windows from VMEM
        xt = x_ref[0, pl.ds(tau * V, T_out * V), :]
        acc = acc + jnp.dot(xt, w_ref[tau], preferred_element_type=jnp.float32)
    o_ref[0] = jnp.maximum(acc + b_ref[...], 0.0).astype(o_ref.dtype)


def tcn_stride1(x_pad, w, b, *, T_out, V):
    """Fused temporal conv (stride 1) + folded BN/residual + ReLU, per batch."""
    B, T_pad, _, C = x_pad.shape
    tw = w.shape[0]
    x2 = x_pad.reshape(B, T_pad * V, C).astype(jnp.bfloat16)
    out = pl.pallas_call(
        functools.partial(_tcn_s1_kernel, tw=tw, V=V, T_out=T_out),
        out_shape=jax.ShapeDtypeStruct((B, T_out * V, C), jnp.bfloat16),
        grid=(B,),
        in_specs=[pl.BlockSpec((1, T_pad * V, C), lambda i: (i, 0, 0)),
                  pl.BlockSpec((tw, C, C), lambda i: (0, 0, 0)),
                  pl.BlockSpec((1, C), lambda i: (0, 0))],
        out_specs=pl.BlockSpec((1, T_out * V, C), lambda i: (i, 0, 0)),
        compiler_params=pltpu.CompilerParams(
            dimension_semantics=("parallel",)),
    )(x2, w.astype(jnp.bfloat16), b.astype(jnp.float32).reshape(1, C))
    return out.reshape(B, T_out, V, C)


def _att_apply_kernel(x_ref, at_ref, av_ref, sc_ref, sh_ref, o_ref):
    x = x_ref[0].astype(jnp.float32)       # (T, V, C)
    at = at_ref[0].astype(jnp.float32)     # (T, C)
    av = av_ref[0].astype(jnp.float32)     # (V, C)
    y = x * at[:, None, :] * av[None, :, :]
    y = y * sc_ref[0] + sh_ref[0] + x      # folded BN affine + residual
    o_ref[0] = jnp.maximum(y, 0.0).astype(o_ref.dtype)


def att_apply(x, att_t, att_v, scale, shift):
    """relu( BN(x * att_t * att_v) + x ), fused elementwise, grid over batch."""
    B, T, V, C = x.shape
    return pl.pallas_call(
        _att_apply_kernel,
        out_shape=jax.ShapeDtypeStruct((B, T, V, C), jnp.bfloat16),
        grid=(B,),
        in_specs=[pl.BlockSpec((1, T, V, C), lambda i: (i, 0, 0, 0)),
                  pl.BlockSpec((1, T, C), lambda i: (i, 0, 0)),
                  pl.BlockSpec((1, V, C), lambda i: (i, 0, 0)),
                  pl.BlockSpec((1, 1, C), lambda i: (0, 0, 0)),
                  pl.BlockSpec((1, 1, C), lambda i: (0, 0, 0))],
        out_specs=pl.BlockSpec((1, T, V, C), lambda i: (i, 0, 0, 0)),
        compiler_params=pltpu.CompilerParams(
            dimension_semantics=("parallel",)),
    )(x.astype(jnp.bfloat16), att_t.astype(jnp.bfloat16),
      att_v.astype(jnp.bfloat16),
      scale.reshape(1, 1, C).astype(jnp.float32),
      shift.reshape(1, 1, C).astype(jnp.float32))


# ---------------------------------------------------------------------------
# Parameter initialization (mirrors init_param of the PyTorch reference)
# ---------------------------------------------------------------------------
class KeyGen:
    def __init__(self, key):
        self.key = key

    def __call__(self):
        self.key, sub = jax.random.split(self.key)
        return sub


def conv2d_init(kg, out_c, in_c, kh=1, kw=1):
    # kaiming_normal_(fan_out, leaky_relu); bias = 0
    fan_out = out_c * kh * kw
    gain = math.sqrt(2.0 / (1.0 + 0.01 ** 2))
    std = gain / math.sqrt(fan_out)
    w = std * jax.random.normal(kg(), (out_c, in_c, kh, kw), jnp.float32)
    b = jnp.zeros((out_c,), jnp.float32)
    return w, b


def bn_init(c):
    return dict(gamma=jnp.ones((c,), jnp.float32),
                beta=jnp.zeros((c,), jnp.float32),
                mean=jnp.zeros((c,), jnp.float32),
                var=jnp.ones((c,), jnp.float32))


def make_scn(kg, in_c, out_c, A):
    k = A.shape[0]
    w, b = conv2d_init(kg, out_c * k, in_c)
    p = dict(kind='scn', gcn_w=w.reshape(out_c * k, in_c), gcn_b=b,
             A=A, edge=jnp.ones_like(A), bn=bn_init(out_c), res=None)
    if in_c != out_c:                      # residual = Conv2d 1x1 + BN
        rw, rb = conv2d_init(kg, out_c, in_c)
        p['res'] = dict(w=rw.reshape(out_c, in_c), b=rb, bn=bn_init(out_c))
    return p


def make_tcn(kg, c, tw, stride):
    w, b = conv2d_init(kg, c, c, kh=tw, kw=1)
    p = dict(kind='tcn', w=w.reshape(c, c, tw), b=b, tw=tw, stride=stride,
             bn=bn_init(c), res_w=None, res_b=None)
    if stride != 1:                        # residual = strided 1x1 conv (no BN)
        rw, rb = conv2d_init(kg, c, c)
        p['res_w'] = rw.reshape(c, c)
        p['res_b'] = rb
    return p


def make_att(kg, c, reduct_ratio):
    inner = c // reduct_ratio
    fw, fb = conv2d_init(kg, inner, c)
    tw_, tb_ = conv2d_init(kg, c, inner)
    vw_, vb_ = conv2d_init(kg, c, inner)
    return dict(kind='att',
                fcn_w=fw.reshape(inner, c), fcn_b=fb, fcn_bn=bn_init(inner),
                t_w=tw_.reshape(c, inner), t_b=tb_,
                v_w=vw_.reshape(c, inner), v_b=vb_,
                att_bn=bn_init(c))


def make_blocks(kg, init_channel, block_args, A, tw, input_channel=0,
                reduct_ratio=2):
    layers = []
    if input_channel > 0:
        layers.append(dict(kind='bn', bn=bn_init(input_channel)))
        layers.append(make_scn(kg, input_channel, init_channel, A))
        layers.append(make_tcn(kg, init_channel, tw, 1))
    last = init_channel
    for (channel, stride, depth) in block_args:
        layers.append(make_scn(kg, last, channel, A))
        for j in range(depth):
            layers.append(make_tcn(kg, channel, tw, stride if j == 0 else 1))
        layers.append(make_att(kg, channel, reduct_ratio))
        last = channel
    return layers


def build_adjacency(V, max_graph_distance):
    # simple chain graph on V joints; hop-0 = identity, hop-1 = D^-1 A
    A1 = jnp.zeros((V, V), jnp.float32)
    idx = jnp.arange(V - 1)
    A1 = A1.at[idx, idx + 1].set(1.0).at[idx + 1, idx].set(1.0)
    deg = jnp.maximum(A1.sum(axis=1, keepdims=True), 1.0)
    hops = [jnp.eye(V, dtype=jnp.float32), A1 / deg]
    # TODO(synk): only hop distances 0/1 built; the original Graph supports larger max_graph_distance.
    return jnp.stack(hops[: max_graph_distance + 1], axis=0)


# ---------------------------------------------------------------------------
# Fold BN / residual / graph weights into fused inference weights
# ---------------------------------------------------------------------------
def _bn_affine(bn, eps=1e-5):
    scale = bn['gamma'] / jnp.sqrt(bn['var'] + eps)
    shift = bn['beta'] - bn['mean'] * scale
    return scale, shift


def fold_scn(p, in_bn=None):
    """Whole Spatial_Graph_Layer -> one (V*Cin, V*Cout) matmul weight.

    Pre-contracts the 1x1 gcn conv with A*edge, folds the main BN, the
    residual branch (identity or conv+BN) and an optional preceding input BN.
    """
    A_eff = p['A'] * p['edge']                          # (K, V, V)
    K, V, _ = A_eff.shape
    Cin = p['gcn_w'].shape[1]
    Cout = p['gcn_w'].shape[0] // K
    W = p['gcn_w'].reshape(K, Cout, Cin)                # W[k, c, i]
    bg = p['gcn_b'].reshape(K, Cout)
    # z[(w,c)] = sum_{v,i} x[(v,i)] * M[(v,i),(w,c)] + b[(w,c)]
    M = jnp.einsum('kci,kvw->viwc', W, A_eff).reshape(V * Cin, V * Cout)
    b = jnp.einsum('kc,kw->wc', bg, A_eff.sum(axis=1)).reshape(V * Cout)
    sm, tm = _bn_affine(p['bn'])                        # main BN (per c)
    sm_f, tm_f = jnp.tile(sm, V), jnp.tile(tm, V)
    M = M * sm_f[None, :]
    b = b * sm_f + tm_f
    if p['res'] is None:                                # identity residual
        M = M + jnp.eye(V * Cin, dtype=M.dtype)
    else:                                               # 1x1 conv + BN residual
        sr, tr = _bn_affine(p['res']['bn'])
        Rblk = (sr[:, None] * p['res']['w']).T          # (Cin, Cout)
        M = M + jnp.kron(jnp.eye(V, dtype=M.dtype), Rblk)
        b = b + jnp.tile(sr * p['res']['b'] + tr, V)
    if in_bn is not None:                               # fold preceding input BN
        si, ti = _bn_affine(in_bn)
        si_f, ti_f = jnp.tile(si, V), jnp.tile(ti, V)
        b = b + ti_f @ M
        M = M * si_f[:, None]
    return dict(kind='scn', W=M.astype(jnp.bfloat16), b=b.astype(jnp.float32),
                Cout=Cout)


def fold_tcn(p):
    C, _, tw = p['w'].shape
    s = p['stride']
    pad = (tw - 1) // 2
    sm, tm = _bn_affine(p['bn'])
    W = jnp.transpose(p['w'], (2, 1, 0)) * sm[None, None, :]   # (tw, ci, co)
    b = sm * p['b'] + tm
    if s == 1:                          # identity residual -> add to centre tap
        W = W.at[pad].add(jnp.eye(C, dtype=W.dtype))
    else:                               # strided 1x1 conv residual (no BN)
        W = W.at[pad].add(p['res_w'].T)
        b = b + p['res_b']
    return dict(kind='tcn', W=W.astype(jnp.bfloat16), b=b.astype(jnp.float32),
                tw=tw, stride=s, pad=pad)


def fold_att(p):
    sf, tf = _bn_affine(p['fcn_bn'])
    Wf = (sf[:, None] * p['fcn_w']).T                    # (C, inner)
    bf = sf * p['fcn_b'] + tf
    Wtv = jnp.concatenate([p['t_w'].T, p['v_w'].T], axis=1)   # (inner, 2C)
    btv = jnp.concatenate([p['t_b'], p['v_b']])
    sa, ta = _bn_affine(p['att_bn'])
    return dict(kind='att',
                Wf=Wf.astype(jnp.bfloat16), bf=bf.astype(jnp.float32),
                Wtv=Wtv.astype(jnp.bfloat16), btv=btv.astype(jnp.float32),
                scale=sa, shift=ta)


def fold_blocks(layers):
    folded, pending_bn = [], None
    for p in layers:
        if p['kind'] == 'bn':
            pending_bn = p['bn']
        elif p['kind'] == 'scn':
            folded.append(fold_scn(p, in_bn=pending_bn))
            pending_bn = None
        elif p['kind'] == 'tcn':
            folded.append(fold_tcn(p))
        else:
            folded.append(fold_att(p))
    return folded


def init_efficientgcn(key, data_shape, block_args, fusion_stage, stem_channel,
                      kernel_size, num_class, reduct_ratio):
    I, C, T, V, M = data_shape
    tw, mgd = kernel_size
    A = build_adjacency(V, mgd)
    kg = KeyGen(key)
    branches = [make_blocks(kg, stem_channel, block_args[:fusion_stage], A, tw,
                            input_channel=C, reduct_ratio=reduct_ratio)
                for _ in range(I)]
    main = make_blocks(kg,
                       I * (stem_channel if fusion_stage == 0
                            else block_args[fusion_stage - 1][0]),
                       block_args[fusion_stage:], A, tw,
                       input_channel=0, reduct_ratio=reduct_ratio)
    cls_channel = (I * block_args[-1][0] if fusion_stage == len(block_args)
                   else block_args[-1][0])
    # classifier Conv3d 1x1x1: normal(std=0.001), bias 0
    fc_w = 0.001 * jax.random.normal(kg(), (num_class, cls_channel), jnp.float32)
    fc_b = jnp.zeros((num_class,), jnp.float32)
    return dict(branches=[fold_blocks(br) for br in branches],
                main=fold_blocks(main),
                fc_w=fc_w.T.astype(jnp.bfloat16), fc_b=fc_b)


# ---------------------------------------------------------------------------
# Layer forward functions (one fused Pallas call per SCN / TCN layer)
# ---------------------------------------------------------------------------
def apply_scn(x, p):
    B, T, V, C = x.shape
    y = mm_act(x.reshape(B * T, V * C), p['W'], p['b'], act='relu')
    return y.reshape(B, T, V, p['Cout'])


def apply_tcn(x, p):
    B, T, V, C = x.shape
    tw, s, pad = p['tw'], p['stride'], p['pad']
    T_out = (T + 2 * pad - tw) // s + 1
    xp = jnp.pad(x, ((0, 0), (pad, pad), (0, 0), (0, 0)))
    if s == 1:
        return tcn_stride1(xp, p['W'], p['b'], T_out=T_out, V=V)
    # strided temporal conv: tw strided slices + one fused matmul
    taps = [xp[:, tau: tau + s * (T_out - 1) + 1: s] for tau in range(tw)]
    xc = jnp.concatenate(taps, axis=-1).reshape(B * T_out * V, tw * C)
    y = mm_act(xc, p['W'].reshape(tw * C, C), p['b'], act='relu')
    return y.reshape(B, T_out, V, C)


def apply_att(x, p):
    B, T, V, C = x.shape
    x_t = jnp.mean(x, axis=2, dtype=jnp.float32)        # pool over V -> (B,T,C)
    x_v = jnp.mean(x, axis=1, dtype=jnp.float32)        # pool over T -> (B,V,C)
    cat = jnp.concatenate([x_t, x_v], axis=1).reshape(B * (T + V), C)
    h = mm_act(cat, p['Wf'], p['bf'], act='hardswish')
    tv = mm_act(h, p['Wtv'], p['btv'], act='sigmoid').reshape(B, T + V, 2 * C)
    att_t = tv[:, :T, :C]
    att_v = tv[:, T:, C:]
    return att_apply(x, att_t, att_v, p['scale'], p['shift'])


def apply_blocks(x, layers):
    for p in layers:
        if p['kind'] == 'scn':
            x = apply_scn(x, p)
        elif p['kind'] == 'tcn':
            x = apply_tcn(x, p)
        else:
            x = apply_att(x, p)
    return x


def efficientgcn_forward(x, params):
    """x: (N, I, C, T, V, M) -> (logits (N, num_class), feature (N, C', T', V, M))."""
    N, I, C, T, V, M = x.shape
    x = (jnp.transpose(x, (1, 0, 5, 3, 4, 2))           # (I, N, M, T, V, C)
         .reshape(I, N * M, T, V, C).astype(jnp.bfloat16))
    outs = [apply_blocks(x[i], params['branches'][i]) for i in range(I)]
    x = jnp.concatenate(outs, axis=-1)                  # channel concat (last dim)
    x = apply_blocks(x, params['main'])
    _, T2, V2, C2 = x.shape
    x5 = x.reshape(N, M, T2, V2, C2)
    feature = jnp.transpose(x5, (0, 4, 2, 3, 1)).astype(jnp.float32)  # (N,C,T,V,M)
    # Classifier: AdaptiveAvgPool3d(1) -> Dropout(eval=identity) -> Conv3d 1x1x1
    pooled = jnp.mean(x5, axis=(1, 2, 3), dtype=jnp.float32)          # (N, C)
    out = mm_act(pooled, params['fc_w'], params['fc_b'], act='none',
                 out_dtype=jnp.float32)
    return out, feature


# ---------------------------------------------------------------------------
if __name__ == "__main__":
    # Small synthetic config:
    #   I=2 input branches, C=3 input channels, T=8 frames, V=8 joints, M=2 persons
    N, I, C, T, V, M = 2, 2, 3, 8, 8, 2
    block_args = [[8, 1, 1], [16, 2, 1]]       # (channel, stride, depth)
    fusion_stage = 1
    stem_channel = 8
    kernel_size = (3, 1)                       # (temporal_window, max_graph_distance)
    num_class = 5

    params = init_efficientgcn(jax.random.PRNGKey(1),
                               data_shape=(I, C, T, V, M),
                               block_args=block_args,
                               fusion_stage=fusion_stage,
                               stem_channel=stem_channel,
                               kernel_size=kernel_size,
                               num_class=num_class,
                               reduct_ratio=2)

    x = jax.random.normal(jax.random.PRNGKey(0), (N, I, C, T, V, M), jnp.float32)

    fwd = jax.jit(lambda inp: efficientgcn_forward(inp, params))
    out, feature = fwd(x)
    out = jax.block_until_ready(out)
    feature = jax.block_until_ready(feature)

    assert out.shape == (N, num_class), out.shape
    assert feature.shape == (N, block_args[-1][0], 4, V, M), feature.shape
    assert jnp.all(jnp.isfinite(out)) and jnp.all(jnp.isfinite(feature))
    print("KERNEL_OK")
</pallas_src>

<mosaic_0001>
module attributes {stable_mosaic.version = 11 : i64} {
  func.func @_mm_act_kernel(%arg0: i32, %arg1: memref<32x64xbf16, #tpu.memory_space<vmem>>, %arg2: memref<64x64xbf16, #tpu.memory_space<vmem>>, %arg3: memref<1x64xf32, #tpu.memory_space<vmem>>, %arg4: memref<32x64xbf16, #tpu.memory_space<vmem>>) attributes {dimension_semantics = [#tpu.dimension_semantics<parallel>], iteration_bounds = array<i64: 1>, scalar_prefetch = 0 : i64, scratch_operands = 0 : i64, tpu.core_type = #tpu.core_type<tc>, window_params = [{transform_indices = @transform_0, window_bounds = array<i64: 32, 64>}, {pipeline_mode = #tpu.pipeline_mode<synchronous>, transform_indices = @transform_1, window_bounds = array<i64: 64, 64>}, {pipeline_mode = #tpu.pipeline_mode<synchronous>, transform_indices = @transform_2, window_bounds = array<i64: 1, 64>}, {transform_indices = @transform_3, window_bounds = array<i64: 32, 64>}]} {
    %c0 = arith.constant 0 : index
    %c0_0 = arith.constant 0 : index
    %0 = vector.load %arg1[%c0, %c0_0] : memref<32x64xbf16, #tpu.memory_space<vmem>>, vector<32x64xbf16>
    %c0_1 = arith.constant 0 : index
    %c0_2 = arith.constant 0 : index
    %1 = vector.load %arg2[%c0_1, %c0_2] : memref<64x64xbf16, #tpu.memory_space<vmem>>, vector<64x64xbf16>
    %cst = arith.constant dense<0.000000e+00> : vector<32x64xf32>
    %2 = tpu.matmul %0, %1, %cst {dimension_numbers = #tpu.dot_dimension_numbers<[1], [0], [0], [1], [0, 0, 1, 1], [], []>} : vector<32x64xbf16>, vector<64x64xbf16>, vector<32x64xf32> -> vector<32x64xf32>
    %c0_3 = arith.constant 0 : index
    %c0_4 = arith.constant 0 : index
    %3 = vector.load %arg3[%c0_3, %c0_4] : memref<1x64xf32, #tpu.memory_space<vmem>>, vector<1x64xf32>
    %4 = vector.broadcast %3 : vector<1x64xf32> to vector<32x64xf32>
    %5 = arith.addf %2, %4 : vector<32x64xf32>
    %cst_5 = arith.constant 0.000000e+00 : f32
    %6 = vector.broadcast %cst_5 : f32 to vector<32x64xf32>
    %7 = arith.maximumf %5, %6 : vector<32x64xf32>
    %8 = arith.truncf %7 : vector<32x64xf32> to vector<32x64xbf16>
    %c0_6 = arith.constant 0 : index
    %c0_7 = arith.constant 0 : index
    %9 = vector.load %arg4[%c0_6, %c0_7] : memref<32x64xbf16, #tpu.memory_space<vmem>>, vector<32x64xbf16>
    tpu.vector_store %arg4[%c0_6, %c0_7], %8 {strides = array<i32>} : memref<32x64xbf16, #tpu.memory_space<vmem>>, vector<32x64xbf16>,
    return
  }
  func.func @transform_0(%arg0: i32) -> (i32, i32) {
    %c0_i32 = arith.constant 0 : i32
    %c0_i32_0 = arith.constant 0 : i32
    return %arg0, %c0_i32 : i32, i32
  }
  func.func @transform_1(%arg0: i32) -> (i32, i32) {
    %c0_i32 = arith.constant 0 : i32
    %c0_i32_0 = arith.constant 0 : i32
    %c0_i32_1 = arith.constant 0 : i32
    return %c0_i32, %c0_i32_0 : i32, i32
  }
  func.func @transform_2(%arg0: i32) -> (i32, i32) {
    %c0_i32 = arith.constant 0 : i32
    %c0_i32_0 = arith.constant 0 : i32
    %c0_i32_1 = arith.constant 0 : i32
    return %c0_i32, %c0_i32_0 : i32, i32
  }
  func.func @transform_3(%arg0: i32) -> (i32, i32) {
    %c0_i32 = arith.constant 0 : i32
    %c0_i32_0 = arith.constant 0 : i32
    return %arg0, %c0_i32 : i32, i32
  }
}

module attributes {stable_mosaic.version = 11 : i64} {
  func.func @_tcn_s1_kernel(%arg0: i32, %arg1: memref<1x80x8xbf16, #tpu.memory_space<vmem>>, %arg2: memref<3x8x8xbf16, #tpu.memory_space<vmem>>, %arg3: memref<1x8xf32, #tpu.memory_space<vmem>>, %arg4: memref<1x64x8xbf16, #tpu.memory_space<vmem>>) attributes {dimension_semantics = [#tpu.dimension_semantics<parallel>], iteration_bounds = array<i64: 4>, scalar_prefetch = 0 : i64, scratch_operands = 0 : i64, tpu.core_type = #tpu.core_type<tc>, window_params = [{transform_indices = @transform_0, window_bounds = array<i64: 1, 80, 8>}, {pipeline_mode = #tpu.pipeline_mode<synchronous>, transform_indices = @transform_1, window_bounds = array<i64: 3, 8, 8>}, {pipeline_mode = #tpu.pipeline_mode<synchronous>, transform_indices = @transform_2, window_bounds = array<i64: 1, 8>}, {transform_indices = @transform_3, window_bounds = array<i64: 1, 64, 8>}]} {
    %cst = arith.constant 0.000000e+00 : f32
    %0 = vector.broadcast %cst : f32 to vector<64x8xf32>
    %c0 = arith.constant 0 : index
    %c0_0 = arith.constant 0 : index
    %c0_1 = arith.constant 0 : index
    %1 = vector.load %arg1[%c0, %c0_0, %c0_1] : memref<1x80x8xbf16, #tpu.memory_space<vmem>>, vector<1x64x8xbf16>
    %2 = vector.shape_cast %1 : vector<1x64x8xbf16> to vector<64x8xbf16>
    %c0_2 = arith.constant 0 : index
    %c0_3 = arith.constant 0 : index
    %c0_4 = arith.constant 0 : index
    %3 = vector.load %arg2[%c0_2, %c0_3, %c0_4] : memref<3x8x8xbf16, #tpu.memory_space<vmem>>, vector<1x8x8xbf16>
    %4 = vector.shape_cast %3 : vector<1x8x8xbf16> to vector<8x8xbf16>
    %cst_5 = arith.constant dense<0.000000e+00> : vector<64x8xf32>
    %5 = tpu.matmul %2, %4, %cst_5 {dimension_numbers = #tpu.dot_dimension_numbers<[1], [0], [0], [1], [0, 0, 1, 1], [], []>} : vector<64x8xbf16>, vector<8x8xbf16>, vector<64x8xf32> -> vector<64x8xf32>
    %6 = arith.addf %0, %5 : vector<64x8xf32>
    %c0_6 = arith.constant 0 : index
    %c8 = arith.constant 8 : index
    %c0_7 = arith.constant 0 : index
    %7 = vector.load %arg1[%c0_6, %c8, %c0_7] : memref<1x80x8xbf16, #tpu.memory_space<vmem>>, vector<1x64x8xbf16>
    %8 = vector.shape_cast %7 : vector<1x64x8xbf16> to vector<64x8xbf16>
    %c1 = arith.constant 1 : index
    %c0_8 = arith.constant 0 : index
    %c0_9 = arith.constant 0 : index
    %9 = vector.load %arg2[%c1, %c0_8, %c0_9] : memref<3x8x8xbf16, #tpu.memory_space<vmem>>, vector<1x8x8xbf16>
    %10 = vector.shape_cast %9 : vector<1x8x8xbf16> to vector<8x8xbf16>
    %cst_10 = arith.constant dense<0.000000e+00> : vector<64x8xf32>
    %11 = tpu.matmul %8, %10, %cst_10 {dimension_numbers = #tpu.dot_dimension_numbers<[1], [0], [0], [1], [0, 0, 1, 1], [], []>} : vector<64x8xbf16>, vector<8x8xbf16>, vector<64x8xf32> -> vector<64x8xf32>
    %12 = arith.addf %6, %11 : vector<64x8xf32>
    %c0_11 = arith.constant 0 : index
    %c16 = arith.constant 16 : index
    %c0_12 = arith.constant 0 : index
    %13 = vector.load %arg1[%c0_11, %c16, %c0_12] : memref<1x80x8xbf16, #tpu.memory_space<vmem>>, vector<1x64x8xbf16>
    %14 = vector.shape_cast %13 : vector<1x64x8xbf16> to vector<64x8xbf16>
    %c2 = arith.constant 2 : index
    %c0_13 = arith.constant 0 : index
    %c0_14 = arith.constant 0 : index
    %15 = vector.load %arg2[%c2, %c0_13, %c0_14] : memref<3x8x8xbf16, #tpu.memory_space<vmem>>, vector<1x8x8xbf16>
    %16 = vector.shape_cast %15 : vector<1x8x8xbf16> to vector<8x8xbf16>
    %cst_15 = arith.constant dense<0.000000e+00> : vector<64x8xf32>
    %17 = tpu.matmul %14, %16, %cst_15 {dimension_numbers = #tpu.dot_dimension_numbers<[1], [0], [0], [1], [0, 0, 1, 1], [], []>} : vector<64x8xbf16>, vector<8x8xbf16>, vector<64x8xf32> -> vector<64x8xf32>
    %18 = arith.addf %12, %17 : vector<64x8xf32>
    %c0_16 = arith.constant 0 : index
    %c0_17 = arith.constant 0 : index
    %19 = vector.load %arg3[%c0_16, %c0_17] : memref<1x8xf32, #tpu.memory_space<vmem>>, vector<1x8xf32>
    %20 = vector.broadcast %19 : vector<1x8xf32> to vector<64x8xf32>
    %21 = arith.addf %18, %20 : vector<64x8xf32>
    %cst_18 = arith.constant 0.000000e+00 : f32
    %22 = vector.broadcast %cst_18 : f32 to vector<64x8xf32>
    %23 = arith.maximumf %21, %22 : vector<64x8xf32>
    %24 = arith.truncf %23 : vector<64x8xf32> to vector<64x8xbf16>
    %c0_19 = arith.constant 0 : index
    %c0_20 = arith.constant 0 : index
    %c0_21 = arith.constant 0 : index
    %25 = vector.load %arg4[%c0_19, %c0_20, %c0_21] : memref<1x64x8xbf16, #tpu.memory_space<vmem>>, vector<1x64x8xbf16>
    %26 = vector.shape_cast %25 : vector<1x64x8xbf16> to vector<64x8xbf16>
    %27 = vector.shape_cast %24 : vector<64x8xbf16> to vector<1x64x8xbf16>
    tpu.vector_store %arg4[%c0_19, %c0_20, %c0_21], %27 {strides = array<i32>} : memref<1x64x8xbf16, #tpu.memory_space<vmem>>, vector<1x64x8xbf16>,
    return
  }
  func.func @transform_0(%arg0: i32) -> (i32, i32, i32) {
    %c0_i32 = arith.constant 0 : i32
    %c0_i32_0 = arith.constant 0 : i32
    %c0_i32_1 = arith.constant 0 : i32
    return %arg0, %c0_i32, %c0_i32_0 : i32, i32, i32
  }
  func.func @transform_1(%arg0: i32) -> (i32, i32, i32) {
    %c0_i32 = arith.constant 0 : i32
    %c0_i32_0 = arith.constant 0 : i32
    %c0_i32_1 = arith.constant 0 : i32
    %c0_i32_2 = arith.constant 0 : i32
    return %c0_i32, %c0_i32_0, %c0_i32_1 : i32, i32, i32
  }
  func.func @transform_2(%arg0: i32) -> (i32, i32) {
    %c0_i32 = arith.constant 0 : i32
    %c0_i32_0 = arith.constant 0 : i32
    %c0_i32_1 = arith.constant 0 : i32
    return %c0_i32, %c0_i32_0 : i32, i32
  }
  func.func @transform_3(%arg0: i32) -> (i32, i32, i32) {
    %c0_i32 = arith.constant 0 : i32
    %c0_i32_0 = arith.constant 0 : i32
    %c0_i32_1 = arith.constant 0 : i32
    return %arg0, %c0_i32, %c0_i32_0 : i32, i32, i32
  }
}

module attributes {stable_mosaic.version = 11 : i64} {
  func.func @_mm_act_kernel(%arg0: i32, %arg1: memref<32x24xbf16, #tpu.memory_space<vmem>>, %arg2: memref<24x64xbf16, #tpu.memory_space<vmem>>, %arg3: memref<1x64xf32, #tpu.memory_space<vmem>>, %arg4: memref<32x64xbf16, #tpu.memory_space<vmem>>) attributes {dimension_semantics = [#tpu.dimension_semantics<parallel>], iteration_bounds = array<i64: 1>, scalar_prefetch = 0 : i64, scratch_operands = 0 : i64, tpu.core_type = #tpu.core_type<tc>, window_params = [{transform_indices = @transform_0, window_bounds = array<i64: 32, 24>}, {pipeline_mode = #tpu.pipeline_mode<synchronous>, transform_indices = @transform_1, window_bounds = array<i64: 24, 64>}, {pipeline_mode = #tpu.pipeline_mode<synchronous>, transform_indices = @transform_2, window_bounds = array<i64: 1, 64>}, {transform_indices = @transform_3, window_bounds = array<i64: 32, 64>}]} {
    %c0 = arith.constant 0 : index
    %c0_0 = arith.constant 0 : index
    %0 = vector.load %arg1[%c0, %c0_0] : memref<32x24xbf16, #tpu.memory_space<vmem>>, vector<32x24xbf16>
    %c0_1 = arith.constant 0 : index
    %c0_2 = arith.constant 0 : index
    %1 = vector.load %arg2[%c0_1, %c0_2] : memref<24x64xbf16, #tpu.memory_space<vmem>>, vector<24x64xbf16>
    %cst = arith.constant dense<0.000000e+00> : vector<32x64xf32>
    %2 = tpu.matmul %0, %1, %cst {dimension_numbers = #tpu.dot_dimension_numbers<[1], [0], [0], [1], [0, 0, 1, 1], [], []>} : vector<32x24xbf16>, vector<24x64xbf16>, vector<32x64xf32> -> vector<32x64xf32>
    %c0_3 = arith.constant 0 : index
    %c0_4 = arith.constant 0 : index
    %3 = vector.load %arg3[%c0_3, %c0_4] : memref<1x64xf32, #tpu.memory_space<vmem>>, vector<1x64xf32>
    %4 = vector.broadcast %3 : vector<1x64xf32> to vector<32x64xf32>
    %5 = arith.addf %2, %4 : vector<32x64xf32>
    %cst_5 = arith.constant 0.000000e+00 : f32
    %6 = vector.broadcast %cst_5 : f32 to vector<32x64xf32>
    %7 = arith.maximumf %5, %6 : vector<32x64xf32>
    %8 = arith.truncf %7 : vector<32x64xf32> to vector<32x64xbf16>
    %c0_6 = arith.constant 0 : index
    %c0_7 = arith.constant 0 : index
    %9 = vector.load %arg4[%c0_6, %c0_7] : memref<32x64xbf16, #tpu.memory_space<vmem>>, vector<32x64xbf16>
    tpu.vector_store %arg4[%c0_6, %c0_7], %8 {strides = array<i32>} : memref<32x64xbf16, #tpu.memory_space<vmem>>, vector<32x64xbf16>,
    return
  }
  func.func @transform_0(%arg0: i32) -> (i32, i32) {
    %c0_i32 = arith.constant 0 : i32
    %c0_i32_0 = arith.constant 0 : i32
    return %arg0, %c0_i32 : i32, i32
  }
  func.func @transform_1(%arg0: i32) -> (i32, i32) {
    %c0_i32 = arith.constant 0 : i32
    %c0_i32_0 = arith.constant 0 : i32
    %c0_i32_1 = arith.constant 0 : i32
    return %c0_i32, %c0_i32_0 : i32, i32
  }
  func.func @transform_2(%arg0: i32) -> (i32, i32) {
    %c0_i32 = arith.constant 0 : i32
    %c0_i32_0 = arith.constant 0 : i32
    %c0_i32_1 = arith.constant 0 : i32
    return %c0_i32, %c0_i32_0 : i32, i32
  }
  func.func @transform_3(%arg0: i32) -> (i32, i32) {
    %c0_i32 = arith.constant 0 : i32
    %c0_i32_0 = arith.constant 0 : i32
    return %arg0, %c0_i32 : i32, i32
  }
}

module attributes {stable_mosaic.version = 11 : i64} {
  func.func @_mm_act_kernel(%arg0: i32, %arg1: memref<64x8xbf16, #tpu.memory_space<vmem>>, %arg2: memref<8x4xbf16, #tpu.memory_space<vmem>>, %arg3: memref<1x4xf32, #tpu.memory_space<vmem>>, %arg4: memref<64x4xbf16, #tpu.memory_space<vmem>>) attributes {dimension_semantics = [#tpu.dimension_semantics<parallel>], iteration_bounds = array<i64: 1>, scalar_prefetch = 0 : i64, scratch_operands = 0 : i64, tpu.core_type = #tpu.core_type<tc>, window_params = [{transform_indices = @transform_0, window_bounds = array<i64: 64, 8>}, {pipeline_mode = #tpu.pipeline_mode<synchronous>, transform_indices = @transform_1, window_bounds = array<i64: 8, 4>}, {pipeline_mode = #tpu.pipeline_mode<synchronous>, transform_indices = @transform_2, window_bounds = array<i64: 1, 4>}, {transform_indices = @transform_3, window_bounds = array<i64: 64, 4>}]} {
    %c0 = arith.constant 0 : index
    %c0_0 = arith.constant 0 : index
    %0 = vector.load %arg1[%c0, %c0_0] : memref<64x8xbf16, #tpu.memory_space<vmem>>, vector<64x8xbf16>
    %c0_1 = arith.constant 0 : index
    %c0_2 = arith.constant 0 : index
    %1 = vector.load %arg2[%c0_1, %c0_2] : memref<8x4xbf16, #tpu.memory_space<vmem>>, vector<8x4xbf16>
    %cst = arith.constant dense<0.000000e+00> : vector<64x4xf32>
    %2 = tpu.matmul %0, %1, %cst {dimension_numbers = #tpu.dot_dimension_numbers<[1], [0], [0], [1], [0, 0, 1, 1], [], []>} : vector<64x8xbf16>, vector<8x4xbf16>, vector<64x4xf32> -> vector<64x4xf32>
    %c0_3 = arith.constant 0 : index
    %c0_4 = arith.constant 0 : index
    %3 = vector.load %arg3[%c0_3, %c0_4] : memref<1x4xf32, #tpu.memory_space<vmem>>, vector<1x4xf32>
    %4 = vector.broadcast %3 : vector<1x4xf32> to vector<64x4xf32>
    %5 = arith.addf %2, %4 : vector<64x4xf32>
    %cst_5 = arith.constant 3.000000e+00 : f32
    %6 = vector.broadcast %cst_5 : f32 to vector<64x4xf32>
    %7 = arith.addf %5, %6 : vector<64x4xf32>
    %cst_6 = arith.constant 0.000000e+00 : f32
    %cst_7 = arith.constant 6.000000e+00 : f32
    %8 = vector.broadcast %cst_6 : f32 to vector<64x4xf32>
    %9 = arith.maximumf %8, %7 : vector<64x4xf32>
    %10 = vector.broadcast %cst_7 : f32 to vector<64x4xf32>
    %11 = arith.minimumf %10, %9 : vector<64x4xf32>
    %12 = arith.mulf %5, %11 : vector<64x4xf32>
    %cst_8 = arith.constant 0.166666672 : f32
    %13 = vector.broadcast %cst_8 : f32 to vector<64x4xf32>
    %14 = arith.mulf %12, %13 : vector<64x4xf32>
    %15 = arith.truncf %14 : vector<64x4xf32> to vector<64x4xbf16>
    %c0_9 = arith.constant 0 : index
    %c0_10 = arith.constant 0 : index
    %16 = vector.load %arg4[%c0_9, %c0_10] : memref<64x4xbf16, #tpu.memory_space<vmem>>, vector<64x4xbf16>
    tpu.vector_store %arg4[%c0_9, %c0_10], %15 {strides = array<i32>} : memref<64x4xbf16, #tpu.memory_space<vmem>>, vector<64x4xbf16>,
    return
  }
  func.func @transform_0(%arg0: i32) -> (i32, i32) {
    %c0_i32 = arith.constant 0 : i32
    %c0_i32_0 = arith.constant 0 : i32
    return %arg0, %c0_i32 : i32, i32
  }
  func.func @transform_1(%arg0: i32) -> (i32, i32) {
    %c0_i32 = arith.constant 0 : i32
    %c0_i32_0 = arith.constant 0 : i32
    %c0_i32_1 = arith.constant 0 : i32
    return %c0_i32, %c0_i32_0 : i32, i32
  }
  func.func @transform_2(%arg0: i32) -> (i32, i32) {
    %c0_i32 = arith.constant 0 : i32
    %c0_i32_0 = arith.constant 0 : i32
    %c0_i32_1 = arith.constant 0 : i32
    return %c0_i32, %c0_i32_0 : i32, i32
  }
  func.func @transform_3(%arg0: i32) -> (i32, i32) {
    %c0_i32 = arith.constant 0 : i32
    %c0_i32_0 = arith.constant 0 : i32
    return %arg0, %c0_i32 : i32, i32
  }
}

module attributes {stable_mosaic.version = 11 : i64} {
  func.func @_mm_act_kernel(%arg0: i32, %arg1: memref<64x4xbf16, #tpu.memory_space<vmem>>, %arg2: memref<4x16xbf16, #tpu.memory_space<vmem>>, %arg3: memref<1x16xf32, #tpu.memory_space<vmem>>, %arg4: memref<64x16xbf16, #tpu.memory_space<vmem>>) attributes {dimension_semantics = [#tpu.dimension_semantics<parallel>], iteration_bounds = array<i64: 1>, scalar_prefetch = 0 : i64, scratch_operands = 0 : i64, tpu.core_type = #tpu.core_type<tc>, window_params = [{transform_indices = @transform_0, window_bounds = array<i64: 64, 4>}, {pipeline_mode = #tpu.pipeline_mode<synchronous>, transform_indices = @transform_1, window_bounds = array<i64: 4, 16>}, {pipeline_mode = #tpu.pipeline_mode<synchronous>, transform_indices = @transform_2, window_bounds = array<i64: 1, 16>}, {transform_indices = @transform_3, window_bounds = array<i64: 64, 16>}]} {
    %c0 = arith.constant 0 : index
    %c0_0 = arith.constant 0 : index
    %0 = vector.load %arg1[%c0, %c0_0] : memref<64x4xbf16, #tpu.memory_space<vmem>>, vector<64x4xbf16>
    %c0_1 = arith.constant 0 : index
    %c0_2 = arith.constant 0 : index
    %1 = vector.load %arg2[%c0_1, %c0_2] : memref<4x16xbf16, #tpu.memory_space<vmem>>, vector<4x16xbf16>
    %cst = arith.constant dense<0.000000e+00> : vector<64x16xf32>
    %2 = tpu.matmul %0, %1, %cst {dimension_numbers = #tpu.dot_dimension_numbers<[1], [0], [0], [1], [0, 0, 1, 1], [], []>} : vector<64x4xbf16>, vector<4x16xbf16>, vector<64x16xf32> -> vector<64x16xf32>
    %c0_3 = arith.constant 0 : index
    %c0_4 = arith.constant 0 : index
    %3 = vector.load %arg3[%c0_3, %c0_4] : memref<1x16xf32, #tpu.memory_space<vmem>>, vector<1x16xf32>
    %4 = vector.broadcast %3 : vector<1x16xf32> to vector<64x16xf32>
    %5 = arith.addf %2, %4 : vector<64x16xf32>
    %6 = arith.negf %5 : vector<64x16xf32>
    %7 = math.exp %6 : vector<64x16xf32>
    %cst_5 = arith.constant 1.000000e+00 : f32
    %8 = vector.broadcast %cst_5 : f32 to vector<64x16xf32>
    %9 = arith.addf %8, %7 : vector<64x16xf32>
    %10 = arith.divf %8, %9 : vector<64x16xf32>
    %11 = arith.truncf %10 : vector<64x16xf32> to vector<64x16xbf16>
    %c0_6 = arith.constant 0 : index
    %c0_7 = arith.constant 0 : index
    %12 = vector.load %arg4[%c0_6, %c0_7] : memref<64x16xbf16, #tpu.memory_space<vmem>>, vector<64x16xbf16>
    tpu.vector_store %arg4[%c0_6, %c0_7], %11 {strides = array<i32>} : memref<64x16xbf16, #tpu.memory_space<vmem>>, vector<64x16xbf16>,
    return
  }
  func.func @transform_0(%arg0: i32) -> (i32, i32) {
    %c0_i32 = arith.constant 0 : i32
    %c0_i32_0 = arith.constant 0 : i32
    return %arg0, %c0_i32 : i32, i32
  }
  func.func @transform_1(%arg0: i32) -> (i32, i32) {
    %c0_i32 = arith.constant 0 : i32
    %c0_i32_0 = arith.constant 0 : i32
    %c0_i32_1 = arith.constant 0 : i32
    return %c0_i32, %c0_i32_0 : i32, i32
  }
  func.func @transform_2(%arg0: i32) -> (i32, i32) {
    %c0_i32 = arith.constant 0 : i32
    %c0_i32_0 = arith.constant 0 : i32
    %c0_i32_1 = arith.constant 0 : i32
    return %c0_i32, %c0_i32_0 : i32, i32
  }
  func.func @transform_3(%arg0: i32) -> (i32, i32) {
    %c0_i32 = arith.constant 0 : i32
    %c0_i32_0 = arith.constant 0 : i32
    return %arg0, %c0_i32 : i32, i32
  }
}

module attributes {stable_mosaic.version = 11 : i64} {
  func.func @_mm_act_kernel(%arg0: i32, %arg1: memref<32x128xbf16, #tpu.memory_space<vmem>>, %arg2: memref<128x128xbf16, #tpu.memory_space<vmem>>, %arg3: memref<1x128xf32, #tpu.memory_space<vmem>>, %arg4: memref<32x128xbf16, #tpu.memory_space<vmem>>) attributes {dimension_semantics = [#tpu.dimension_semantics<parallel>], iteration_bounds = array<i64: 1>, scalar_prefetch = 0 : i64, scratch_operands = 0 : i64, tpu.core_type = #tpu.core_type<tc>, window_params = [{transform_indices = @transform_0, window_bounds = array<i64: 32, 128>}, {pipeline_mode = #tpu.pipeline_mode<synchronous>, transform_indices = @transform_1, window_bounds = array<i64: 128, 128>}, {pipeline_mode = #tpu.pipeline_mode<synchronous>, transform_indices = @transform_2, window_bounds = array<i64: 1, 128>}, {transform_indices = @transform_3, window_bounds = array<i64: 32, 128>}]} {
    %c0 = arith.constant 0 : index
    %c0_0 = arith.constant 0 : index
    %0 = vector.load %arg1[%c0, %c0_0] : memref<32x128xbf16, #tpu.memory_space<vmem>>, vector<32x128xbf16>
    %c0_1 = arith.constant 0 : index
    %c0_2 = arith.constant 0 : index
    %1 = vector.load %arg2[%c0_1, %c0_2] : memref<128x128xbf16, #tpu.memory_space<vmem>>, vector<128x128xbf16>
    %cst = arith.constant dense<0.000000e+00> : vector<32x128xf32>
    %2 = tpu.matmul %0, %1, %cst {dimension_numbers = #tpu.dot_dimension_numbers<[1], [0], [0], [1], [0, 0, 1, 1], [], []>} : vector<32x128xbf16>, vector<128x128xbf16>, vector<32x128xf32> -> vector<32x128xf32>
    %c0_3 = arith.constant 0 : index
    %c0_4 = arith.constant 0 : index
    %3 = vector.load %arg3[%c0_3, %c0_4] : memref<1x128xf32, #tpu.memory_space<vmem>>, vector<1x128xf32>
    %4 = vector.broadcast %3 : vector<1x128xf32> to vector<32x128xf32>
    %5 = arith.addf %2, %4 : vector<32x128xf32>
    %cst_5 = arith.constant 0.000000e+00 : f32
    %6 = vector.broadcast %cst_5 : f32 to vector<32x128xf32>
    %7 = arith.maximumf %5, %6 : vector<32x128xf32>
    %8 = arith.truncf %7 : vector<32x128xf32> to vector<32x128xbf16>
    %c0_6 = arith.constant 0 : index
    %c0_7 = arith.constant 0 : index
    %9 = vector.load %arg4[%c0_6, %c0_7] : memref<32x128xbf16, #tpu.memory_space<vmem>>, vector<32x128xbf16>
    tpu.vector_store %arg4[%c0_6, %c0_7], %8 {strides = array<i32>} : memref<32x128xbf16, #tpu.memory_space<vmem>>, vector<32x128xbf16>,
    return
  }
  func.func @transform_0(%arg0: i32) -> (i32, i32) {
    %c0_i32 = arith.constant 0 : i32
    %c0_i32_0 = arith.constant 0 : i32
    return %arg0, %c0_i32 : i32, i32
  }
  func.func @transform_1(%arg0: i32) -> (i32, i32) {
    %c0_i32 = arith.constant 0 : i32
    %c0_i32_0 = arith.constant 0 : i32
    %c0_i32_1 = arith.constant 0 : i32
    return %c0_i32, %c0_i32_0 : i32, i32
  }
  func.func @transform_2(%arg0: i32) -> (i32, i32) {
    %c0_i32 = arith.constant 0 : i32
    %c0_i32_0 = arith.constant 0 : i32
    %c0_i32_1 = arith.constant 0 : i32
    return %c0_i32, %c0_i32_0 : i32, i32
  }
  func.func @transform_3(%arg0: i32) -> (i32, i32) {
    %c0_i32 = arith.constant 0 : i32
    %c0_i32_0 = arith.constant 0 : i32
    return %arg0, %c0_i32 : i32, i32
  }
}

module attributes {stable_mosaic.version = 11 : i64} {
  func.func @_att_apply_kernel(%arg0: i32, %arg1: memref<1x8x8x8xbf16, #tpu.memory_space<vmem>>, %arg2: memref<1x8x8xbf16, #tpu.memory_space<vmem>>, %arg3: memref<1x8x8xbf16, #tpu.memory_space<vmem>>, %arg4: memref<1x1x8xf32, #tpu.memory_space<vmem>>, %arg5: memref<1x1x8xf32, #tpu.memory_space<vmem>>, %arg6: memref<1x8x8x8xbf16, #tpu.memory_space<vmem>>) attributes {dimension_semantics = [#tpu.dimension_semantics<parallel>], iteration_bounds = array<i64: 4>, scalar_prefetch = 0 : i64, scratch_operands = 0 : i64, tpu.core_type = #tpu.core_type<tc>, window_params = [{transform_indices = @transform_0, window_bounds = array<i64: 1, 8, 8, 8>}, {transform_indices = @transform_1, window_bounds = array<i64: 1, 8, 8>}, {transform_indices = @transform_2, window_bounds = array<i64: 1, 8, 8>}, {pipeline_mode = #tpu.pipeline_mode<synchronous>, transform_indices = @transform_3, window_bounds = array<i64: 1, 1, 8>}, {pipeline_mode = #tpu.pipeline_mode<synchronous>, transform_indices = @transform_4, window_bounds = array<i64: 1, 1, 8>}, {transform_indices = @transform_5, window_bounds = array<i64: 1, 8, 8, 8>}]} {
    %c0 = arith.constant 0 : index
    %c0_0 = arith.constant 0 : index
    %c0_1 = arith.constant 0 : index
    %c0_2 = arith.constant 0 : index
    %0 = vector.load %arg1[%c0, %c0_0, %c0_1, %c0_2] : memref<1x8x8x8xbf16, #tpu.memory_space<vmem>>, vector<1x8x8x8xbf16>
    %1 = vector.shape_cast %0 : vector<1x8x8x8xbf16> to vector<8x8x8xbf16>
    %2 = arith.extf %1 : vector<8x8x8xbf16> to vector<8x8x8xf32>
    %c0_3 = arith.constant 0 : index
    %c0_4 = arith.constant 0 : index
    %c0_5 = arith.constant 0 : index
    %3 = vector.load %arg2[%c0_3, %c0_4, %c0_5] : memref<1x8x8xbf16, #tpu.memory_space<vmem>>, vector<1x8x8xbf16>
    %4 = vector.shape_cast %3 : vector<1x8x8xbf16> to vector<8x8xbf16>
    %5 = arith.extf %4 : vector<8x8xbf16> to vector<8x8xf32>
    %c0_6 = arith.constant 0 : index
    %c0_7 = arith.constant 0 : index
    %c0_8 = arith.constant 0 : index
    %6 = vector.load %arg3[%c0_6, %c0_7, %c0_8] : memref<1x8x8xbf16, #tpu.memory_space<vmem>>, vector<1x8x8xbf16>
    %7 = vector.shape_cast %6 : vector<1x8x8xbf16> to vector<8x8xbf16>
    %8 = arith.extf %7 : vector<8x8xbf16> to vector<8x8xf32>
    %9 = vector.shape_cast %5 : vector<8x8xf32> to vector<8x1x8xf32>
    %10 = vector.broadcast %9 : vector<8x1x8xf32> to vector<8x8x8xf32>
    %11 = arith.mulf %2, %10 : vector<8x8x8xf32>
    %12 = vector.shape_cast %8 : vector<8x8xf32> to vector<1x8x8xf32>
    %13 = vector.broadcast %12 : vector<1x8x8xf32> to vector<8x8x8xf32>
    %14 = arith.mulf %11, %13 : vector<8x8x8xf32>
    %c0_9 = arith.constant 0 : index
    %c0_10 = arith.constant 0 : index
    %c0_11 = arith.constant 0 : index
    %15 = vector.load %arg4[%c0_9, %c0_10, %c0_11] : memref<1x1x8xf32, #tpu.memory_space<vmem>>, vector<1x1x8xf32>
    %16 = vector.shape_cast %15 : vector<1x1x8xf32> to vector<1x8xf32>
    %17 = vector.shape_cast %16 : vector<1x8xf32> to vector<1x1x8xf32>
    %18 = vector.broadcast %17 : vector<1x1x8xf32> to vector<8x8x8xf32>
    %19 = arith.mulf %14, %18 : vector<8x8x8xf32>
    %c0_12 = arith.constant 0 : index
    %c0_13 = arith.constant 0 : index
    %c0_14 = arith.constant 0 : index
    %20 = vector.load %arg5[%c0_12, %c0_13, %c0_14] : memref<1x1x8xf32, #tpu.memory_space<vmem>>, vector<1x1x8xf32>
    %21 = vector.shape_cast %20 : vector<1x1x8xf32> to vector<1x8xf32>
    %22 = vector.shape_cast %21 : vector<1x8xf32> to vector<1x1x8xf32>
    %23 = vector.broadcast %22 : vector<1x1x8xf32> to vector<8x8x8xf32>
    %24 = arith.addf %19, %23 : vector<8x8x8xf32>
    %25 = arith.addf %24, %2 : vector<8x8x8xf32>
    %cst = arith.constant 0.000000e+00 : f32
    %26 = vector.broadcast %cst : f32 to vector<8x8x8xf32>
    %27 = arith.maximumf %25, %26 : vector<8x8x8xf32>
    %28 = arith.truncf %27 : vector<8x8x8xf32> to vector<8x8x8xbf16>
    %c0_15 = arith.constant 0 : index
    %c0_16 = arith.constant 0 : index
    %c0_17 = arith.constant 0 : index
    %c0_18 = arith.constant 0 : index
    %29 = vector.load %arg6[%c0_15, %c0_16, %c0_17, %c0_18] : memref<1x8x8x8xbf16, #tpu.memory_space<vmem>>, vector<1x8x8x8xbf16>
    %30 = vector.shape_cast %29 : vector<1x8x8x8xbf16> to vector<8x8x8xbf16>
    %31 = vector.shape_cast %28 : vector<8x8x8xbf16> to vector<1x8x8x8xbf16>
    tpu.vector_store %arg6[%c0_15, %c0_16, %c0_17, %c0_18], %31 {strides = array<i32>} : memref<1x8x8x8xbf16, #tpu.memory_space<vmem>>, vector<1x8x8x8xbf16>,
    return
  }
  func.func @transform_0(%arg0: i32) -> (i32, i32, i32, i32) {
    %c0_i32 = arith.constant 0 : i32
    %c0_i32_0 = arith.constant 0 : i32
    %c0_i32_1 = arith.constant 0 : i32
    %c0_i32_2 = arith.constant 0 : i32
    return %arg0, %c0_i32, %c0_i32_0, %c0_i32_1 : i32, i32, i32, i32
  }
  func.func @transform_1(%arg0: i32) -> (i32, i32, i32) {
    %c0_i32 = arith.constant 0 : i32
    %c0_i32_0 = arith.constant 0 : i32
    %c0_i32_1 = arith.constant 0 : i32
    return %arg0, %c0_i32, %c0_i32_0 : i32, i32, i32
  }
  func.func @transform_2(%arg0: i32) -> (i32, i32, i32) {
    %c0_i32 = arith.constant 0 : i32
    %c0_i32_0 = arith.constant 0 : i32
    %c0_i32_1 = arith.constant 0 : i32
    return %arg0, %c0_i32, %c0_i32_0 : i32, i32, i32
  }
  func.func @transform_3(%arg0: i32) -> (i32, i32, i32) {
    %c0_i32 = arith.constant 0 : i32
    %c0_i32_0 = arith.constant 0 : i32
    %c0_i32_1 = arith.constant 0 : i32
    %c0_i32_2 = arith.constant 0 : i32
    return %c0_i32, %c0_i32_0, %c0_i32_1 : i32, i32, i32
  }
  func.func @transform_4(%arg0: i32) -> (i32, i32, i32) {
    %c0_i32 = arith.constant 0 : i32
    %c0_i32_0 = arith.constant 0 : i32
    %c0_i32_1 = arith.constant 0 : i32
    %c0_i32_2 = arith.constant 0 : i32
    return %c0_i32, %c0_i32_0, %c0_i32_1 : i32, i32, i32
  }
  func.func @transform_5(%arg0: i32) -> (i32, i32, i32, i32) {
    %c0_i32 = arith.constant 0 : i32
    %c0_i32_0 = arith.constant 0 : i32
    %c0_i32_1 = arith.constant 0 : i32
    %c0_i32_2 = arith.constant 0 : i32
    return %arg0, %c0_i32, %c0_i32_0, %c0_i32_1 : i32, i32, i32, i32
  }
}

module attributes {stable_mosaic.version = 11 : i64} {
  func.func @_mm_act_kernel(%arg0: i32, %arg1: memref<128x48xbf16, #tpu.memory_space<vmem>>, %arg2: memref<48x16xbf16, #tpu.memory_space<vmem>>, %arg3: memref<1x16xf32, #tpu.memory_space<vmem>>, %arg4: memref<128x16xbf16, #tpu.memory_space<vmem>>) attributes {dimension_semantics = [#tpu.dimension_semantics<parallel>], iteration_bounds = array<i64: 1>, scalar_prefetch = 0 : i64, scratch_operands = 0 : i64, tpu.core_type = #tpu.core_type<tc>, window_params = [{transform_indices = @transform_0, window_bounds = array<i64: 128, 48>}, {pipeline_mode = #tpu.pipeline_mode<synchronous>, transform_indices = @transform_1, window_bounds = array<i64: 48, 16>}, {pipeline_mode = #tpu.pipeline_mode<synchronous>, transform_indices = @transform_2, window_bounds = array<i64: 1, 16>}, {transform_indices = @transform_3, window_bounds = array<i64: 128, 16>}]} {
    %c0 = arith.constant 0 : index
    %c0_0 = arith.constant 0 : index
    %0 = vector.load %arg1[%c0, %c0_0] : memref<128x48xbf16, #tpu.memory_space<vmem>>, vector<128x48xbf16>
    %c0_1 = arith.constant 0 : index
    %c0_2 = arith.constant 0 : index
    %1 = vector.load %arg2[%c0_1, %c0_2] : memref<48x16xbf16, #tpu.memory_space<vmem>>, vector<48x16xbf16>
    %cst = arith.constant dense<0.000000e+00> : vector<128x16xf32>
    %2 = tpu.matmul %0, %1, %cst {dimension_numbers = #tpu.dot_dimension_numbers<[1], [0], [0], [1], [0, 0, 1, 1], [], []>} : vector<128x48xbf16>, vector<48x16xbf16>, vector<128x16xf32> -> vector<128x16xf32>
    %c0_3 = arith.constant 0 : index
    %c0_4 = arith.constant 0 : index
    %3 = vector.load %arg3[%c0_3, %c0_4] : memref<1x16xf32, #tpu.memory_space<vmem>>, vector<1x16xf32>
    %4 = vector.broadcast %3 : vector<1x16xf32> to vector<128x16xf32>
    %5 = arith.addf %2, %4 : vector<128x16xf32>
    %cst_5 = arith.constant 0.000000e+00 : f32
    %6 = vector.broadcast %cst_5 : f32 to vector<128x16xf32>
    %7 = arith.maximumf %5, %6 : vector<128x16xf32>
    %8 = arith.truncf %7 : vector<128x16xf32> to vector<128x16xbf16>
    %c0_6 = arith.constant 0 : index
    %c0_7 = arith.constant 0 : index
    %9 = vector.load %arg4[%c0_6, %c0_7] : memref<128x16xbf16, #tpu.memory_space<vmem>>, vector<128x16xbf16>
    tpu.vector_store %arg4[%c0_6, %c0_7], %8 {strides = array<i32>} : memref<128x16xbf16, #tpu.memory_space<vmem>>, vector<128x16xbf16>,
    return
  }
  func.func @transform_0(%arg0: i32) -> (i32, i32) {
    %c0_i32 = arith.constant 0 : i32
    %c0_i32_0 = arith.constant 0 : i32
    return %arg0, %c0_i32 : i32, i32
  }
  func.func @transform_1(%arg0: i32) -> (i32, i32) {
    %c0_i32 = arith.constant 0 : i32
    %c0_i32_0 = arith.constant 0 : i32
    %c0_i32_1 = arith.constant 0 : i32
    return %c0_i32, %c0_i32_0 : i32, i32
  }
  func.func @transform_2(%arg0: i32) -> (i32, i32) {
    %c0_i32 = arith.constant 0 : i32
    %c0_i32_0 = arith.constant 0 : i32
    %c0_i32_1 = arith.constant 0 : i32
    return %c0_i32, %c0_i32_0 : i32, i32
  }
  func.func @transform_3(%arg0: i32) -> (i32, i32) {
    %c0_i32 = arith.constant 0 : i32
    %c0_i32_0 = arith.constant 0 : i32
    return %arg0, %c0_i32 : i32, i32
  }
}

module attributes {stable_mosaic.version = 11 : i64} {
  func.func @_mm_act_kernel(%arg0: i32, %arg1: memref<48x8xbf16, #tpu.memory_space<vmem>>, %arg2: memref<8x32xbf16, #tpu.memory_space<vmem>>, %arg3: memref<1x32xf32, #tpu.memory_space<vmem>>, %arg4: memref<48x32xbf16, #tpu.memory_space<vmem>>) attributes {dimension_semantics = [#tpu.dimension_semantics<parallel>], iteration_bounds = array<i64: 1>, scalar_prefetch = 0 : i64, scratch_operands = 0 : i64, tpu.core_type = #tpu.core_type<tc>, window_params = [{transform_indices = @transform_0, window_bounds = array<i64: 48, 8>}, {pipeline_mode = #tpu.pipeline_mode<synchronous>, transform_indices = @transform_1, window_bounds = array<i64: 8, 32>}, {pipeline_mode = #tpu.pipeline_mode<synchronous>, transform_indices = @transform_2, window_bounds = array<i64: 1, 32>}, {transform_indices = @transform_3, window_bounds = array<i64: 48, 32>}]} {
    %c0 = arith.constant 0 : index
    %c0_0 = arith.constant 0 : index
    %0 = vector.load %arg1[%c0, %c0_0] : memref<48x8xbf16, #tpu.memory_space<vmem>>, vector<48x8xbf16>
    %c0_1 = arith.constant 0 : index
    %c0_2 = arith.constant 0 : index
    %1 = vector.load %arg2[%c0_1, %c0_2] : memref<8x32xbf16, #tpu.memory_space<vmem>>, vector<8x32xbf16>
    %cst = arith.constant dense<0.000000e+00> : vector<48x32xf32>
    %2 = tpu.matmul %0, %1, %cst {dimension_numbers = #tpu.dot_dimension_numbers<[1], [0], [0], [1], [0, 0, 1, 1], [], []>} : vector<48x8xbf16>, vector<8x32xbf16>, vector<48x32xf32> -> vector<48x32xf32>
    %c0_3 = arith.constant 0 : index
    %c0_4 = arith.constant 0 : index
    %3 = vector.load %arg3[%c0_3, %c0_4] : memref<1x32xf32, #tpu.memory_space<vmem>>, vector<1x32xf32>
    %4 = vector.broadcast %3 : vector<1x32xf32> to vector<48x32xf32>
    %5 = arith.addf %2, %4 : vector<48x32xf32>
    %6 = arith.negf %5 : vector<48x32xf32>
    %7 = math.exp %6 : vector<48x32xf32>
    %cst_5 = arith.constant 1.000000e+00 : f32
    %8 = vector.broadcast %cst_5 : f32 to vector<48x32xf32>
    %9 = arith.addf %8, %7 : vector<48x32xf32>
    %10 = arith.divf %8, %9 : vector<48x32xf32>
    %11 = arith.truncf %10 : vector<48x32xf32> to vector<48x32xbf16>
    %c0_6 = arith.constant 0 : index
    %c0_7 = arith.constant 0 : index
    %12 = vector.load %arg4[%c0_6, %c0_7] : memref<48x32xbf16, #tpu.memory_space<vmem>>, vector<48x32xbf16>
    tpu.vector_store %arg4[%c0_6, %c0_7], %11 {strides = array<i32>} : memref<48x32xbf16, #tpu.memory_space<vmem>>, vector<48x32xbf16>,
    return
  }
  func.func @transform_0(%arg0: i32) -> (i32, i32) {
    %c0_i32 = arith.constant 0 : i32
    %c0_i32_0 = arith.constant 0 : i32
    return %arg0, %c0_i32 : i32, i32
  }
  func.func @transform_1(%arg0: i32) -> (i32, i32) {
    %c0_i32 = arith.constant 0 : i32
    %c0_i32_0 = arith.constant 0 : i32
    %c0_i32_1 = arith.constant 0 : i32
    return %c0_i32, %c0_i32_0 : i32, i32
  }
  func.func @transform_2(%arg0: i32) -> (i32, i32) {
    %c0_i32 = arith.constant 0 : i32
    %c0_i32_0 = arith.constant 0 : i32
    %c0_i32_1 = arith.constant 0 : i32
    return %c0_i32, %c0_i32_0 : i32, i32
  }
  func.func @transform_3(%arg0: i32) -> (i32, i32) {
    %c0_i32 = arith.constant 0 : i32
    %c0_i32_0 = arith.constant 0 : i32
    return %arg0, %c0_i32 : i32, i32
  }
}

module attributes {stable_mosaic.version = 11 : i64} {
  func.func @_mm_act_kernel(%arg0: i32, %arg1: memref<48x16xbf16, #tpu.memory_space<vmem>>, %arg2: memref<16x8xbf16, #tpu.memory_space<vmem>>, %arg3: memref<1x8xf32, #tpu.memory_space<vmem>>, %arg4: memref<48x8xbf16, #tpu.memory_space<vmem>>) attributes {dimension_semantics = [#tpu.dimension_semantics<parallel>], iteration_bounds = array<i64: 1>, scalar_prefetch = 0 : i64, scratch_operands = 0 : i64, tpu.core_type = #tpu.core_type<tc>, window_params = [{transform_indices = @transform_0, window_bounds = array<i64: 48, 16>}, {pipeline_mode = #tpu.pipeline_mode<synchronous>, transform_indices = @transform_1, window_bounds = array<i64: 16, 8>}, {pipeline_mode = #tpu.pipeline_mode<synchronous>, transform_indices = @transform_2, window_bounds = array<i64: 1, 8>}, {transform_indices = @transform_3, window_bounds = array<i64: 48, 8>}]} {
    %c0 = arith.constant 0 : index
    %c0_0 = arith.constant 0 : index
    %0 = vector.load %arg1[%c0, %c0_0] : memref<48x16xbf16, #tpu.memory_space<vmem>>, vector<48x16xbf16>
    %c0_1 = arith.constant 0 : index
    %c0_2 = arith.constant 0 : index
    %1 = vector.load %arg2[%c0_1, %c0_2] : memref<16x8xbf16, #tpu.memory_space<vmem>>, vector<16x8xbf16>
    %cst = arith.constant dense<0.000000e+00> : vector<48x8xf32>
    %2 = tpu.matmul %0, %1, %cst {dimension_numbers = #tpu.dot_dimension_numbers<[1], [0], [0], [1], [0, 0, 1, 1], [], []>} : vector<48x16xbf16>, vector<16x8xbf16>, vector<48x8xf32> -> vector<48x8xf32>
    %c0_3 = arith.constant 0 : index
    %c0_4 = arith.constant 0 : index
    %3 = vector.load %arg3[%c0_3, %c0_4] : memref<1x8xf32, #tpu.memory_space<vmem>>, vector<1x8xf32>
    %4 = vector.broadcast %3 : vector<1x8xf32> to vector<48x8xf32>
    %5 = arith.addf %2, %4 : vector<48x8xf32>
    %cst_5 = arith.constant 3.000000e+00 : f32
    %6 = vector.broadcast %cst_5 : f32 to vector<48x8xf32>
    %7 = arith.addf %5, %6 : vector<48x8xf32>
    %cst_6 = arith.constant 0.000000e+00 : f32
    %cst_7 = arith.constant 6.000000e+00 : f32
    %8 = vector.broadcast %cst_6 : f32 to vector<48x8xf32>
    %9 = arith.maximumf %8, %7 : vector<48x8xf32>
    %10 = vector.broadcast %cst_7 : f32 to vector<48x8xf32>
    %11 = arith.minimumf %10, %9 : vector<48x8xf32>
    %12 = arith.mulf %5, %11 : vector<48x8xf32>
    %cst_8 = arith.constant 0.166666672 : f32
    %13 = vector.broadcast %cst_8 : f32 to vector<48x8xf32>
    %14 = arith.mulf %12, %13 : vector<48x8xf32>
    %15 = arith.truncf %14 : vector<48x8xf32> to vector<48x8xbf16>
    %c0_9 = arith.constant 0 : index
    %c0_10 = arith.constant 0 : index
    %16 = vector.load %arg4[%c0_9, %c0_10] : memref<48x8xbf16, #tpu.memory_space<vmem>>, vector<48x8xbf16>
    tpu.vector_store %arg4[%c0_9, %c0_10], %15 {strides = array<i32>} : memref<48x8xbf16, #tpu.memory_space<vmem>>, vector<48x8xbf16>,
    return
  }
  func.func @transform_0(%arg0: i32) -> (i32, i32) {
    %c0_i32 = arith.constant 0 : i32
    %c0_i32_0 = arith.constant 0 : i32
    return %arg0, %c0_i32 : i32, i32
  }
  func.func @transform_1(%arg0: i32) -> (i32, i32) {
    %c0_i32 = arith.constant 0 : i32
    %c0_i32_0 = arith.constant 0 : i32
    %c0_i32_1 = arith.constant 0 : i32
    return %c0_i32, %c0_i32_0 : i32, i32
  }
  func.func @transform_2(%arg0: i32) -> (i32, i32) {
    %c0_i32 = arith.constant 0 : i32
    %c0_i32_0 = arith.constant 0 : i32
    %c0_i32_1 = arith.constant 0 : i32
    return %c0_i32, %c0_i32_0 : i32, i32
  }
  func.func @transform_3(%arg0: i32) -> (i32, i32) {
    %c0_i32 = arith.constant 0 : i32
    %c0_i32_0 = arith.constant 0 : i32
    return %arg0, %c0_i32 : i32, i32
  }
}

module attributes {stable_mosaic.version = 11 : i64} {
  func.func @_att_apply_kernel(%arg0: i32, %arg1: memref<1x4x8x16xbf16, #tpu.memory_space<vmem>>, %arg2: memref<1x4x16xbf16, #tpu.memory_space<vmem>>, %arg3: memref<1x8x16xbf16, #tpu.memory_space<vmem>>, %arg4: memref<1x1x16xf32, #tpu.memory_space<vmem>>, %arg5: memref<1x1x16xf32, #tpu.memory_space<vmem>>, %arg6: memref<1x4x8x16xbf16, #tpu.memory_space<vmem>>) attributes {dimension_semantics = [#tpu.dimension_semantics<parallel>], iteration_bounds = array<i64: 4>, scalar_prefetch = 0 : i64, scratch_operands = 0 : i64, tpu.core_type = #tpu.core_type<tc>, window_params = [{transform_indices = @transform_0, window_bounds = array<i64: 1, 4, 8, 16>}, {transform_indices = @transform_1, window_bounds = array<i64: 1, 4, 16>}, {transform_indices = @transform_2, window_bounds = array<i64: 1, 8, 16>}, {pipeline_mode = #tpu.pipeline_mode<synchronous>, transform_indices = @transform_3, window_bounds = array<i64: 1, 1, 16>}, {pipeline_mode = #tpu.pipeline_mode<synchronous>, transform_indices = @transform_4, window_bounds = array<i64: 1, 1, 16>}, {transform_indices = @transform_5, window_bounds = array<i64: 1, 4, 8, 16>}]} {
    %c0 = arith.constant 0 : index
    %c0_0 = arith.constant 0 : index
    %c0_1 = arith.constant 0 : index
    %c0_2 = arith.constant 0 : index
    %0 = vector.load %arg1[%c0, %c0_0, %c0_1, %c0_2] : memref<1x4x8x16xbf16, #tpu.memory_space<vmem>>, vector<1x4x8x16xbf16>
    %1 = vector.shape_cast %0 : vector<1x4x8x16xbf16> to vector<4x8x16xbf16>
    %2 = arith.extf %1 : vector<4x8x16xbf16> to vector<4x8x16xf32>
    %c0_3 = arith.constant 0 : index
    %c0_4 = arith.constant 0 : index
    %c0_5 = arith.constant 0 : index
    %3 = vector.load %arg2[%c0_3, %c0_4, %c0_5] : memref<1x4x16xbf16, #tpu.memory_space<vmem>>, vector<1x4x16xbf16>
    %4 = vector.shape_cast %3 : vector<1x4x16xbf16> to vector<4x16xbf16>
    %5 = arith.extf %4 : vector<4x16xbf16> to vector<4x16xf32>
    %c0_6 = arith.constant 0 : index
    %c0_7 = arith.constant 0 : index
    %c0_8 = arith.constant 0 : index
    %6 = vector.load %arg3[%c0_6, %c0_7, %c0_8] : memref<1x8x16xbf16, #tpu.memory_space<vmem>>, vector<1x8x16xbf16>
    %7 = vector.shape_cast %6 : vector<1x8x16xbf16> to vector<8x16xbf16>
    %8 = arith.extf %7 : vector<8x16xbf16> to vector<8x16xf32>
    %9 = vector.shape_cast %5 : vector<4x16xf32> to vector<4x1x16xf32>
    %10 = vector.broadcast %9 : vector<4x1x16xf32> to vector<4x8x16xf32>
    %11 = arith.mulf %2, %10 : vector<4x8x16xf32>
    %12 = vector.shape_cast %8 : vector<8x16xf32> to vector<1x8x16xf32>
    %13 = vector.broadcast %12 : vector<1x8x16xf32> to vector<4x8x16xf32>
    %14 = arith.mulf %11, %13 : vector<4x8x16xf32>
    %c0_9 = arith.constant 0 : index
    %c0_10 = arith.constant 0 : index
    %c0_11 = arith.constant 0 : index
    %15 = vector.load %arg4[%c0_9, %c0_10, %c0_11] : memref<1x1x16xf32, #tpu.memory_space<vmem>>, vector<1x1x16xf32>
    %16 = vector.shape_cast %15 : vector<1x1x16xf32> to vector<1x16xf32>
    %17 = vector.shape_cast %16 : vector<1x16xf32> to vector<1x1x16xf32>
    %18 = vector.broadcast %17 : vector<1x1x16xf32> to vector<4x8x16xf32>
    %19 = arith.mulf %14, %18 : vector<4x8x16xf32>
    %c0_12 = arith.constant 0 : index
    %c0_13 = arith.constant 0 : index
    %c0_14 = arith.constant 0 : index
    %20 = vector.load %arg5[%c0_12, %c0_13, %c0_14] : memref<1x1x16xf32, #tpu.memory_space<vmem>>, vector<1x1x16xf32>
    %21 = vector.shape_cast %20 : vector<1x1x16xf32> to vector<1x16xf32>
    %22 = vector.shape_cast %21 : vector<1x16xf32> to vector<1x1x16xf32>
    %23 = vector.broadcast %22 : vector<1x1x16xf32> to vector<4x8x16xf32>
    %24 = arith.addf %19, %23 : vector<4x8x16xf32>
    %25 = arith.addf %24, %2 : vector<4x8x16xf32>
    %cst = arith.constant 0.000000e+00 : f32
    %26 = vector.broadcast %cst : f32 to vector<4x8x16xf32>
    %27 = arith.maximumf %25, %26 : vector<4x8x16xf32>
    %28 = arith.truncf %27 : vector<4x8x16xf32> to vector<4x8x16xbf16>
    %c0_15 = arith.constant 0 : index
    %c0_16 = arith.constant 0 : index
    %c0_17 = arith.constant 0 : index
    %c0_18 = arith.constant 0 : index
    %29 = vector.load %arg6[%c0_15, %c0_16, %c0_17, %c0_18] : memref<1x4x8x16xbf16, #tpu.memory_space<vmem>>, vector<1x4x8x16xbf16>
    %30 = vector.shape_cast %29 : vector<1x4x8x16xbf16> to vector<4x8x16xbf16>
    %31 = vector.shape_cast %28 : vector<4x8x16xbf16> to vector<1x4x8x16xbf16>
    tpu.vector_store %arg6[%c0_15, %c0_16, %c0_17, %c0_18], %31 {strides = array<i32>} : memref<1x4x8x16xbf16, #tpu.memory_space<vmem>>, vector<1x4x8x16xbf16>,
    return
  }
  func.func @transform_0(%arg0: i32) -> (i32, i32, i32, i32) {
    %c0_i32 = arith.constant 0 : i32
    %c0_i32_0 = arith.constant 0 : i32
    %c0_i32_1 = arith.constant 0 : i32
    %c0_i32_2 = arith.constant 0 : i32
    return %arg0, %c0_i32, %c0_i32_0, %c0_i32_1 : i32, i32, i32, i32
  }
  func.func @transform_1(%arg0: i32) -> (i32, i32, i32) {
    %c0_i32 = arith.constant 0 : i32
    %c0_i32_0 = arith.constant 0 : i32
    %c0_i32_1 = arith.constant 0 : i32
    return %arg0, %c0_i32, %c0_i32_0 : i32, i32, i32
  }
  func.func @transform_2(%arg0: i32) -> (i32, i32, i32) {
    %c0_i32 = arith.constant 0 : i32
    %c0_i32_0 = arith.constant 0 : i32
    %c0_i32_1 = arith.constant 0 : i32
    return %arg0, %c0_i32, %c0_i32_0 : i32, i32, i32
  }
  func.func @transform_3(%arg0: i32) -> (i32, i32, i32) {
    %c0_i32 = arith.constant 0 : i32
    %c0_i32_0 = arith.constant 0 : i32
    %c0_i32_1 = arith.constant 0 : i32
    %c0_i32_2 = arith.constant 0 : i32
    return %c0_i32, %c0_i32_0, %c0_i32_1 : i32, i32, i32
  }
  func.func @transform_4(%arg0: i32) -> (i32, i32, i32) {
    %c0_i32 = arith.constant 0 : i32
    %c0_i32_0 = arith.constant 0 : i32
    %c0_i32_1 = arith.constant 0 : i32
    %c0_i32_2 = arith.constant 0 : i32
    return %c0_i32, %c0_i32_0, %c0_i32_1 : i32, i32, i32
  }
  func.func @transform_5(%arg0: i32) -> (i32, i32, i32, i32) {
    %c0_i32 = arith.constant 0 : i32
    %c0_i32_0 = arith.constant 0 : i32
    %c0_i32_1 = arith.constant 0 : i32
    %c0_i32_2 = arith.constant 0 : i32
    return %arg0, %c0_i32, %c0_i32_0, %c0_i32_1 : i32, i32, i32, i32
  }
}

module attributes {stable_mosaic.version = 11 : i64} {
  func.func @_mm_act_kernel(%arg0: i32, %arg1: memref<2x16xbf16, #tpu.memory_space<vmem>>, %arg2: memref<16x5xbf16, #tpu.memory_space<vmem>>, %arg3: memref<1x5xf32, #tpu.memory_space<vmem>>, %arg4: memref<2x5xf32, #tpu.memory_space<vmem>>) attributes {dimension_semantics = [#tpu.dimension_semantics<parallel>], iteration_bounds = array<i64: 1>, scalar_prefetch = 0 : i64, scratch_operands = 0 : i64, tpu.core_type = #tpu.core_type<tc>, window_params = [{transform_indices = @transform_0, window_bounds = array<i64: 2, 16>}, {pipeline_mode = #tpu.pipeline_mode<synchronous>, transform_indices = @transform_1, window_bounds = array<i64: 16, 5>}, {pipeline_mode = #tpu.pipeline_mode<synchronous>, transform_indices = @transform_2, window_bounds = array<i64: 1, 5>}, {transform_indices = @transform_3, window_bounds = array<i64: 2, 5>}]} {
    %c0 = arith.constant 0 : index
    %c0_0 = arith.constant 0 : index
    %0 = vector.load %arg1[%c0, %c0_0] : memref<2x16xbf16, #tpu.memory_space<vmem>>, vector<2x16xbf16>
    %c0_1 = arith.constant 0 : index
    %c0_2 = arith.constant 0 : index
    %1 = vector.load %arg2[%c0_1, %c0_2] : memref<16x5xbf16, #tpu.memory_space<vmem>>, vector<16x5xbf16>
    %cst = arith.constant dense<0.000000e+00> : vector<2x5xf32>
    %2 = tpu.matmul %0, %1, %cst {dimension_numbers = #tpu.dot_dimension_numbers<[1], [0], [0], [1], [0, 0, 1, 1], [], []>} : vector<2x16xbf16>, vector<16x5xbf16>, vector<2x5xf32> -> vector<2x5xf32>
    %c0_3 = arith.constant 0 : index
    %c0_4 = arith.constant 0 : index
    %3 = vector.load %arg3[%c0_3, %c0_4] : memref<1x5xf32, #tpu.memory_space<vmem>>, vector<1x5xf32>
    %4 = vector.broadcast %3 : vector<1x5xf32> to vector<2x5xf32>
    %5 = arith.addf %2, %4 : vector<2x5xf32>
    %c0_5 = arith.constant 0 : index
    %c0_6 = arith.constant 0 : index
    %6 = vector.load %arg4[%c0_5, %c0_6] : memref<2x5xf32, #tpu.memory_space<vmem>>, vector<2x5xf32>
    tpu.vector_store %arg4[%c0_5, %c0_6], %5 {strides = array<i32>} : memref<2x5xf32, #tpu.memory_space<vmem>>, vector<2x5xf32>,
    return
  }
  func.func @transform_0(%arg0: i32) -> (i32, i32) {
    %c0_i32 = arith.constant 0 : i32
    %c0_i32_0 = arith.constant 0 : i32
    return %arg0, %c0_i32 : i32, i32
  }
  func.func @transform_1(%arg0: i32) -> (i32, i32) {
    %c0_i32 = arith.constant 0 : i32
    %c0_i32_0 = arith.constant 0 : i32
    %c0_i32_1 = arith.constant 0 : i32
    return %c0_i32, %c0_i32_0 : i32, i32
  }
  func.func @transform_2(%arg0: i32) -> (i32, i32) {
    %c0_i32 = arith.constant 0 : i32
    %c0_i32_0 = arith.constant 0 : i32
    %c0_i32_1 = arith.constant 0 : i32
    return %c0_i32, %c0_i32_0 : i32, i32
  }
  func.func @transform_3(%arg0: i32) -> (i32, i32) {
    %c0_i32 = arith.constant 0 : i32
    %c0_i32_0 = arith.constant 0 : i32
    return %arg0, %c0_i32 : i32, i32
  }
}

</mosaic_0001>

<bundles_post_ra>
// kernel: squeeze.2
= control target key start
LH: loop header
LB: loop body
LE: loop exit
PB: predicated region body
PF: predicated region fallthrough
CT: control target
= control target key end

     0   :  { %vm774_vm0 = vcmask 1043458   ;;  %s1239_s9 = smov 3  ;;  %s1241_s10 = smov 12  ;;  %vm778_vm1 = vcmask 1045508   ;;  %vm782_vm2 = vcmask 1047558   ;;  %vm784_vm3 = vcmask 64512   ;;  %s1428_s0 = inlined_call_operand.vmem [shape: bf16[1,2,2,8,8,3], index: 0, kind: input, shape index: {}]   ;;  %s1429_s1 = inlined_call_operand.vmem [shape: bf16[32,24], index: 1, kind: output, shape index: {}]  }
   0x1   :  { %v1120_v0 = vld [vmem:[%s1428_s0 + $0x1f] sm:$0x1]  ;;  %v1122_v1 = vld [vmem:[%s1428_s0 + $0x1d] sm:$0x1]  ;;  %v1124_v2 = vld [vmem:[%s1428_s0 + $0x1b] sm:$0x1] }
   0x2   :  { %v274_v3 = vunpack.c.l.bf16 %v1120_v0  ;;  %v306_v4 = vunpack.c.l.bf16 %v1122_v1  ;;  %v338_v5 = vunpack.c.l.bf16 %v1124_v2  ;;  %v1126_v6 = vld [vmem:[%s1428_s0 + $0x19] sm:$0x1]  ;;  %v1128_v7 = vld [vmem:[%s1428_s0 + $0x17] sm:$0x1]  ;;  %v1130_v8 = vld [vmem:[%s1428_s0 + $0x15] sm:$0x1] }
   0x3   :  { %v370_v9 = vunpack.c.l.bf16 %v1126_v6  ;;  %v402_v10 = vunpack.c.l.bf16 %v1128_v7  ;;  %v434_v11 = vunpack.c.l.bf16 %v1130_v8  ;;  %v1132_v12 = vld [vmem:[%s1428_s0 + $0x13] sm:$0x1]  ;;  %v1134_v13 = vld [vmem:[%s1428_s0 + $0x11] sm:$0x1]  ;;  %v1136_v14 = vld [vmem:[%s1428_s0 + $0xf] sm:$0x1] }
   0x4   :  { %277 = vst [vmem:[#allocation1 + $0xf8] sm:$0x3] %v274_v3  ;;  %309 = vst [vmem:[#allocation1 + $0xe8] sm:$0x3] %v306_v4  ;;  %v466_v15 = vunpack.c.l.bf16 %v1132_v12  ;;  %v498_v16 = vunpack.c.l.bf16 %v1134_v13  ;;  %v530_v17 = vunpack.c.l.bf16 %v1136_v14  ;;  %v1138_v18 = vld [vmem:[%s1428_s0 + $0xd] sm:$0x1] }
   0x5   :  { %341 = vst [vmem:[#allocation1 + $0xd8] sm:$0x3] %v338_v5  ;;  %v1140_v19 = vld [vmem:[%s1428_s0 + $0xb] sm:$0x1]  ;;  %v1142_v20 = vld [vmem:[%s1428_s0 + $0x9] sm:$0x1]  ;;  %v562_v21 = vunpack.c.l.bf16 %v1138_v18 }
   0x6   :  { %373 = vst [vmem:[#allocation1 + $0xc8] sm:$0x3] %v370_v9  ;;  %405 = vst [vmem:[#allocation1 + $0xb8] sm:$0x3] %v402_v10  ;;  %v594_v22 = vunpack.c.l.bf16 %v1140_v19  ;;  %v626_v23 = vunpack.c.l.bf16 %v1142_v20  ;;  %v1144_v24 = vld [vmem:[%s1428_s0 + $0x7] sm:$0x1] }
   0x7   :  { %437 = vst [vmem:[#allocation1 + $0xa8] sm:$0x3] %v434_v11  ;;  %v1146_v25 = vld [vmem:[%s1428_s0 + $0x5] sm:$0x1]  ;;  %v1148_v26 = vld [vmem:[%s1428_s0 + $0x3] sm:$0x1]  ;;  %v658_v27 = vunpack.c.l.bf16 %v1144_v24 }
   0x8   :  { %469 = vst [vmem:[#allocation1 + $0x98] sm:$0x3] %v466_v15  ;;  %501 = vst [vmem:[#allocation1 + $0x88] sm:$0x3] %v498_v16  ;;  %v690_v28 = vunpack.c.l.bf16 %v1146_v25  ;;  %v722_v29 = vunpack.c.l.bf16 %v1148_v26  ;;  %v1150_v30 = vld [vmem:[%s1428_s0 + $0x1] sm:$0x1] }
   0x9   :  { %533 = vst [vmem:[#allocation1 + $0x78] sm:$0x3] %v530_v17  ;;  %565 = vst [vmem:[#allocation1 + $0x68] sm:$0x3] %v562_v21  ;;  %v753_v31 = vunpack.c.l.bf16 %v1150_v30  ;;  %s1243_s11 = smov 48  ;;  %s1245_s12 = smov 192 }
   0xa   :  { %597 = vst [vmem:[#allocation1 + $0x58] sm:$0x3] %v594_v22  ;;  %629 = vst [vmem:[#allocation1 + $0x48] sm:$0x3] %v626_v23  ;;  %v1104_v32 = vld [vmem:[%s1428_s0 + $0x2f] sm:$0x1] }
   0xb   :  { %661 = vst [vmem:[#allocation1 + $0x38] sm:$0x3] %v658_v27  ;;  %693 = vst [vmem:[#allocation1 + $0x28] sm:$0x3] %v690_v28  ;;  %s1250_s15 = smov 3  ;;  %v18_v33 = vunpack.c.l.bf16 %v1104_v32  ;;  %s854_s20 = smov 12 }
   0xc   :  { %725 = vst [vmem:[#allocation1 + $0x18] sm:$0x3] %v722_v29  ;;  %v1106_v34 = vld [vmem:[%s1428_s0 + $0x2d] sm:$0x1]  ;;  %v1108_v35 = vld [vmem:[%s1428_s0 + $0x2b] sm:$0x1] }
   0xd   :  { %756 = vst [vmem:[#allocation1 + $0x8] sm:$0x3] %v753_v31  ;;  %s859_s21 = smov 48  ;;  %v50_v36 = vunpack.c.l.bf16 %v1106_v34  ;;  %v82_v37 = vunpack.c.l.bf16 %v1108_v35  ;;  %v1110_v38 = vld [vmem:[%s1428_s0 + $0x29] sm:$0x1]  ;;  %s864_s26 = smov 192 }
   0xe   :  { %v1112_v39 = vld [vmem:[%s1428_s0 + $0x27] sm:$0x1]  ;;  %s1264_s27 = smov 3  ;;  %21 = vst [vmem:[#allocation1 + $0x178] sm:$0x3] %v18_v33  ;;  %v114_v40 = vunpack.c.l.bf16 %v1110_v38  ;;  %s1272_s3 = smov 12 }
   0xf   :  { %v146_v41 = vunpack.c.l.bf16 %v1112_v39  ;;  %v1114_v42 = vld [vmem:[%s1428_s0 + $0x25] sm:$0x1]  ;;  %v1116_v43 = vld [vmem:[%s1428_s0 + $0x23] sm:$0x1]  ;;  %s1274_s4 = smov 48  ;;  %s1282_s13 = smov 192 }
  0x10   :  { %53 = vst [vmem:[#allocation1 + $0x168] sm:$0x3] %v50_v36  ;;  %85 = vst [vmem:[#allocation1 + $0x158] sm:$0x3] %v82_v37  ;;  %v178_v44 = vunpack.c.l.bf16 %v1114_v42  ;;  %v210_v45 = vunpack.c.l.bf16 %v1116_v43  ;;  %v1118_v46 = vld [vmem:[%s1428_s0 + $0x21] sm:$0x1] }
  0x11   :  { %v1121_v47 = vld [vmem:[%s1428_s0 + $0x1e] sm:$0x1]  ;;  %117 = vst [vmem:[#allocation1 + $0x148] sm:$0x3] %v114_v40  ;;  %149 = vst [vmem:[#allocation1 + $0x138] sm:$0x3] %v146_v41  ;;  %v242_v48 = vunpack.c.l.bf16 %v1118_v46 }
  0x12   :  { %v290_v49 = vunpack.c.l.bf16 %v1121_v47  ;;  %v1123_v50 = vld [vmem:[%s1428_s0 + $0x1c] sm:$0x1]  ;;  %v1125_v51 = vld [vmem:[%s1428_s0 + $0x1a] sm:$0x1]  ;;  %v852_v52 = vld [vmem:[#allocation1 + $0x89] ss:$16 sm:%s1250_s15]  }
  0x13   :  { %v855_v53 = vld [vmem:[#allocation1 + $0x89] ss:$16 sm:%s854_s20]   ;;  %181 = vst [vmem:[#allocation1 + $0x128] sm:$0x3] %v178_v44  ;;  %213 = vst [vmem:[#allocation1 + $0x118] sm:$0x3] %v210_v45  ;;  %v322_v55 = vunpack.c.l.bf16 %v1123_v50  ;;  %v354_v56 = vunpack.c.l.bf16 %v1125_v51 }
  0x14   :  { %v860_v54 = vld [vmem:[#allocation1 + $0x89] ss:$16 sm:%s859_s21]   ;;  %v857_v57 = vsel %vm774_vm0, %v855_v53, %v852_v52  ;;  %s919_s15 = smov 3  ;;  %s922_s19 = smov 12  ;;  %245 = vst [vmem:[#allocation1 + $0x108] sm:$0x3] %v242_v48 }
  0x15   :  { %v865_v58 = vld [vmem:[#allocation1 + $0x89] ss:$16 sm:%s864_s26]   ;;  %293 = vst [vmem:[#allocation1 + $0xf0] sm:$0x3] %v290_v49  ;;  %v1127_v59 = vld [vmem:[%s1428_s0 + $0x18] sm:$0x1]  ;;  %v862_v60 = vsel %vm778_vm1, %v860_v54, %v857_v57 }
  0x16   :  { %v920_v61 = vld [vmem:[#allocation1 + $0x88] ss:$16 sm:%s919_s15]   ;;  %s927_s22 = smov 48  ;;  %s932_s23 = smov 192  ;;  %325 = vst [vmem:[#allocation1 + $0xe0] sm:$0x3] %v322_v55  ;;  %v386_v63 = vunpack.c.l.bf16 %v1127_v59  ;;  %v867_v6 = vsel %vm782_vm2, %v865_v58, %v862_v60 }
  0x17   :  { %v923_v62 = vld [vmem:[#allocation1 + $0x88] ss:$16 sm:%s922_s19]   ;;  %357 = vst [vmem:[#allocation1 + $0xd0] sm:$0x3] %v354_v56  ;;  %v830_v0 = vld [vmem:[#allocation1 + $0x9] ss:$16 sm:%s1239_s9]  }
  0x18   :  { %v833_v1 = vld [vmem:[#allocation1 + $0x9] ss:$16 sm:%s1241_s10]   ;;  %v925_v3 = vsel %vm774_vm0, %v923_v62, %v920_v61  ;;  %v898_v7 = vld [vmem:[#allocation1 + $0x8] ss:$16 sm:%s1264_s27]   ;;  %389 = vst [vmem:[#allocation1 + $0xc0] sm:$0x3] %v386_v63 }
  0x19   :  { %v838_v2 = vld [vmem:[#allocation1 + $0x9] ss:$16 sm:%s1243_s11]   ;;  %v835_v4 = vsel %vm774_vm0, %v833_v1, %v830_v0  ;;  %v901_v8 = vld [vmem:[#allocation1 + $0x8] ss:$16 sm:%s1272_s3]   ;;  %s874_s9 = smov 3  ;;  %s877_s10 = smov 12 }
  0x1a   :  { %v843_v5 = vld [vmem:[#allocation1 + $0x9] ss:$16 sm:%s1245_s12]   ;;  %v840_v9 = vsel %vm778_vm1, %v838_v2, %v835_v4  ;;  %v903_v10 = vsel %vm774_vm0, %v901_v8, %v898_v7  ;;  %v906_v11 = vld [vmem:[#allocation1 + $0x8] ss:$16 sm:%s1274_s4]   ;;  %v1129_v18 = vld [vmem:[%s1428_s0 + $0x16] sm:$0x1] }
  0x1b   :  { %v911_v12 = vld [vmem:[#allocation1 + $0x8] ss:$16 sm:%s1282_s13]   ;;  %v845_v14 = vsel %vm782_vm2, %v843_v5, %v840_v9  ;;  %v908_v15 = vsel %vm778_vm1, %v906_v11, %v903_v10  ;;  %s882_s24 = smov 48  ;;  %s887_s25 = smov 192  ;;  %v418_v22 = vunpack.c.l.bf16 %v1129_v18  ;;  %v1131_v23 = vld [vmem:[%s1428_s0 + $0x14] sm:$0x1] }
  0x1c   :  { %v928_v13 = vld [vmem:[#allocation1 + $0x88] ss:$16 sm:%s927_s22]   ;;  %v1162_v19 = vpack.i.bf16 %v867_v6, %v845_v14  ;;  %v913_v20 = vsel %vm782_vm2, %v911_v12, %v908_v15  ;;  %v1133_v24 = vld [vmem:[%s1428_s0 + $0x12] sm:$0x1]  ;;  %v875_v26 = vld [vmem:[#allocation1 + $0x109] ss:$16 sm:%s874_s9]   ;;  %v450_v29 = vunpack.c.l.bf16 %v1131_v23 }
  0x1d   :  { %v930_v16 = vsel %vm778_vm1, %v928_v13, %v925_v3  ;;  %v933_v17 = vld [vmem:[#allocation1 + $0x88] ss:$16 sm:%s932_s23]   ;;  %v878_v27 = vld [vmem:[#allocation1 + $0x109] ss:$16 sm:%s877_s10]   ;;  %v482_v30 = vunpack.c.l.bf16 %v1133_v24  ;;  %s1177_s30 = smov 24   ;;  %s942_s2 = smov 3 }
  0x1e   :  { %v935_v21 = vsel %vm782_vm2, %v933_v17, %v930_v16  ;;  %v883_v28 = vld [vmem:[#allocation1 + $0x109] ss:$16 sm:%s882_s24]   ;;  %1163 = vrot.lane.b32.xlu0 %v1162_v19, %s1177_s30  ;;  %v880_v31 = vsel %vm774_vm0, %v878_v27, %v875_v26  ;;  %s945_s3 = smov 12  ;;  %421 = vst [vmem:[#allocation1 + $0xb0] sm:$0x3] %v418_v22  ;;  %s1178_s6 = smov 16  }
  0x1f   :  { %v1167_v25 = vpack.i.bf16 %v935_v21, %v913_v20  ;;  %v888_v32 = vld [vmem:[#allocation1 + $0x109] ss:$16 sm:%s887_s25]   ;;  %v1135_v33 = vld [vmem:[%s1428_s0 + $0x10] sm:$0x1]  ;;  %v885_v34 = vsel %vm778_vm1, %v883_v28, %v880_v31  ;;  %s950_s7 = smov 48  ;;  %s955_s8 = smov 192 }
  0x20   :  { %v943_v35 = vld [vmem:[#allocation1 + $0x108] ss:$16 sm:%s942_s2]   ;;  %453 = vst [vmem:[#allocation1 + $0xa0] sm:$0x3] %v450_v29  ;;  %485 = vst [vmem:[#allocation1 + $0x90] sm:$0x3] %v482_v30  ;;  %v514_v37 = vunpack.c.l.bf16 %v1135_v33  ;;  %v890_v38 = vsel %vm782_vm2, %v888_v32, %v885_v34 }
  0x21   :  { %1168 = vrot.lane.b32.xlu1 %v1167_v25, %s1178_s6  ;;  %v946_v36 = vld [vmem:[#allocation1 + $0x108] ss:$16 sm:%s945_s3]   ;;  %v1137_v42 = vld [vmem:[%s1428_s0 + $0xe] sm:$0x1]  ;;  %v1139_v45 = vld [vmem:[%s1428_s0 + $0xc] sm:$0x1] }
  0x22   :  { %v948_v39 = vsel %vm774_vm0, %v946_v36, %v943_v35  ;;  %v951_v40 = vld [vmem:[#allocation1 + $0x108] ss:$16 sm:%s950_s7]   ;;  %517 = vst [vmem:[#allocation1 + $0x80] sm:$0x3] %v514_v37  ;;  %v546_v44 = vunpack.c.l.bf16 %v1137_v42  ;;  %v1141_v46 = vld [vmem:[%s1428_s0 + $0xa] sm:$0x1]  ;;  %891 = vrot.lane.b32.xlu0 %v890_v38, %s1177_s30  ;;  %v578_v49 = vunpack.c.l.bf16 %v1139_v45 }
  0x23   :  { %v956_v41 = vld [vmem:[#allocation1 + $0x108] ss:$16 sm:%s955_s8]   ;;  %v953_v43 = vsel %vm778_vm1, %v951_v40, %v948_v39  ;;  %v1143_v47 = vld [vmem:[%s1428_s0 + $0x8] sm:$0x1]  ;;  %v610_v50 = vunpack.c.l.bf16 %v1141_v46  ;;  %v1145_v52 = vld [vmem:[%s1428_s0 + $0x6] sm:$0x1] }
  0x24   :  { %v958_v48 = vsel %vm782_vm2, %v956_v41, %v953_v43  ;;  %v642_v51 = vunpack.c.l.bf16 %v1143_v47  ;;  %v1147_v53 = vld [vmem:[%s1428_s0 + $0x4] sm:$0x1]  ;;  %v1149_v54 = vld [vmem:[%s1428_s0 + $0x2] sm:$0x1]  ;;  %549 = vst [vmem:[#allocation1 + $0x70] sm:$0x3] %v546_v44  ;;  %v674_v55 = vunpack.c.l.bf16 %v1145_v52 }
  0x25   :  { %959 = vrot.lane.b32.xlu1 %v958_v48, %s1178_s6  ;;  %v706_v56 = vunpack.c.l.bf16 %v1147_v53  ;;  %v738_v57 = vunpack.c.l.bf16 %v1149_v54  ;;  %v766_v58 = vld [vmem:[%s1428_s0] sm:$0x1]  ;;  %s1356_s25 = smov 3  ;;  %v1105_v59 = vld [vmem:[%s1428_s0 + $0x2e] sm:$0x1]  ;;  %s1361_s28 = smov 12 }
  0x26   :  { %581 = vst [vmem:[#allocation1 + $0x60] sm:$0x3] %v578_v49  ;;  %613 = vst [vmem:[#allocation1 + $0x50] sm:$0x3] %v610_v50  ;;  %v767_v60 = vunpack.c.l.bf16 %v766_v58  ;;  %s1363_s29 = smov 48  ;;  %v34_v61 = vunpack.c.l.bf16 %v1105_v59  ;;  %s1371_s5 = smov 192 }
  0x27   :  { %645 = vst [vmem:[#allocation1 + $0x40] sm:$0x3] %v642_v51  ;;  %v1107_v62 = vld [vmem:[%s1428_s0 + $0x2c] sm:$0x1]  ;;  %v1109_v63 = vld [vmem:[%s1428_s0 + $0x2a] sm:$0x1] }
  0x28   :  { %677 = vst [vmem:[#allocation1 + $0x30] sm:$0x3] %v674_v55  ;;  %709 = vst [vmem:[#allocation1 + $0x20] sm:$0x3] %v706_v56  ;;  %s987_s6 = smov 3  ;;  %v66_v0 = vunpack.c.l.bf16 %v1107_v62  ;;  %v98_v1 = vunpack.c.l.bf16 %v1109_v63  ;;  %s990_s16 = smov 12 }
  0x29   :  { %741 = vst [vmem:[#allocation1 + $0x10] sm:$0x3] %v738_v57  ;;  %v1111_v2 = vld [vmem:[%s1428_s0 + $0x28] sm:$0x1]  ;;  %v1113_v3 = vld [vmem:[%s1428_s0 + $0x26] sm:$0x1] }
  0x2a   :  { %769 = vst [vmem:[#allocation1] sm:$0x3] %v767_v60  ;;  %s995_s17 = smov 48  ;;  %37 = vst [vmem:[#allocation1 + $0x170] sm:$0x3] %v34_v61  ;;  %v130_v4 = vunpack.c.l.bf16 %v1111_v2  ;;  %v162_v5 = vunpack.c.l.bf16 %v1113_v3  ;;  %s1000_s21 = smov 192 }
  0x2b   :  { %v1115_v6 = vld [vmem:[%s1428_s0 + $0x24] sm:$0x1]  ;;  %v1117_v7 = vld [vmem:[%s1428_s0 + $0x22] sm:$0x1]  ;;  %69 = vst [vmem:[#allocation1 + $0x160] sm:$0x3] %v66_v0 }
  0x2c   :  { %101 = vst [vmem:[#allocation1 + $0x150] sm:$0x3] %v98_v1  ;;  %v194_v8 = vunpack.c.l.bf16 %v1115_v6  ;;  %v226_v9 = vunpack.c.l.bf16 %v1117_v7  ;;  %v1119_v10 = vld [vmem:[%s1428_s0 + $0x20] sm:$0x1]  ;;  %v988_v11 = vld [vmem:[#allocation1 + $0x81] ss:$16 sm:%s987_s6]  }
  0x2d   :  { %v991_v12 = vld [vmem:[#allocation1 + $0x81] ss:$16 sm:%s990_s16]   ;;  %133 = vst [vmem:[#allocation1 + $0x140] sm:$0x3] %v130_v4  ;;  %165 = vst [vmem:[#allocation1 + $0x130] sm:$0x3] %v162_v5  ;;  %v258_v14 = vunpack.c.l.bf16 %v1119_v10 }
  0x2e   :  { %v996_v13 = vld [vmem:[#allocation1 + $0x81] ss:$16 sm:%s995_s17]   ;;  %v993_v15 = vsel %vm774_vm0, %v991_v12, %v988_v11  ;;  %197 = vst [vmem:[#allocation1 + $0x120] sm:$0x3] %v194_v8  ;;  %229 = vst [vmem:[#allocation1 + $0x110] sm:$0x3] %v226_v9 }
  0x2f   :  { %s1389_s0 = smov 3  ;;  %s1391_s9 = smov 12  ;;  %261 = vst [vmem:[#allocation1 + $0x100] sm:$0x3] %v258_v14  ;;  %v998_v16 = vsel %vm778_vm1, %v996_v13, %v993_v15  ;;  %v1001_v17 = vld [vmem:[#allocation1 + $0x81] ss:$16 sm:%s1000_s21]  }
  0x30   :  { %s1393_s10 = smov 48  ;;  %s770_s11 = smov 3  ;;  %v1003_v23 = vsel %vm782_vm2, %v1001_v17, %v998_v16  ;;  %vm848_vm4 = vcmask 261312   ;;  %vm916_vm5 = vcmask 195712   ;;  %vm984_vm6 = vcmask 130112  }
  0x31   :  { %s772_s12 = smov 12  ;;  %s776_s24 = smov 48  ;;  %v966_v18 = vld [vmem:[#allocation1 + $0x1] ss:$16 sm:%s1356_s25]   ;;  %v771_v24 = vld [vmem:[#allocation1] ss:$16 sm:%s770_s11]  }
  0x32   :  { %s780_s26 = smov 192  ;;  %s787_s27 = smov 3  ;;  %v969_v19 = vld [vmem:[#allocation1 + $0x1] ss:$16 sm:%s1361_s28]   ;;  %v773_v25 = vld [vmem:[#allocation1] ss:$16 sm:%s772_s12]  }
  0x33   :  { %v974_v20 = vld [vmem:[#allocation1 + $0x1] ss:$16 sm:%s1363_s29]   ;;  %v971_v21 = vsel %vm774_vm0, %v969_v19, %v966_v18  ;;  %s1023_s25 = smov 192  ;;  %v775_v27 = vsel %vm774_vm0, %v773_v25, %v771_v24  ;;  %v777_v28 = vld [vmem:[#allocation1] ss:$16 sm:%s776_s24]   ;;  %s790_s28 = smov 12 }
  0x34   :  { %v979_v22 = vld [vmem:[#allocation1 + $0x1] ss:$16 sm:%s1371_s5]   ;;  %v976_v26 = vsel %vm778_vm1, %v974_v20, %v971_v21  ;;  %v781_v29 = vld [vmem:[#allocation1] ss:$16 sm:%s780_s26]   ;;  %v779_v31 = vsel %vm778_vm1, %v777_v28, %v775_v27  ;;  %s795_s29 = smov 48  ;;  %s1179_s30 = smov 8  }
  0x35   :  { %v981_v30 = vsel %vm782_vm2, %v979_v22, %v976_v26  ;;  %v788_v32 = vld [vmem:[#allocation1 + $0x80] ss:$16 sm:%s787_s27]   ;;  %v783_v37 = vsel %vm782_vm2, %v781_v29, %v779_v31  ;;  %s800_s2 = smov 192  ;;  %s808_s3 = smov 3  ;;  %v1180_v7 = vmov 0.0  }
  0x36   :  { %v1172_v33 = vpack.i.bf16 %v1003_v23, %v981_v30  ;;  %v1011_v34 = vld [vmem:[#allocation1 + $0x101] ss:$16 sm:%s1389_s0]   ;;  %785 = vst.msk [vmem:[#allocation0] sm:$0xff] %vm784_vm3, %v783_v37   ;;  %v791_v40 = vld [vmem:[#allocation1 + $0x80] ss:$16 sm:%s790_s28]   ;;  %s811_s4 = smov 12 }
  0x37   :  { %v1014_v35 = vld [vmem:[#allocation1 + $0x101] ss:$16 sm:%s1391_s9]   ;;  %v796_v41 = vld [vmem:[#allocation1 + $0x80] ss:$16 sm:%s795_s29]   ;;  %v793_v43 = vsel %vm774_vm0, %v791_v40, %v788_v32  ;;  %s816_s5 = smov 48  ;;  %s821_s6 = smov 192 }
  0x38   :  { %v1019_v36 = vld [vmem:[#allocation1 + $0x101] ss:$16 sm:%s1393_s10]   ;;  %v1016_v38 = vsel %vm774_vm0, %v1014_v35, %v1011_v34  ;;  %1173 = vrot.lane.b32.xlu0 %v1172_v33, %s1179_s30  ;;  %v798_v45 = vsel %vm778_vm1, %v796_v41, %v793_v43  ;;  %v801_v46 = vld [vmem:[#allocation1 + $0x80] ss:$16 sm:%s800_s2]  }
  0x39   :  { %v1024_v39 = vld [vmem:[#allocation1 + $0x101] ss:$16 sm:%s1023_s25]   ;;  %v1021_v42 = vsel %vm778_vm1, %v1019_v36, %v1016_v38  ;;  %v809_v47 = vld [vmem:[#allocation1 + $0x100] ss:$16 sm:%s808_s3]   ;;  %v803_v48 = vsel %vm782_vm2, %v801_v46, %v798_v45 }
  0x3a   :  { %v1026_v44 = vsel %vm782_vm2, %v1024_v39, %v1021_v42  ;;  %v812_v49 = vld [vmem:[#allocation1 + $0x100] ss:$16 sm:%s811_s4]   ;;  %806 = vst.msk [vmem:[#allocation0 + $0x8] sm:$0xff] %vm784_vm3, %v803_v48  }
  0x3b   :  { %1027 = vrot.lane.b32.xlu1 %v1026_v44, %s1179_s30  ;;  %v817_v50 = vld [vmem:[#allocation1 + $0x100] ss:$16 sm:%s816_s5]   ;;  %v814_v51 = vsel %vm774_vm0, %v812_v49, %v809_v47 }
  0x3c   :  { %v822_v52 = vld [vmem:[#allocation1 + $0x100] ss:$16 sm:%s821_s6]   ;;  %v819_v53 = vsel %vm778_vm1, %v817_v50, %v814_v51 }
  0x3d   :  { %v824_v54 = vsel %vm782_vm2, %v822_v52, %v819_v53 }
  0x3e   :  { %827 = vst.msk [vmem:[#allocation0 + $0x10] sm:$0xff] %vm784_vm3, %v824_v54  }
  0x90   :  { %v1164_v55 = vpop.permute.xlu0 %1163 }
  0x91   :  { %v1166_v56 = vunpack.i.h.bf16 %v1164_v55  ;;  %v1165_v57 = vunpack.i.l.bf16 %v1164_v55 }
  0x93   :  { %v1169_v58 = vpop.permute.xlu1 %1168  ;;  %872 = vst.msk [vmem:[#allocation0 + $0x8] sm:$0xff] %vm848_vm4, %v1166_v56   ;;  %849 = vst.msk [vmem:[#allocation0] sm:$0xff] %vm848_vm4, %v1165_v57  }
  0x94   :  { %v1171_v59 = vunpack.i.h.bf16 %v1169_v58  ;;  %v1170_v60 = vunpack.i.l.bf16 %v1169_v58  ;;  %v892_v61 = vpop.permute.xlu0 %891  }
  0x95   :  { %895 = vst.msk [vmem:[#allocation0 + $0x10] sm:$0xff] %vm848_vm4, %v892_v61  }
  0x96   :  { %917 = vst.msk [vmem:[#allocation0] sm:$0xff] %vm916_vm5, %v1170_v60   ;;  %940 = vst.msk [vmem:[#allocation0 + $0x8] sm:$0xff] %vm916_vm5, %v1171_v59  }
  0x97   :  { %v960_v62 = vpop.permute.xlu1 %959  }
  0x98   :  { %963 = vst.msk [vmem:[#allocation0 + $0x10] sm:$0xff] %vm916_vm5, %v960_v62  }
  0xaa   :  { %v1174_v63 = vpop.permute.xlu0 %1173 }
  0xab   :  { %v1176_v0 = vunpack.i.h.bf16 %v1174_v63  ;;  %v1175_v1 = vunpack.i.l.bf16 %v1174_v63 }
  0xad   :  { %v1028_v2 = vpop.permute.xlu1 %1027   ;;  %1008 = vst.msk [vmem:[#allocation0 + $0x8] sm:$0xff] %vm984_vm6, %v1176_v0   ;;  %985 = vst.msk [vmem:[#allocation0] sm:$0xff] %vm984_vm6, %v1175_v1  }
  0xae   :  { %1031 = vst.msk [vmem:[#allocation0 + $0x10] sm:$0xff] %vm984_vm6, %v1028_v2  }
  0xb4   :  { %v1043_v3 = vld [vmem:[#allocation0 + $0x8] sm:$0xff]  ;;  %v1037_v4 = vld [vmem:[#allocation0] sm:$0xff] }
  0xb5   :  { %v1050_v5 = vld [vmem:[#allocation0 + $0x10] sm:$0xff]  ;;  %v1156_v6 = vpack.c.bf16 %v1043_v3, %v1037_v4 }
  0xb6   :  { %v1051_v8 = vpack.c.bf16 %v1180_v7, %v1050_v5 }
  0xb7   :  { %1157 = vst [vmem:[%s1429_s1] sm:$0xff] %v1156_v6  }
  0xb8   :  { %1152 = vst [vmem:[%s1429_s1 + $0x8] sm:$0xf] %v1051_v8 }

// kernel: _lambda_.24
= control target key start
LH: loop header
LB: loop body
LE: loop exit
PB: predicated region body
PF: predicated region fallthrough
CT: control target
= control target key end

     0   :  { %vm64_vm0 = vcmask 1043456   ;;  %vm51_vm1 = vcmask 64512   ;;  %vm205_vm2 = vcmask 27648   ;;  %s336_s1 = inlined_call_operand.vmem [shape: bf16[8,4], index: 1, kind: input, shape index: {}]   ;;  %s337_s0 = inlined_call_operand.vmem [shape: bf16[64,8], index: 0, kind: input, shape index: {}]   ;;  %s338_s2 = inlined_call_operand.vmem [shape: f32[1,4], index: 2, kind: input, shape index: {}]   ;;  %s339_s3 = inlined_call_operand.vmem [shape: bf16[64,4], index: 3, kind: output, shape index: {}]  }
   0x1   :  { %v23_v0 = vld [vmem:[%s336_s1] sm:$0xf]  ;;  %v263_v3 = vld [vmem:[%s337_s0 + $0x10] sm:$0xff]   ;;  %v264_v4 = vld [vmem:[%s337_s0 + $0x8] sm:$0xff]  }
   0x2   :  { %260 = vmatprep.subr.msk.bf16.mxu0 %vm64_vm0, %v23_v0  ;;  %261 = vmatprep.subr.msk.bf16.mxu1 %vm64_vm0, %v23_v0  ;;  %v66_v1 = vsel %vm64_vm0, %v23_v0, 0  ;;  %v262_v2 = vld [vmem:[%s337_s0] sm:$0xff]   ;;  %v265_v5 = vld [vmem:[%s337_s0 + $0x18] sm:$0xff]  }
   0x3   :  { %249 = vmatpush3.bf16.msra.mxu0 %v66_v1  ;;  %259 = vmatpush3.bf16.msra.mxu1 %v66_v1  ;;  %v218_v6 = vld [vmem:[%s338_s2] ss:$0 sm:$0xff] }
   0x4   :  { %250 = vmatprep.mubr.msk.bf16.mxu0 %vm51_vm1, %v262_v2  ;;  %254 = vmatprep.mubr.msk.bf16.mxu1 %vm51_vm1, %v263_v3 }
   0x6   :  { %251 = vmatmul.mubr.msk.bf16.vlgmr.msra.gmra.mxu0 %vm51_vm1, %v264_v4  ;;  %255 = vmatmul.mubr.msk.bf16.vlgmr.msra.gmra.mxu1 %vm51_vm1, %v265_v5 }
  0xc6   :  { %v252_v7 = vpop.f32.mrf.mxu0  ;;  %v256_v9 = vpop.f32.mrf.mxu1 }
  0xc7   :  { %v111_v8 = vadd.f32 %v252_v7, %v218_v6  ;;  %v127_v10 = vadd.f32 %v256_v9, %v218_v6 }
  0xc8   :  { %v102_v11 = vpop.f32.mrf.mxu0  ;;  %v118_v14 = vpop.f32.mrf.mxu1 }
  0xc9   :  { %v135_v12 = vadd.f32 3.0, %v111_v8  ;;  %v103_v13 = vadd.f32 %v218_v6, %v102_v11  ;;  %v139_v15 = vadd.f32 3.0, %v127_v10  ;;  %v119_v16 = vadd.f32 %v218_v6, %v118_v14 }
  0xca   :  { %v253_v17 = vpop.f32.mrf.mxu0  ;;  %v257_v21 = vpop.f32.mrf.mxu1 }
  0xcb   :  { %v143_v18 = vmax.f32 %v135_v12, 0.0  ;;  %v133_v19 = vadd.f32 3.0, %v103_v13  ;;  %v114_v20 = vadd.f32 %v253_v17, %v218_v6  ;;  %v147_v22 = vmax.f32 %v139_v15, 0.0 }
  0xcc   :  { %v137_v23 = vadd.f32 3.0, %v119_v16  ;;  %v130_v24 = vadd.f32 %v257_v21, %v218_v6  ;;  %v105_v25 = vpop.f32.mrf.mxu0  ;;  %v121_v30 = vpop.f32.mrf.mxu1 }
  0xcd   :  { %v151_v26 = vmin.f32 %v143_v18, 6.0  ;;  %v141_v27 = vmax.f32 %v133_v19, 0.0  ;;  %v136_v28 = vadd.f32 3.0, %v114_v20  ;;  %v106_v29 = vadd.f32 %v218_v6, %v105_v25 }
  0xce   :  { %v155_v31 = vmin.f32 %v147_v22, 6.0  ;;  %v145_v32 = vmax.f32 %v137_v23, 0.0  ;;  %v140_v33 = vadd.f32 3.0, %v130_v24  ;;  %v122_v34 = vadd.f32 %v218_v6, %v121_v30 }
  0xcf   :  { %v159_v35 = vmul.f32 %v151_v26, %v111_v8  ;;  %v149_v36 = vmin.f32 %v141_v27, 6.0  ;;  %v144_v37 = vmax.f32 %v136_v28, 0.0  ;;  %v134_v38 = vadd.f32 3.0, %v106_v29 }
  0xd0   :  { %v163_v39 = vmul.f32 %v155_v31, %v127_v10  ;;  %v153_v40 = vmin.f32 %v145_v32, 6.0  ;;  %v148_v41 = vmax.f32 %v140_v33, 0.0  ;;  %v138_v42 = vadd.f32 3.0, %v122_v34 }
  0xd1   :  { %v167_v43 = vmul.f32 0.16666667, %v159_v35  ;;  %v157_v44 = vmul.f32 %v149_v36, %v103_v13  ;;  %v152_v45 = vmin.f32 %v144_v37, 6.0  ;;  %v142_v46 = vmax.f32 %v134_v38, 0.0 }
  0xd2   :  { %v171_v47 = vmul.f32 0.16666667, %v163_v39  ;;  %v161_v48 = vmul.f32 %v153_v40, %v119_v16  ;;  %v156_v49 = vmin.f32 %v148_v41, 6.0  ;;  %v146_v50 = vmax.f32 %v138_v42, 0.0 }
  0xd3   :  { %v237_v51 = vpack.c.bf16 %v167_v43, %v167_v43  ;;  %v165_v52 = vmul.f32 0.16666667, %v157_v44  ;;  %v160_v53 = vmul.f32 %v152_v45, %v114_v20  ;;  %v150_v54 = vmin.f32 %v142_v46, 6.0 }
  0xd4   :  { %v241_v55 = vpack.c.bf16 %v171_v47, %v171_v47  ;;  %v169_v56 = vmul.f32 0.16666667, %v161_v48  ;;  %v164_v57 = vmul.f32 %v156_v49, %v130_v24  ;;  %v154_v58 = vmin.f32 %v146_v50, 6.0 }
  0xd5   :  { %208 = vst.msk [vmem:[%s339_s3 + $0x8] sm:$0xf] %vm205_vm2, %v237_v51  ;;  %v235_v59 = vpack.c.bf16 %v165_v52, %v165_v52  ;;  %v168_v60 = vmul.f32 0.16666667, %v160_v53  ;;  %v158_v61 = vmul.f32 %v150_v54, %v106_v29 }
  0xd6   :  { %212 = vst.msk [vmem:[%s339_s3 + $0x18] sm:$0xf] %vm205_vm2, %v241_v55  ;;  %v239_v62 = vpack.c.bf16 %v169_v56, %v169_v56  ;;  %v172_v63 = vmul.f32 0.16666667, %v164_v57  ;;  %v162_v0 = vmul.f32 %v154_v58, %v122_v34 }
  0xd7   :  { %206 = vst.msk [vmem:[%s339_s3] sm:$0xf] %vm205_vm2, %v235_v59  ;;  %v238_v1 = vpack.c.bf16 %v168_v60, %v168_v60  ;;  %v166_v2 = vmul.f32 0.16666667, %v158_v61 }
  0xd8   :  { %210 = vst.msk [vmem:[%s339_s3 + $0x10] sm:$0xf] %vm205_vm2, %v239_v62  ;;  %v242_v3 = vpack.c.bf16 %v172_v63, %v172_v63  ;;  %v170_v4 = vmul.f32 0.16666667, %v162_v0 }
  0xd9   :  { %209 = vst.msk [vmem:[%s339_s3 + $0xc] sm:$0xf] %vm205_vm2, %v238_v1  ;;  %v236_v5 = vpack.c.bf16 %v166_v2, %v166_v2 }
  0xda   :  { %213 = vst.msk [vmem:[%s339_s3 + $0x1c] sm:$0xf] %vm205_vm2, %v242_v3  ;;  %v240_v6 = vpack.c.bf16 %v170_v4, %v170_v4 }
  0xdb   :  { %207 = vst.msk [vmem:[%s339_s3 + $0x4] sm:$0xf] %vm205_vm2, %v236_v5 }
  0xdc   :  { %211 = vst.msk [vmem:[%s339_s3 + $0x14] sm:$0xf] %vm205_vm2, %v240_v6 }

// kernel: _lambda_.22
= control target key start
LH: loop header
LB: loop body
LE: loop exit
PB: predicated region body
PF: predicated region fallthrough
CT: control target
= control target key end

     0   :  { %vm68_vm0 = vcmask 523264   ;;  %vm144_vm1 = vcmask 519168   ;;  %s247_s1 = inlined_call_operand.vmem [shape: bf16[64,64], index: 1, kind: input, shape index: {}]   ;;  %s248_s0 = inlined_call_operand.vmem [shape: bf16[32,64], index: 0, kind: input, shape index: {}]   ;;  %s249_s2 = inlined_call_operand.vmem [shape: f32[1,64], index: 2, kind: input, shape index: {}]   ;;  %s250_s3 = inlined_call_operand.vmem [shape: bf16[32,64], index: 3, kind: output, shape index: {}]  }
   0x1   :  { %v188_v0 = vld [vmem:[%s247_s1 + $0x18] sm:$0xff]   ;;  %v189_v1 = vld [vmem:[%s247_s1 + $0x10] sm:$0xff]   ;;  %v190_v2 = vld [vmem:[%s247_s1 + $0x8] sm:$0xff]  }
   0x2   :  { %176 = vmatprep.subr.bf16.mxu0 %v188_v0  ;;  %v192_v3 = vld [vmem:[%s248_s0] sm:$0xff]   ;;  %v193_v5 = vld [vmem:[%s248_s0 + $0x8] sm:$0xff]  }
   0x3   :  { %177 = vmatpush3.bf16.msra.mxu0 %v188_v0  ;;  %184 = vmatprep.mubr.msk.bf16.mxu0 %vm68_vm0, %v192_v3  ;;  %v191_v4 = vld [vmem:[%s247_s1] sm:$0xff]  }
   0x4   :  { %178 = vmatprep.subr.bf16.mxu0 %v189_v1  ;;  %v153_v6 = vld [vmem:[%s249_s2] ss:$0 sm:$0xff] }
   0x7   :  { %179 = vmatpush3.bf16.msra.mxu0 %v189_v1 }
   0x8   :  { %180 = vmatprep.subr.bf16.mxu0 %v190_v2 }
   0xb   :  { %181 = vmatpush3.bf16.msra.mxu0 %v190_v2 }
   0xc   :  { %182 = vmatprep.subr.bf16.mxu0 %v191_v4 }
   0xf   :  { %183 = vmatpush3.bf16.msra.mxu0 %v191_v4 }
  0x12   :  { %185 = vmatmul.mubr.msk.bf16.vlgmr.msra.gmra.mxu0 %vm68_vm0, %v193_v5 }
  0xd2   :  { %v186_v7 = vpop.f32.mrf.mxu0 }
  0xd3   :  { %v118_v8 = vadd.f32 %v186_v7, %v153_v6 }
  0xd4   :  { %v109_v9 = vpop.f32.mrf.mxu0 }
  0xd5   :  { %v126_v10 = vmax.f32 %v118_v8, 0.0  ;;  %v110_v11 = vadd.f32 %v153_v6, %v109_v9 }
  0xd6   :  { %v187_v12 = vpop.f32.mrf.mxu0 }
  0xd7   :  { %v168_v13 = vpack.c.bf16 %v126_v10, %v126_v10  ;;  %v124_v14 = vmax.f32 %v110_v11, 0.0  ;;  %v121_v15 = vadd.f32 %v187_v12, %v153_v6 }
  0xd8   :  { %v112_v16 = vpop.f32.mrf.mxu0 }
  0xd9   :  { %147 = vst.msk [vmem:[%s250_s3 + $0x8] sm:$0xf] %vm144_vm1, %v168_v13  ;;  %v166_v17 = vpack.c.bf16 %v124_v14, %v124_v14  ;;  %v127_v18 = vmax.f32 %v121_v15, 0.0  ;;  %v113_v19 = vadd.f32 %v153_v6, %v112_v16 }
  0xdb   :  { %145 = vst.msk [vmem:[%s250_s3] sm:$0xf] %vm144_vm1, %v166_v17  ;;  %v169_v20 = vpack.c.bf16 %v127_v18, %v127_v18  ;;  %v125_v21 = vmax.f32 %v113_v19, 0.0 }
  0xdd   :  { %148 = vst.msk [vmem:[%s250_s3 + $0xc] sm:$0xf] %vm144_vm1, %v169_v20  ;;  %v167_v22 = vpack.c.bf16 %v125_v21, %v125_v21 }
  0xdf   :  { %146 = vst.msk [vmem:[%s250_s3 + $0x4] sm:$0xf] %vm144_vm1, %v167_v22 }

// kernel: _lambda_.20
= control target key start
LH: loop header
LB: loop body
LE: loop exit
PB: predicated region body
PF: predicated region fallthrough
CT: control target
= control target key end

     0   :  { %vm55_vm0 = vcmask 1043456   ;;  %vm48_vm1 = vcmask 195584   ;;  %vm128_vm2 = vcmask 519168   ;;  %s216_s1 = inlined_call_operand.vmem [shape: bf16[24,64], index: 1, kind: input, shape index: {}]   ;;  %s217_s0 = inlined_call_operand.vmem [shape: bf16[32,24], index: 0, kind: input, shape index: {}]   ;;  %s218_s2 = inlined_call_operand.vmem [shape: f32[1,64], index: 2, kind: input, shape index: {}]   ;;  %s219_s3 = inlined_call_operand.vmem [shape: bf16[32,64], index: 3, kind: output, shape index: {}]  }
   0x1   :  { %v165_v0 = vld [vmem:[%s216_s1 + $0x8] ss:$0 sps:$4 sm:$0xff]   ;;  %v166_v1 = vld [vmem:[%s216_s1] sm:$0xff]  }
   0x2   :  { %164 = vmatprep.subr.msk.bf16.mxu0 %vm55_vm0, %v165_v0  ;;  %v57_v2 = vsel %vm55_vm0, %v165_v0, 0  ;;  %v167_v3 = vld [vmem:[%s217_s0] sm:$0xff]   ;;  %v168_v4 = vld [vmem:[%s217_s0 + $0x8] sm:$0xff]  }
   0x3   :  { %157 = vmatpush3.bf16.msra.mxu0 %v57_v2  ;;  %160 = vmatprep.mubr.msk.bf16.mxu0 %vm48_vm1, %v167_v3  ;;  %v137_v5 = vld [vmem:[%s218_s2] ss:$0 sm:$0xff] }
   0x4   :  { %158 = vmatprep.subr.bf16.mxu0 %v166_v1 }
   0x7   :  { %159 = vmatpush3.bf16.msra.mxu0 %v166_v1 }
   0xa   :  { %161 = vmatmul.mubr.msk.bf16.vlgmr.msra.gmra.mxu0 %vm48_vm1, %v168_v4 }
  0xca   :  { %v162_v6 = vpop.f32.mrf.mxu0 }
  0xcb   :  { %v102_v7 = vadd.f32 %v162_v6, %v137_v5 }
  0xcc   :  { %v93_v8 = vpop.f32.mrf.mxu0 }
  0xcd   :  { %v110_v9 = vmax.f32 %v102_v7, 0.0  ;;  %v94_v10 = vadd.f32 %v137_v5, %v93_v8 }
  0xce   :  { %v163_v11 = vpop.f32.mrf.mxu0 }
  0xcf   :  { %v150_v12 = vpack.c.bf16 %v110_v9, %v110_v9  ;;  %v108_v13 = vmax.f32 %v94_v10, 0.0  ;;  %v105_v14 = vadd.f32 %v163_v11, %v137_v5 }
  0xd0   :  { %v96_v15 = vpop.f32.mrf.mxu0 }
  0xd1   :  { %131 = vst.msk [vmem:[%s219_s3 + $0x8] sm:$0xf] %vm128_vm2, %v150_v12  ;;  %v148_v16 = vpack.c.bf16 %v108_v13, %v108_v13  ;;  %v111_v17 = vmax.f32 %v105_v14, 0.0  ;;  %v97_v18 = vadd.f32 %v137_v5, %v96_v15 }
  0xd3   :  { %129 = vst.msk [vmem:[%s219_s3] sm:$0xf] %vm128_vm2, %v148_v16  ;;  %v151_v19 = vpack.c.bf16 %v111_v17, %v111_v17  ;;  %v109_v20 = vmax.f32 %v97_v18, 0.0 }
  0xd5   :  { %132 = vst.msk [vmem:[%s219_s3 + $0xc] sm:$0xf] %vm128_vm2, %v151_v19  ;;  %v149_v21 = vpack.c.bf16 %v109_v20, %v109_v20 }
  0xd7   :  { %130 = vst.msk [vmem:[%s219_s3 + $0x4] sm:$0xf] %vm128_vm2, %v149_v21 }

// kernel: _lambda_.21
= control target key start
LH: loop header
LB: loop body
LE: loop exit
PB: predicated region body
PF: predicated region fallthrough
CT: control target
= control target key end

     0   :  { %s763_s12 = smov 0   ;;  %s848_s0 = inlined_call_operand.vmem [shape: bf16[4,80,8], index: 0, kind: input, shape index: {}]   ;;  %s849_s1 = inlined_call_operand.vmem [shape: bf16[3,8,8], index: 1, kind: input, shape index: {}]   ;;  %s850_s2 = inlined_call_operand.vmem [shape: f32[1,8], index: 2, kind: input, shape index: {}]   ;;  %s851_s3 = inlined_call_operand.vmem [shape: bf16[4,64,8], index: 3, kind: output, shape index: {}]  }
   0x1 LB: > { %s609_s13 = sadd.s32 4294967295, %s741_s12   ;;  %p613_p0 = scmp.ge.s32.totalorder %s741_s12, 1  ;;  %s741_s12 = sphi %s763_s12, %s13_s12  }
   0x2   : > { %p137_p1 = scmp.lt.s32.totalorder %s741_s12, 5 }
   0x4   : > { %p138_p2 = pnand %p613_p0, %p137_p1 }
   0x5   : > { %p161_p3 = scmp.lt.s32.totalorder (!%p138_p2), %s609_s13, 3 }
   0x6   : > { %141 = sbr.rel (%p138_p2) target bundleno = 247 (0xf7), region = 32 }
   0xb   : > { %v617_v0 = vld [vmem:[%s849_s1 + $0x4] sm:$0xf]  ;;  %vm217_vm0 = vcmask 1043456   ;;  %v180_v2 = vld [vmem:[%s849_s1] sm:$0xf]  ;;  %s853_s13 = smov (!%p161_p3, %s609_s13), 3 }
   0xc   : > { %711 = vmatprep.subr.msk.bf16.mxu1 %vm217_vm0, %v617_v0  ;;  %710 = vmatprep.subr.msk.bf16.mxu0 %vm217_vm0, %v617_v0  ;;  %v219_v1 = vsel %vm217_vm0, %v617_v0, 0  ;;  %v634_v3 = vld [vmem:[%s849_s1 + $0x8] sm:$0xf]  ;;  %s714_s20 = smul.u32 40, %s853_s13  ;;  %vm204_vm1 = vcmask 64512   ;;  %v305_v20 = vsel %vm217_vm0, %v180_v2, 0 }
   0xd   : > { %709 = vmatpush3.bf16.msra.mxu1 %v219_v1  ;;  %679 = vmatpush3.bf16.msra.mxu0 %v219_v1  ;;  %v415_v4 = vsel %vm217_vm0, %v634_v3, 0  ;;  %v643_v39 = vld [vmem:[%s850_s2] ss:$0 sm:$0xff]  ;;  %s654_s26 = sshll.u32 %s853_s13, 5  ;;  %vm545_vm2 = vcmask 60416  }
   0xe   : > { %712 = vmatprep.subr.msk.bf16.mxu1 %vm217_vm0, %v180_v2  ;;  %713 = vmatprep.subr.msk.bf16.mxu0 %vm217_vm0, %v634_v3  ;;  %s791_s23 = scalar_lea.vmem %s848_s0, %s714_s20  ;;  %s827_s29 = scalar_lea.vmem %s851_s3, %s654_s26 }
   0xf   : > { %v172_v5 = vld [vmem:[%s791_s23] sm:$0xf]  ;;  %v173_v6 = vld [vmem:[%s791_s23 + $0x4] sm:$0xf]  ;;  %v174_v7 = vld [vmem:[%s791_s23 + $0x8] sm:$0xf] }
  0x10   : > { %v175_v8 = vld [vmem:[%s791_s23 + $0xc] sm:$0xf]  ;;  %v618_v9 = vcombine.low %v173_v6, %v174_v7  ;;  %v176_v10 = vld [vmem:[%s791_s23 + $0x10] sm:$0xf]  ;;  %v177_v11 = vld [vmem:[%s791_s23 + $0x14] sm:$0xf]  ;;  %v626_v16 = vcombine.low %v172_v5, %v173_v6 }
  0x11   : > { %v178_v12 = vld [vmem:[%s791_s23 + $0x18] sm:$0xf]  ;;  %v179_v13 = vld [vmem:[%s791_s23 + $0x1c] sm:$0xf]  ;;  %v181_v14 = vld [vmem:[%s791_s23 + $0x20] sm:$0xf]  ;;  %v619_v15 = vcombine.low %v175_v8, %v176_v10  ;;  %v627_v23 = vcombine.low %v174_v7, %v175_v8  ;;  %v628_v24 = vcombine.low %v176_v10, %v177_v11 }
  0x12   : > { %680 = vmatprep.mubr.msk.bf16.mxu0 %vm204_vm1, %v618_v9  ;;  %v620_v17 = vcombine.low %v177_v11, %v178_v12  ;;  %v621_v18 = vcombine.low %v179_v13, %v181_v14  ;;  %v731_v19 = vld [vmem:[%s791_s23 + $0x8] sm:$0xff]   ;;  %v732_v21 = vld [vmem:[%s791_s23 + $0x10] sm:$0xff]   ;;  %v733_v22 = vld [vmem:[%s791_s23 + $0x18] sm:$0xff]   ;;  %v629_v26 = vcombine.low %v178_v12, %v179_v13 }
  0x13   : > { %681 = vmatmul.mubr.msk.bf16.vlgmr.msra.gmra.mxu0 %vm204_vm1, %v619_v15  ;;  %v734_v25 = vld [vmem:[%s791_s23 + $0x20] sm:$0xff]  }
  0x14   : > { %684 = vmatprep.mubr.msk.bf16.mxu1 %vm204_vm1, %v620_v17  ;;  %699 = vmatpush3.bf16.msra.mxu0 %v415_v4 }
  0x15   : > { %685 = vmatmul.mubr.msk.bf16.vlgmr.msra.gmra.mxu1 %vm204_vm1, %v621_v18  ;;  %700 = vmatprep.mubr.msk.bf16.mxu0 %vm204_vm1, %v731_v19 }
  0x16   : > { %689 = vmatpush3.bf16.msra.mxu1 %v305_v20  ;;  %690 = vmatprep.mubr.msk.bf16.mxu1 %vm204_vm1, %v626_v16 }
  0x1b   : > { %701 = vmatmul.mubr.msk.bf16.vlgmr.msra.gmra.mxu0 %vm204_vm1, %v732_v21 }
  0x1c   : > { %704 = vmatprep.mubr.msk.bf16.mxu0 %vm204_vm1, %v733_v22 }
  0x1d   : > { %691 = vmatmul.mubr.msk.bf16.vlgmr.msra.gmra.mxu1 %vm204_vm1, %v627_v23 }
  0x1e   : > { %694 = vmatprep.mubr.msk.bf16.mxu1 %vm204_vm1, %v628_v24 }
  0x23   : > { %705 = vmatmul.mubr.msk.bf16.gmra.mxu0 %vm204_vm1, %v734_v25 }
  0x25   : > { %695 = vmatmul.mubr.msk.bf16.gmra.mxu1 %vm204_vm1, %v629_v26 }
  0xd3   : > { %v682_v27 = vpop.f32.mrf.mxu0 }
  0xd5   : > { %v686_v28 = vpop.f32.mrf.mxu1  ;;  %v255_v29 = vpop.f32.mrf.mxu0 }
  0xd7   : > { %v271_v30 = vpop.f32.mrf.mxu1  ;;  %v683_v31 = vpop.f32.mrf.mxu0 }
  0xd9   : > { %v687_v32 = vpop.f32.mrf.mxu1  ;;  %v258_v33 = vpop.f32.mrf.mxu0 }
  0xdb   : > { %v274_v34 = vpop.f32.mrf.mxu1  ;;  %v702_v35 = vpop.f32.mrf.mxu0 }
  0xdd   : > { %v692_v36 = vpop.f32.mrf.mxu1  ;;  %v451_v37 = vpop.f32.mrf.mxu0 }
  0xde   : > { %v350_v38 = vadd.f32 %v692_v36, %v682_v27 }
  0xdf   : > { %v341_v40 = vpop.f32.mrf.mxu1  ;;  %v703_v41 = vpop.f32.mrf.mxu0 }
  0xe0   : > { %v484_v42 = vadd.f32 %v702_v35, %v350_v38  ;;  %v342_v43 = vadd.f32 %v341_v40, %v255_v29 }
  0xe1   : > { %v693_v44 = vpop.f32.mrf.mxu1  ;;  %v454_v45 = vpop.f32.mrf.mxu0 }
  0xe2   : > { %v499_v46 = vadd.f32 %v643_v39, %v484_v42  ;;  %v482_v47 = vadd.f32 %v451_v37, %v342_v43  ;;  %v353_v48 = vadd.f32 %v693_v44, %v683_v31 }
  0xe3   : > { %v344_v49 = vpop.f32.mrf.mxu1  ;;  %v706_v50 = vpop.f32.mrf.mxu0 }
  0xe4   : > { %v507_v51 = vmax.f32 %v499_v46, 0.0  ;;  %v497_v52 = vadd.f32 %v643_v39, %v482_v47  ;;  %v485_v53 = vadd.f32 %v703_v41, %v353_v48  ;;  %v345_v54 = vadd.f32 %v344_v49, %v258_v33 }
  0xe5   : > { %v696_v55 = vpop.f32.mrf.mxu1  ;;  %v467_v56 = vpop.f32.mrf.mxu0 }
  0xe6   : > { %v657_v57 = vpack.c.bf16 %v507_v51, %v507_v51  ;;  %v505_v58 = vmax.f32 %v497_v52, 0.0  ;;  %v500_v59 = vadd.f32 %v643_v39, %v485_v53  ;;  %v483_v60 = vadd.f32 %v454_v45, %v345_v54 }
  0xe7   : > { %v366_v61 = vadd.f32 %v696_v55, %v686_v28  ;;  %v357_v62 = vpop.f32.mrf.mxu1  ;;  %v707_v5 = vpop.f32.mrf.mxu0 }
  0xe8   : > { %548 = vst.msk [vmem:[%s827_s29 + $0x8] sm:$0xf] %vm545_vm2, %v657_v57  ;;  %v655_v63 = vpack.c.bf16 %v505_v58, %v505_v58  ;;  %v508_v0 = vmax.f32 %v500_v59, 0.0  ;;  %v498_v1 = vadd.f32 %v643_v39, %v483_v60  ;;  %v358_v2 = vadd.f32 %v357_v62, %v271_v30 }
  0xe9   : > { %v488_v3 = vadd.f32 %v706_v50, %v366_v61  ;;  %v697_v4 = vpop.f32.mrf.mxu1  ;;  %v470_v17 = vpop.f32.mrf.mxu0 }
  0xea   : > { %546 = vst.msk [vmem:[%s827_s29] sm:$0xf] %vm545_vm2, %v655_v63  ;;  %v658_v6 = vpack.c.bf16 %v508_v0, %v508_v0  ;;  %v506_v7 = vmax.f32 %v498_v1, 0.0  ;;  %v486_v8 = vadd.f32 %v467_v56, %v358_v2  ;;  %v369_v9 = vadd.f32 %v697_v4, %v687_v32 }
  0xeb   : > { %v503_v10 = vadd.f32 %v643_v39, %v488_v3  ;;  %v360_v11 = vpop.f32.mrf.mxu1 }
  0xec   : > { %549 = vst.msk [vmem:[%s827_s29 + $0xc] sm:$0xf] %vm545_vm2, %v658_v6  ;;  %v656_v12 = vpack.c.bf16 %v506_v7, %v506_v7  ;;  %v501_v13 = vadd.f32 %v643_v39, %v486_v8  ;;  %v489_v14 = vadd.f32 %v707_v5, %v369_v9  ;;  %v361_v15 = vadd.f32 %v360_v11, %v274_v34 }
  0xed   : > { %v511_v16 = vmax.f32 %v503_v10, 0.0 }
  0xee   : > { %547 = vst.msk [vmem:[%s827_s29 + $0x4] sm:$0xf] %vm545_vm2, %v656_v12  ;;  %v509_v18 = vmax.f32 %v501_v13, 0.0  ;;  %v504_v19 = vadd.f32 %v643_v39, %v489_v14  ;;  %v487_v20 = vadd.f32 %v470_v17, %v361_v15 }
  0xef   : > { %v661_v21 = vpack.c.bf16 %v511_v16, %v511_v16 }
  0xf0   : > { %v659_v22 = vpack.c.bf16 %v509_v18, %v509_v18  ;;  %v512_v23 = vmax.f32 %v504_v19, 0.0  ;;  %v502_v24 = vadd.f32 %v643_v39, %v487_v20 }
  0xf1   : > { %552 = vst.msk [vmem:[%s827_s29 + $0x18] sm:$0xf] %vm545_vm2, %v661_v21 }
  0xf2   : > { %550 = vst.msk [vmem:[%s827_s29 + $0x10] sm:$0xf] %vm545_vm2, %v659_v22  ;;  %v662_v25 = vpack.c.bf16 %v512_v23, %v512_v23  ;;  %v510_v26 = vmax.f32 %v502_v24, 0.0 }
  0xf4   : > { %553 = vst.msk [vmem:[%s827_s29 + $0x1c] sm:$0xf] %vm545_vm2, %v662_v25  ;;  %v660_v27 = vpack.c.bf16 %v510_v26, %v510_v26 }
  0xf6   : > { %551 = vst.msk [vmem:[%s827_s29 + $0x14] sm:$0xf] %vm545_vm2, %v660_v27 }
  0xf7 PF: > { %s13_s12 = sadd.s32 1, %s741_s12  }
  0xf8   : > { %p10_p4 = scmp.ge.s32.totalorder %s13_s12, 6  }
  0xfa   :  { %12 = sbr.rel (!%p10_p4) target bundleno = 1 (0x1), region = 64 }

// kernel: squeeze.3
= control target key start
LH: loop header
LB: loop body
LE: loop exit
PB: predicated region body
PF: predicated region fallthrough
CT: control target
= control target key end

     0   :  { %vm388_vm0 = vcmask 1047556   ;;  %vm390_vm1 = vcmask 64512   ;;  %s604_s20 = smov 16   ;;  %s605_s21 = smov 8   ;;  %vm418_vm2 = vcmask 261312   ;;  %vm450_vm3 = vcmask 195712   ;;  %s659_s0 = inlined_call_operand.vmem [shape: bf16[1,4,8,8,3], index: 0, kind: input, shape index: {}]   ;;  %s660_s1 = inlined_call_operand.vmem [shape: bf16[32,24], index: 1, kind: output, shape index: {}]  }
   0x1   :  { %v562_v0 = vld [vmem:[%s659_s0 + $0x1a] sm:$0xff]   ;;  %v565_v1 = vld [vmem:[%s659_s0 + $0x12] sm:$0xff]   ;;  %v569_v2 = vld [vmem:[%s659_s0 + $0xa] sm:$0xff]   ;;  %vm482_vm4 = vcmask 130112  }
   0x2   :  { %v146_v3 = vunpack.c.h.bf16 %v562_v0  ;;  %v162_v4 = vunpack.c.l.bf16 %v562_v0  ;;  %v194_v5 = vunpack.c.h.bf16 %v565_v1  ;;  %v573_v6 = vld [vmem:[%s659_s0 + $0x2] sm:$0xff]   ;;  %v226_v8 = vunpack.c.l.bf16 %v565_v1 }
   0x3   :  { %v382_v7 = vld [vmem:[%s659_s0] ss:$34 sps:$2 sm:$0xf]   ;;  %v258_v9 = vunpack.c.h.bf16 %v569_v2  ;;  %v554_v10 = vld [vmem:[%s659_s0 + $0x28] sm:$0xff]   ;;  %v290_v11 = vunpack.c.l.bf16 %v569_v2  ;;  %v322_v12 = vunpack.c.h.bf16 %v573_v6  ;;  %v558_v13 = vld [vmem:[%s659_s0 + $0x24] sm:$0xf]   ;;  %v354_v14 = vunpack.c.l.bf16 %v573_v6 }
   0x4   :  { %149 = vst [vmem:[#allocation1 + $0x78] ss:$8 sps:$4 sm:$0xff] %v146_v3   ;;  %165 = vst [vmem:[#allocation1 + $0x68] ss:$8 sps:$4 sm:$0xff] %v162_v4   ;;  %v383_v15 = vunpack.c.l.bf16 %v382_v7  ;;  %v18_v16 = vunpack.c.h.bf16 %v554_v10  ;;  %v50_v17 = vunpack.c.l.bf16 %v554_v10  ;;  %v82_v18 = vunpack.c.l.bf16 %v558_v13  ;;  %s603_s0 = smov 24  }
   0x5   :  { %197 = vst [vmem:[#allocation1 + $0x58] ss:$8 sps:$4 sm:$0xff] %v194_v5   ;;  %229 = vst [vmem:[#allocation1 + $0x48] ss:$8 sps:$4 sm:$0xff] %v226_v8   ;;  %v606_v7 = vmov 0.0  }
   0x6   :  { %261 = vst [vmem:[#allocation1 + $0x38] ss:$8 sps:$4 sm:$0xff] %v258_v9   ;;  %293 = vst [vmem:[#allocation1 + $0x28] ss:$8 sps:$4 sm:$0xff] %v290_v11  }
   0x7   :  { %325 = vst [vmem:[#allocation1 + $0x18] ss:$8 sps:$4 sm:$0xff] %v322_v12   ;;  %357 = vst [vmem:[#allocation1 + $0x8] ss:$8 sps:$4 sm:$0xff] %v354_v14  }
   0x8   :  { %385 = vst [vmem:[#allocation1] ss:$136 sps:$4 sm:$0xff] %v383_v15   ;;  %21 = vst [vmem:[#allocation1 + $0xb0] ss:$8 sps:$4 sm:$0xff] %v18_v16  }
   0x9   :  { %53 = vst [vmem:[#allocation1 + $0xa0] ss:$8 sps:$4 sm:$0xff] %v50_v17   ;;  %85 = vst [vmem:[#allocation1 + $0x90] ss:$8 sps:$4 sm:$0xff] %v82_v18  }
   0xc   :  { %v423_v19 = vld [vmem:[#allocation1 + $0x43] ss:$8 sm:$0xf0]   ;;  %v455_v20 = vld [vmem:[#allocation1 + $0x42] ss:$8 sm:$0xf0]  }
   0xd   :  { %v421_v21 = vld [vmem:[#allocation1 + $0x43] ss:$8 sm:$0xf]   ;;  %v453_v22 = vld [vmem:[#allocation1 + $0x42] ss:$8 sm:$0xf]  }
   0xe   :  { %v413_v23 = vld [vmem:[#allocation1 + $0x3] ss:$8 sm:$0xf0]   ;;  %v425_v24 = vsel %vm388_vm0, %v423_v19, %v421_v21  ;;  %v445_v25 = vld [vmem:[#allocation1 + $0x2] ss:$8 sm:$0xf0]   ;;  %v457_v26 = vsel %vm388_vm0, %v455_v20, %v453_v22 }
   0xf   :  { %v411_v27 = vld [vmem:[#allocation1 + $0x3] ss:$8 sm:$0xf]   ;;  %v443_v28 = vld [vmem:[#allocation1 + $0x2] ss:$8 sm:$0xf]  }
  0x10   :  { %v415_v29 = vsel %vm388_vm0, %v413_v23, %v411_v27  ;;  %v447_v30 = vsel %vm388_vm0, %v445_v25, %v443_v28  ;;  %v434_v31 = vld [vmem:[#allocation1 + $0x83] ss:$8 sm:$0xf0]   ;;  %v466_v32 = vld [vmem:[#allocation1 + $0x82] ss:$8 sm:$0xf0]  }
  0x11   :  { %v588_v33 = vpack.i.bf16 %v425_v24, %v415_v29  ;;  %v593_v34 = vpack.i.bf16 %v457_v26, %v447_v30  ;;  %v432_v35 = vld [vmem:[#allocation1 + $0x83] ss:$8 sm:$0xf]   ;;  %v464_v36 = vld [vmem:[#allocation1 + $0x82] ss:$8 sm:$0xf]  }
  0x12   :  { %v475_v37 = vld [vmem:[#allocation1 + $0x1] ss:$8 sm:$0xf]   ;;  %v436_v41 = vsel %vm388_vm0, %v434_v31, %v432_v35  ;;  %v468_v42 = vsel %vm388_vm0, %v466_v32, %v464_v36  ;;  %v386_v47 = vld [vmem:[#allocation1] ss:$8 sm:$0xf]  }
  0x13   :  { %v477_v38 = vld [vmem:[#allocation1 + $0x1] ss:$8 sm:$0xf0]   ;;  %589 = vrot.lane.b32.xlu0 %v588_v33, %s603_s0  ;;  %594 = vrot.lane.b32.xlu1 %v593_v34, %s604_s20  ;;  %v387_v48 = vld [vmem:[#allocation1] ss:$8 sm:$0xf0]  }
  0x14   :  { %v485_v39 = vld [vmem:[#allocation1 + $0x41] ss:$8 sm:$0xf]   ;;  %v479_v43 = vsel %vm388_vm0, %v477_v38, %v475_v37  ;;  %v389_v49 = vsel %vm388_vm0, %v387_v48, %v386_v47  ;;  %v393_v50 = vld [vmem:[#allocation1 + $0x40] ss:$8 sm:$0xf]  }
  0x15   :  { %v487_v40 = vld [vmem:[#allocation1 + $0x41] ss:$8 sm:$0xf0]   ;;  %v395_v51 = vld [vmem:[#allocation1 + $0x40] ss:$8 sm:$0xf0]  }
  0x16   :  { %v489_v44 = vsel %vm388_vm0, %v487_v40, %v485_v39  ;;  %v496_v45 = vld [vmem:[#allocation1 + $0x81] ss:$8 sm:$0xf]   ;;  %391 = vst.msk [vmem:[#allocation0] sm:$0xff] %vm390_vm1, %v389_v49   ;;  %v397_v53 = vsel %vm388_vm0, %v395_v51, %v393_v50 }
  0x17   :  { %v498_v46 = vld [vmem:[#allocation1 + $0x81] ss:$8 sm:$0xf0]   ;;  %437 = vrot.lane.b32.xlu0 %v436_v41, %s603_s0  ;;  %469 = vrot.lane.b32.xlu1 %v468_v42, %s604_s20  ;;  %v598_v52 = vpack.i.bf16 %v489_v44, %v479_v43  ;;  %v402_v54 = vld [vmem:[#allocation1 + $0x80] ss:$8 sm:$0xf]  }
  0x18   :  { %v404_v55 = vld [vmem:[#allocation1 + $0x80] ss:$8 sm:$0xf0]   ;;  %v500_v56 = vsel %vm388_vm0, %v498_v46, %v496_v45  ;;  %400 = vst.msk [vmem:[#allocation0 + $0x8] sm:$0xff] %vm390_vm1, %v397_v53  }
  0x19   :  { %v406_v57 = vsel %vm388_vm0, %v404_v55, %v402_v54 }
  0x1a   :  { %409 = vst.msk [vmem:[#allocation0 + $0x10] sm:$0xff] %vm390_vm1, %v406_v57  }
  0x1b   :  { %599 = vrot.lane.b32.xlu0 %v598_v52, %s605_s21  ;;  %501 = vrot.lane.b32.xlu1 %v500_v56, %s605_s21 }
  0x85   :  { %v590_v58 = vpop.permute.xlu0 %589  ;;  %v595_v59 = vpop.permute.xlu1 %594 }
  0x86   :  { %v592_v60 = vunpack.i.h.bf16 %v590_v58  ;;  %v591_v61 = vunpack.i.l.bf16 %v590_v58  ;;  %v597_v62 = vunpack.i.h.bf16 %v595_v59  ;;  %v596_v63 = vunpack.i.l.bf16 %v595_v59 }
  0x88   :  { %419 = vst.msk [vmem:[#allocation0] sm:$0xff] %vm418_vm2, %v591_v61   ;;  %430 = vst.msk [vmem:[#allocation0 + $0x8] sm:$0xff] %vm418_vm2, %v592_v60  }
  0x89   :  { %451 = vst.msk [vmem:[#allocation0] sm:$0xff] %vm450_vm3, %v596_v63   ;;  %462 = vst.msk [vmem:[#allocation0 + $0x8] sm:$0xff] %vm450_vm3, %v597_v62   ;;  %v438_v0 = vpop.permute.xlu0 %437   ;;  %v470_v1 = vpop.permute.xlu1 %469  }
  0x8a   :  { %441 = vst.msk [vmem:[#allocation0 + $0x10] sm:$0xff] %vm418_vm2, %v438_v0  }
  0x8b   :  { %473 = vst.msk [vmem:[#allocation0 + $0x10] sm:$0xff] %vm450_vm3, %v470_v1  }
  0x8d   :  { %v600_v2 = vpop.permute.xlu0 %599  ;;  %v502_v3 = vpop.permute.xlu1 %501  }
  0x8e   :  { %v602_v4 = vunpack.i.h.bf16 %v600_v2  ;;  %v601_v5 = vunpack.i.l.bf16 %v600_v2  ;;  %505 = vst.msk [vmem:[#allocation0 + $0x10] sm:$0xff] %vm482_vm4, %v502_v3  }
  0x90   :  { %494 = vst.msk [vmem:[#allocation0 + $0x8] sm:$0xff] %vm482_vm4, %v602_v4   ;;  %483 = vst.msk [vmem:[#allocation0] sm:$0xff] %vm482_vm4, %v601_v5  }
  0x95   :  { %v524_v6 = vld [vmem:[#allocation0 + $0x10] sm:$0xff] }
  0x96   :  { %v525_v8 = vpack.c.bf16 %v606_v7, %v524_v6 }
  0x97   :  { %v517_v9 = vld [vmem:[#allocation0 + $0x8] sm:$0xff]  ;;  %v511_v10 = vld [vmem:[#allocation0] sm:$0xff] }
  0x98   :  { %v582_v11 = vpack.c.bf16 %v517_v9, %v511_v10  ;;  %578 = vst [vmem:[%s660_s1 + $0x8] sm:$0xf] %v525_v8 }
  0x9a   :  { %583 = vst [vmem:[%s660_s1] sm:$0xff] %v582_v11  }

// kernel: _lambda_.25
= control target key start
LH: loop header
LB: loop body
LE: loop exit
PB: predicated region body
PF: predicated region fallthrough
CT: control target
= control target key end

     0   :  { %vm64_vm0 = vcmask 1041408   ;;  %vm51_vm1 = vcmask 31744   ;;  %vm213_vm2 = vcmask 125952   ;;  %s384_s1 = inlined_call_operand.vmem [shape: bf16[4,16], index: 1, kind: input, shape index: {}]   ;;  %s385_s0 = inlined_call_operand.vmem [shape: bf16[64,4], index: 0, kind: input, shape index: {}]   ;;  %s386_s2 = inlined_call_operand.vmem [shape: f32[1,16], index: 2, kind: input, shape index: {}]   ;;  %s387_s3 = inlined_call_operand.vmem [shape: bf16[64,16], index: 3, kind: output, shape index: {}]  }
   0x1   :  { %v23_v0 = vld [vmem:[%s384_s1] sm:$0x3]  ;;  %v279_v3 = vld [vmem:[%s385_s0 + $0x10] sm:$0xff]   ;;  %v280_v4 = vld [vmem:[%s385_s0 + $0x8] sm:$0xff]  }
   0x2   :  { %276 = vmatprep.subr.msk.bf16.mxu0 %vm64_vm0, %v23_v0  ;;  %277 = vmatprep.subr.msk.bf16.mxu1 %vm64_vm0, %v23_v0  ;;  %v66_v1 = vsel %vm64_vm0, %v23_v0, 0  ;;  %v278_v2 = vld [vmem:[%s385_s0] sm:$0xff]   ;;  %v281_v5 = vld [vmem:[%s385_s0 + $0x18] sm:$0xff]  }
   0x3   :  { %265 = vmatpush3.bf16.msra.mxu0 %v66_v1  ;;  %275 = vmatpush3.bf16.msra.mxu1 %v66_v1  ;;  %v226_v6 = vld [vmem:[%s386_s2] ss:$0 sm:$0xff] }
   0x4   :  { %266 = vmatprep.mubr.msk.bf16.mxu0 %vm51_vm1, %v278_v2  ;;  %270 = vmatprep.mubr.msk.bf16.mxu1 %vm51_vm1, %v279_v3 }
   0x6   :  { %267 = vmatmul.mubr.msk.bf16.vlgmr.msra.gmra.mxu0 %vm51_vm1, %v280_v4  ;;  %271 = vmatmul.mubr.msk.bf16.vlgmr.msra.gmra.mxu1 %vm51_vm1, %v281_v5 }
  0xc6   :  { %v268_v7 = vpop.f32.mrf.mxu0  ;;  %v272_v9 = vpop.f32.mrf.mxu1 }
  0xc7   :  { %v111_v8 = vadd.f32 %v268_v7, %v226_v6  ;;  %v127_v10 = vadd.f32 %v272_v9, %v226_v6 }
  0xc8   :  { %v102_v11 = vpop.f32.mrf.mxu0  ;;  %v118_v14 = vpop.f32.mrf.mxu1 }
  0xc9   :  { %v237_v12 = vmul.f32 -1.442695, %v111_v8  ;;  %v103_v13 = vadd.f32 %v226_v6, %v102_v11  ;;  %v241_v15 = vmul.f32 -1.442695, %v127_v10  ;;  %v119_v16 = vadd.f32 %v226_v6, %v118_v14 }
  0xca   :  { %v269_v17 = vpop.f32.mrf.mxu0  ;;  %v273_v20 = vpop.f32.mrf.mxu1 }
  0xcb   :  { %282 = vpow2.f32 %v237_v12  ;;  %v235_v18 = vmul.f32 -1.442695, %v103_v13  ;;  %v114_v19 = vadd.f32 %v269_v17, %v226_v6  ;;  %v239_v21 = vmul.f32 -1.442695, %v119_v16 }
  0xcc   :  { %284 = vpow2.f32 %v241_v15  ;;  %v130_v22 = vadd.f32 %v273_v20, %v226_v6  ;;  %v105_v23 = vpop.f32.mrf.mxu0  ;;  %v121_v26 = vpop.f32.mrf.mxu1 }
  0xcd   :  { %286 = vpow2.f32 %v235_v18  ;;  %v238_v24 = vmul.f32 -1.442695, %v114_v19  ;;  %v106_v25 = vadd.f32 %v226_v6, %v105_v23  ;;  %v122_v28 = vadd.f32 %v226_v6, %v121_v26 }
  0xce   :  { %288 = vpow2.f32 %v239_v21  ;;  %v242_v27 = vmul.f32 -1.442695, %v130_v22 }
  0xcf   :  { %290 = vpow2.f32 %v238_v24  ;;  %v236_v29 = vmul.f32 -1.442695, %v106_v25  ;;  %v240_v30 = vmul.f32 -1.442695, %v122_v28 }
  0xd0   :  { %292 = vpow2.f32 %v242_v27 }
  0xd1   :  { %294 = vpow2.f32 %v236_v29 }
  0xd2   :  { %296 = vpow2.f32 %v240_v30 }
  0xd8   :  { %v283_v31 = vpop.eup %282 }
  0xd9   :  { %v285_v32 = vpop.eup %284  ;;  %v159_v33 = vadd.f32 1.0, %v283_v31 }
  0xda   :  { %v287_v34 = vpop.eup %286  ;;  %v163_v35 = vadd.f32 1.0, %v285_v32 }
  0xdb   :  { %v289_v36 = vpop.eup %288  ;;  %298 = vrcp.f32 %v159_v33  ;;  %v157_v37 = vadd.f32 1.0, %v287_v34 }
  0xdc   :  { %v291_v38 = vpop.eup %290  ;;  %300 = vrcp.f32 %v163_v35  ;;  %v161_v39 = vadd.f32 1.0, %v289_v36 }
  0xdd   :  { %v293_v40 = vpop.eup %292  ;;  %302 = vrcp.f32 %v157_v37  ;;  %v160_v41 = vadd.f32 1.0, %v291_v38 }
  0xde   :  { %v295_v42 = vpop.eup %294  ;;  %304 = vrcp.f32 %v161_v39  ;;  %v164_v43 = vadd.f32 1.0, %v293_v40 }
  0xdf   :  { %v297_v44 = vpop.eup %296  ;;  %306 = vrcp.f32 %v160_v41  ;;  %v158_v45 = vadd.f32 1.0, %v295_v42 }
  0xe0   :  { %308 = vrcp.f32 %v164_v43  ;;  %v162_v46 = vadd.f32 1.0, %v297_v44 }
  0xe1   :  { %310 = vrcp.f32 %v158_v45 }
  0xe2   :  { %312 = vrcp.f32 %v162_v46 }
  0xe8   :  { %v299_v47 = vpop.eup %298 }
  0xe9   :  { %v301_v48 = vpop.eup %300  ;;  %v253_v49 = vpack.c.bf16 %v299_v47, %v299_v47 }
  0xea   :  { %v303_v50 = vpop.eup %302  ;;  %v257_v51 = vpack.c.bf16 %v301_v48, %v301_v48 }
  0xeb   :  { %v305_v52 = vpop.eup %304  ;;  %216 = vst.msk [vmem:[%s387_s3 + $0x8] sm:$0xf] %vm213_vm2, %v253_v49  ;;  %v251_v53 = vpack.c.bf16 %v303_v50, %v303_v50 }
  0xec   :  { %v307_v54 = vpop.eup %306  ;;  %220 = vst.msk [vmem:[%s387_s3 + $0x18] sm:$0xf] %vm213_vm2, %v257_v51  ;;  %v255_v55 = vpack.c.bf16 %v305_v52, %v305_v52 }
  0xed   :  { %v309_v56 = vpop.eup %308  ;;  %214 = vst.msk [vmem:[%s387_s3] sm:$0xf] %vm213_vm2, %v251_v53  ;;  %v254_v57 = vpack.c.bf16 %v307_v54, %v307_v54 }
  0xee   :  { %v311_v58 = vpop.eup %310  ;;  %218 = vst.msk [vmem:[%s387_s3 + $0x10] sm:$0xf] %vm213_vm2, %v255_v55  ;;  %v258_v59 = vpack.c.bf16 %v309_v56, %v309_v56 }
  0xef   :  { %v313_v60 = vpop.eup %312  ;;  %217 = vst.msk [vmem:[%s387_s3 + $0xc] sm:$0xf] %vm213_vm2, %v254_v57  ;;  %v252_v61 = vpack.c.bf16 %v311_v58, %v311_v58 }
  0xf0   :  { %221 = vst.msk [vmem:[%s387_s3 + $0x1c] sm:$0xf] %vm213_vm2, %v258_v59  ;;  %v256_v62 = vpack.c.bf16 %v313_v60, %v313_v60 }
  0xf1   :  { %215 = vst.msk [vmem:[%s387_s3 + $0x4] sm:$0xf] %vm213_vm2, %v252_v61 }
  0xf2   :  { %219 = vst.msk [vmem:[%s387_s3 + $0x14] sm:$0xf] %vm213_vm2, %v256_v62 }

// kernel: _lambda_.34
= control target key start
LH: loop header
LB: loop body
LE: loop exit
PB: predicated region body
PF: predicated region fallthrough
CT: control target
= control target key end

     0   :  { %s308_s1 = inlined_call_operand.vmem [shape: bf16[128,128], index: 1, kind: input, shape index: {}]   ;;  %s309_s0 = inlined_call_operand.vmem [shape: bf16[32,128], index: 0, kind: input, shape index: {}]   ;;  %s310_s2 = inlined_call_operand.vmem [shape: f32[1,128], index: 2, kind: input, shape index: {}]   ;;  %s311_s3 = inlined_call_operand.vmem [shape: bf16[32,128], index: 3, kind: output, shape index: {}]  }
   0x1   :  { %v239_v0 = vld [vmem:[%s308_s1 + $0x38] sm:$0xff]   ;;  %v240_v1 = vld [vmem:[%s308_s1 + $0x30] sm:$0xff]   ;;  %v241_v2 = vld [vmem:[%s308_s1 + $0x28] sm:$0xff]  }
   0x2   :  { %219 = vmatprep.subr.bf16.mxu0 %v239_v0  ;;  %v242_v3 = vld [vmem:[%s308_s1 + $0x20] sm:$0xff]   ;;  %v243_v5 = vld [vmem:[%s308_s1 + $0x18] sm:$0xff]   ;;  %v244_v6 = vld [vmem:[%s308_s1 + $0x10] sm:$0xff]  }
   0x3   :  { %220 = vmatpush3.bf16.msra.mxu0 %v239_v0  ;;  %v247_v4 = vld [vmem:[%s309_s0] sm:$0xff]   ;;  %v245_v7 = vld [vmem:[%s308_s1 + $0x8] sm:$0xff]  }
   0x4   :  { %221 = vmatprep.subr.bf16.mxu0 %v240_v1  ;;  %235 = vmatprep.mubr.bf16.mxu0 %v247_v4  ;;  %v246_v8 = vld [vmem:[%s308_s1] sm:$0xff]   ;;  %v248_v9 = vld [vmem:[%s309_s0 + $0x8] sm:$0xff]  }
   0x5   :  { %v179_v11 = vld [vmem:[%s310_s2] ss:$0 sm:$0xff] }
   0x7   :  { %222 = vmatpush3.bf16.msra.mxu0 %v240_v1 }
   0x8   :  { %223 = vmatprep.subr.bf16.mxu0 %v241_v2 }
   0xb   :  { %224 = vmatpush3.bf16.msra.mxu0 %v241_v2 }
   0xc   :  { %225 = vmatprep.subr.bf16.mxu0 %v242_v3 }
   0xf   :  { %226 = vmatpush3.bf16.msra.mxu0 %v242_v3 }
  0x10   :  { %227 = vmatprep.subr.bf16.mxu0 %v243_v5 }
  0x13   :  { %228 = vmatpush3.bf16.msra.mxu0 %v243_v5 }
  0x14   :  { %229 = vmatprep.subr.bf16.mxu0 %v244_v6 }
  0x17   :  { %230 = vmatpush3.bf16.msra.mxu0 %v244_v6 }
  0x18   :  { %231 = vmatprep.subr.bf16.mxu0 %v245_v7 }
  0x1b   :  { %232 = vmatpush3.bf16.msra.mxu0 %v245_v7 }
  0x1c   :  { %233 = vmatprep.subr.bf16.mxu0 %v246_v8 }
  0x1f   :  { %234 = vmatpush3.bf16.msra.mxu0 %v246_v8 }
  0x22   :  { %236 = vmatmul.mubr.bf16.vlgmr.msra.gmra.mxu0 %v248_v9 }
  0xe2   :  { %v237_v10 = vpop.f32.mrf.mxu0 }
  0xe3   :  { %v145_v13 = vadd.f32 %v237_v10, %v179_v11 }
  0xe4   :  { %v136_v12 = vpop.f32.mrf.mxu0 }
  0xe5   :  { %v137_v15 = vadd.f32 %v179_v11, %v136_v12  ;;  %v153_v18 = vmax.f32 %v145_v13, 0.0 }
  0xe6   :  { %v238_v14 = vpop.f32.mrf.mxu0 }
  0xe7   :  { %v148_v16 = vadd.f32 %v238_v14, %v179_v11  ;;  %v151_v21 = vmax.f32 %v137_v15, 0.0 }
  0xe8   :  { %v139_v17 = vpop.f32.mrf.mxu0 }
  0xe9   :  { %v154_v19 = vmax.f32 %v148_v16, 0.0  ;;  %v140_v20 = vadd.f32 %v179_v11, %v139_v17 }
  0xeb   :  { %v206_v22 = vpack.c.bf16 %v154_v19, %v153_v18  ;;  %v152_v23 = vmax.f32 %v140_v20, 0.0 }
  0xed   :  { %208 = vst [vmem:[%s311_s3 + $0x8] sm:$0xff] %v206_v22   ;;  %v201_v24 = vpack.c.bf16 %v152_v23, %v151_v21 }
  0xef   :  { %202 = vst [vmem:[%s311_s3] sm:$0xff] %v201_v24  }

// kernel: _lambda_.26
= control target key start
LH: loop header
LB: loop body
LE: loop exit
PB: predicated region body
PF: predicated region fallthrough
CT: control target
= control target key end

     0   :  { %s611_s18 = smov 0   ;;  %s686_s0 = inlined_call_operand.vmem [shape: bf16[4,8,8,8], index: 0, kind: input, shape index: {}]   ;;  %s687_s1 = inlined_call_operand.vmem [shape: bf16[4,8,8], index: 1, kind: input, shape index: {}]   ;;  %s688_s2 = inlined_call_operand.vmem [shape: bf16[4,8,8], index: 2, kind: input, shape index: {}]   ;;  %s689_s3 = inlined_call_operand.vmem [shape: f32[1,1,8], index: 3, kind: input, shape index: {}]   ;;  %s690_s4 = inlined_call_operand.vmem [shape: f32[1,1,8], index: 4, kind: input, shape index: {}]   ;;  %s691_s5 = inlined_call_operand.vmem [shape: bf16[4,8,8,8], index: 5, kind: output, shape index: {}]  }
   0x1 LB: > { %s527_s19 = sadd.s32 4294967295, %s578_s18   ;;  %p531_p0 = scmp.ge.s32.totalorder %s578_s18, 1  ;;  %s578_s18 = sphi %s611_s18, %s15_s18  }
   0x2   : > { %p205_p1 = scmp.lt.s32.totalorder %s578_s18, 5 }
   0x4   : > { %p206_p2 = pnand %p531_p0, %p205_p1 }
   0x5   : > { %p241_p3 = scmp.lt.s32.totalorder (!%p206_p2), %s527_s19, 3 }
   0x6   : > { %209 = sbr.rel (%p206_p2) target bundleno = 44 (0x2c), region = 40 }
   0xb   : > { %v284_v0 = vlaneseq  ;;  %v580_v1 = vmov 1966171168   ;;  %s693_s19 = smov (!%p241_p3, %s527_s19), 3  ;;  %v538_v36 = vld [vmem:[%s689_s3] ss:$0 sm:$0xff]  ;;  %vm439_vm0 = vcmask 60416  }
   0xc   : > { %v282_v2 = vunpack.c.l.s4 %v580_v1  ;;  %s542_s20 = sshll.u32 %s693_s19, 5  ;;  %s534_s21 = sshll.u32 %s693_s19, 2  ;;  %v539_v45 = vld [vmem:[%s690_s4] ss:$0 sm:$0xff] }
   0xd   : > { %v285_v3 = vshrl.u32 %v284_v0, 7  ;;  %s245_s24 = scalar_lea.vmem %s686_s0, %s542_s20  ;;  %s249_s27 = scalar_lea.vmem %s687_s1, %s534_s21 }
   0xe   : > { %v283_v4 = vunpack.c.0.s8 %v282_v2  ;;  %s253_s30 = scalar_lea.vmem %s688_s2, %s534_s21  ;;  %v275_v6 = vld [vmem:[%s249_s27] sm:$0xf]  ;;  %v636_v12 = vld [vmem:[%s245_s24 + $0x8] sm:$0xff]   ;;  %v639_v17 = vld [vmem:[%s245_s24 + $0x10] sm:$0xff]   ;;  %s663_s12 = scalar_lea.vmem %s691_s5, %s542_s20 }
   0xf   : > { %v276_v7 = vunpack.c.l.bf16 %v275_v6  ;;  %v634_v8 = vld [vmem:[%s245_s24] sm:$0xff]   ;;  %v331_v11 = vsub.s32 0, %v285_v3  ;;  %v641_v19 = vld [vmem:[%s245_s24 + $0x18] sm:$0xff]   ;;  %v550_v22 = vunpack.c.l.bf16 %v636_v12  ;;  %v551_v23 = vunpack.c.h.bf16 %v636_v12 }
  0x10   : > { %v286_v5 = vsub.s32 %v283_v4, %v285_v3  ;;  %v277_v9 = vld [vmem:[%s253_s30] sm:$0xf]  ;;  %v546_v14 = vunpack.c.l.bf16 %v634_v8  ;;  %v547_v21 = vunpack.c.h.bf16 %v634_v8  ;;  %v554_v28 = vunpack.c.l.bf16 %v639_v17 }
  0x11   : > { %v280_v13 = vcombine.high %v276_v7, %v276_v7  ;;  %v278_v20 = vunpack.c.l.bf16 %v277_v9  ;;  %v555_v29 = vunpack.c.h.bf16 %v639_v17  ;;  %v558_v31 = vunpack.c.l.bf16 %v641_v19 }
  0x12   : > { %v287_v10 = vrot.slane %v276_v7, %v286_v5  ;;  %v559_v40 = vunpack.c.h.bf16 %v641_v19 }
  0x13   : > { %v294_v18 = vrot.slane %v280_v13, %v286_v5 }
  0x14   : > { %v303_v15 = vrot.slane %v287_v10, %v286_v5  ;;  %v295_v16 = vcombine.high %v287_v10, %v287_v10 }
  0x15   : > { %v310_v27 = vrot.slane %v294_v18, %v286_v5  ;;  %v296_v30 = vcombine.high %v294_v18, %v294_v18 }
  0x16   : > { %v332_v24 = vrot.slane %v303_v15, %v331_v11  ;;  %v317_v25 = vrot.slane %v295_v16, %v286_v5  ;;  %v325_v26 = vcombine.high %v303_v15, %v303_v15 }
  0x17   : > { %v348_v37 = vrot.slane %v310_v27, %v331_v11  ;;  %v324_v38 = vrot.slane %v296_v30, %v286_v5  ;;  %v326_v39 = vcombine.high %v310_v27, %v310_v27 }
  0x18   : > { %v369_v32 = vmul.f32 %v546_v14, %v332_v24  ;;  %v336_v33 = vrot.slane %v317_v25, %v331_v11  ;;  %v340_v34 = vrot.slane %v325_v26, %v331_v11  ;;  %v327_v35 = vcombine.high %v317_v25, %v317_v25 }
  0x19   : > { %v373_v46 = vmul.f32 %v554_v28, %v348_v37  ;;  %v352_v47 = vrot.slane %v324_v38, %v331_v11  ;;  %v356_v48 = vrot.slane %v326_v39, %v331_v11  ;;  %v328_v49 = vcombine.high %v324_v38, %v324_v38 }
  0x1a   : > { %v377_v41 = vmul.f32 %v369_v32, %v278_v20  ;;  %v370_v42 = vmul.f32 %v547_v21, %v336_v33  ;;  %v371_v43 = vmul.f32 %v550_v22, %v340_v34  ;;  %v344_v44 = vrot.slane %v327_v35, %v331_v11 }
  0x1b   : > { %v381_v54 = vmul.f32 %v373_v46, %v278_v20  ;;  %v374_v55 = vmul.f32 %v555_v29, %v352_v47  ;;  %v375_v56 = vmul.f32 %v558_v31, %v356_v48  ;;  %v360_v57 = vrot.slane %v328_v49, %v331_v11 }
  0x1c   : > { %v392_v50 = vmul.f32 %v538_v36, %v377_v41  ;;  %v378_v51 = vmul.f32 %v370_v42, %v278_v20  ;;  %v379_v52 = vmul.f32 %v371_v43, %v278_v20  ;;  %v372_v53 = vmul.f32 %v551_v23, %v344_v44 }
  0x1d   : > { %v396_v62 = vmul.f32 %v538_v36, %v381_v54  ;;  %v382_v63 = vmul.f32 %v374_v55, %v278_v20  ;;  %v383_v0 = vmul.f32 %v375_v56, %v278_v20  ;;  %v376_v1 = vmul.f32 %v559_v40, %v360_v57 }
  0x1e   : > { %v407_v58 = vadd.f32 %v539_v45, %v392_v50  ;;  %v393_v59 = vmul.f32 %v538_v36, %v378_v51  ;;  %v394_v60 = vmul.f32 %v538_v36, %v379_v52  ;;  %v380_v61 = vmul.f32 %v372_v53, %v278_v20 }
  0x1f   : > { %v411_v6 = vadd.f32 %v539_v45, %v396_v62  ;;  %v397_v7 = vmul.f32 %v538_v36, %v382_v63  ;;  %v398_v8 = vmul.f32 %v538_v36, %v383_v0  ;;  %v384_v9 = vmul.f32 %v376_v1, %v278_v20 }
  0x20   : > { %v415_v2 = vadd.f32 %v546_v14, %v407_v58  ;;  %v408_v3 = vadd.f32 %v539_v45, %v393_v59  ;;  %v409_v4 = vadd.f32 %v539_v45, %v394_v60  ;;  %v395_v5 = vmul.f32 %v538_v36, %v380_v61 }
  0x21   : > { %v419_v16 = vadd.f32 %v554_v28, %v411_v6  ;;  %v412_v14 = vadd.f32 %v539_v45, %v397_v7  ;;  %v413_v17 = vadd.f32 %v539_v45, %v398_v8  ;;  %v399_v18 = vmul.f32 %v538_v36, %v384_v9 }
  0x22   : > { %v423_v10 = vmax.f32 %v415_v2, 0.0  ;;  %v416_v13 = vadd.f32 %v547_v21, %v408_v3  ;;  %v417_v11 = vadd.f32 %v550_v22, %v409_v4  ;;  %v410_v15 = vadd.f32 %v539_v45, %v395_v5 }
  0x23   : > { %v427_v22 = vmax.f32 %v419_v16, 0.0  ;;  %v420_v25 = vadd.f32 %v555_v29, %v412_v14  ;;  %v421_v26 = vadd.f32 %v558_v31, %v413_v17  ;;  %v414_v27 = vadd.f32 %v539_v45, %v399_v18 }
  0x24   : > { %v431_v19 = vpack.c.bf16 %v423_v10, %v423_v10  ;;  %v424_v24 = vmax.f32 %v416_v13, 0.0  ;;  %v425_v20 = vmax.f32 %v417_v11, 0.0  ;;  %v418_v21 = vadd.f32 %v551_v23, %v410_v15 }
  0x25   : > { %v435_v33 = vpack.c.bf16 %v427_v22, %v427_v22  ;;  %v428_v34 = vmax.f32 %v420_v25, 0.0  ;;  %v429_v35 = vmax.f32 %v421_v26, 0.0  ;;  %v422_v36 = vadd.f32 %v559_v40, %v414_v27 }
  0x26   : > { %440 = vst.msk [vmem:[%s663_s12] sm:$0xf] %vm439_vm0, %v431_v19  ;;  %v432_v28 = vpack.c.bf16 %v424_v24, %v424_v24  ;;  %v433_v30 = vpack.c.bf16 %v425_v20, %v425_v20  ;;  %v426_v32 = vmax.f32 %v418_v21, 0.0 }
  0x27   : > { %444 = vst.msk [vmem:[%s663_s12 + $0x10] sm:$0xf] %vm439_vm0, %v435_v33  ;;  %v436_v23 = vpack.c.bf16 %v428_v34, %v428_v34  ;;  %v437_v29 = vpack.c.bf16 %v429_v35, %v429_v35  ;;  %v430_v31 = vmax.f32 %v422_v36, 0.0 }
  0x28   : > { %441 = vst.msk [vmem:[%s663_s12 + $0x4] sm:$0xf] %vm439_vm0, %v432_v28  ;;  %442 = vst.msk [vmem:[%s663_s12 + $0x8] sm:$0xf] %vm439_vm0, %v433_v30  ;;  %v434_v12 = vpack.c.bf16 %v426_v32, %v426_v32 }
  0x29   : > { %445 = vst.msk [vmem:[%s663_s12 + $0x14] sm:$0xf] %vm439_vm0, %v436_v23  ;;  %446 = vst.msk [vmem:[%s663_s12 + $0x18] sm:$0xf] %vm439_vm0, %v437_v29  ;;  %v438_v37 = vpack.c.bf16 %v430_v31, %v430_v31 }
  0x2a   : > { %443 = vst.msk [vmem:[%s663_s12 + $0xc] sm:$0xf] %vm439_vm0, %v434_v12 }
  0x2b   : > { %447 = vst.msk [vmem:[%s663_s12 + $0x1c] sm:$0xf] %vm439_vm0, %v438_v37 }
  0x2c PF: > { %s15_s18 = sadd.s32 1, %s578_s18  }
  0x2d   : > { %p12_p4 = scmp.ge.s32.totalorder %s15_s18, 6  }
  0x2f   :  { %14 = sbr.rel (!%p12_p4) target bundleno = 1 (0x1), region = 76 }

// kernel: _lambda_.35
= control target key start
LH: loop header
LB: loop body
LE: loop exit
PB: predicated region body
PF: predicated region fallthrough
CT: control target
= control target key end

     0   :  { %vm102_vm0 = vcmask 392192   ;;  %vm304_vm1 = vcmask 125952   ;;  %s573_s1 = inlined_call_operand.vmem [shape: bf16[48,16], index: 1, kind: input, shape index: {}]   ;;  %s574_s0 = inlined_call_operand.vmem [shape: bf16[128,48], index: 0, kind: input, shape index: {}]   ;;  %s575_s2 = inlined_call_operand.vmem [shape: f32[1,16], index: 2, kind: input, shape index: {}]   ;;  %s576_s3 = inlined_call_operand.vmem [shape: bf16[128,16], index: 3, kind: output, shape index: {}]  }
   0x1   :  { %v416_v0 = vld [vmem:[%s573_s1 + $0x10] sm:$0xff]   ;;  %v417_v1 = vld [vmem:[%s573_s1 + $0x8] sm:$0xff]   ;;  %v418_v2 = vld [vmem:[%s573_s1] sm:$0xff]  }
   0x2   :  { %388 = vmatprep.subr.bf16.mxu0 %v416_v0  ;;  %410 = vmatprep.subr.bf16.mxu1 %v416_v0  ;;  %v419_v3 = vld [vmem:[%s574_s0] sm:$0xff]   ;;  %v421_v5 = vld [vmem:[%s574_s0 + $0x8] sm:$0xff]   ;;  %v423_v7 = vld [vmem:[%s574_s0 + $0x10] sm:$0xff]  }
   0x3   :  { %389 = vmatpush3.bf16.msra.mxu0 %v416_v0  ;;  %413 = vmatpush3.bf16.msra.mxu1 %v416_v0  ;;  %v420_v4 = vld [vmem:[%s574_s0 + $0x20] sm:$0xff]   ;;  %v422_v6 = vld [vmem:[%s574_s0 + $0x28] sm:$0xff]   ;;  %v424_v8 = vld [vmem:[%s574_s0 + $0x30] sm:$0xff]  }
   0x4   :  { %390 = vmatprep.subr.bf16.mxu0 %v417_v1  ;;  %411 = vmatprep.subr.bf16.mxu1 %v417_v1  ;;  %v425_v9 = vld [vmem:[%s574_s0 + $0x18] sm:$0xff]   ;;  %v491_v11 = vld [vmem:[%s575_s2] ss:$0 sm:$0xff] }
   0x5   :  { %394 = vmatprep.mubr.msk.bf16.mxu0 %vm102_vm0, %v419_v3  ;;  %402 = vmatprep.mubr.msk.bf16.mxu1 %vm102_vm0, %v420_v4  ;;  %v426_v10 = vld [vmem:[%s574_s0 + $0x38] sm:$0xff]  }
   0x7   :  { %391 = vmatpush3.bf16.msra.mxu0 %v417_v1  ;;  %414 = vmatpush3.bf16.msra.mxu1 %v417_v1 }
   0x8   :  { %392 = vmatprep.subr.bf16.mxu0 %v418_v2  ;;  %412 = vmatprep.subr.bf16.mxu1 %v418_v2 }
   0xb   :  { %393 = vmatpush3.bf16.msra.mxu0 %v418_v2  ;;  %415 = vmatpush3.bf16.msra.mxu1 %v418_v2 }
   0xe   :  { %395 = vmatmul.mubr.msk.bf16.vlgmr.msra.gmra.mxu0 %vm102_vm0, %v421_v5  ;;  %403 = vmatmul.mubr.msk.bf16.vlgmr.msra.gmra.mxu1 %vm102_vm0, %v422_v6 }
   0xf   :  { %398 = vmatprep.mubr.msk.bf16.mxu0 %vm102_vm0, %v423_v7  ;;  %406 = vmatprep.mubr.msk.bf16.mxu1 %vm102_vm0, %v424_v8 }
  0x16   :  { %399 = vmatmul.mubr.msk.bf16.gmra.mxu0 %vm102_vm0, %v425_v9  ;;  %407 = vmatmul.mubr.msk.bf16.gmra.mxu1 %vm102_vm0, %v426_v10 }
  0xce   :  { %v396_v12 = vpop.f32.mrf.mxu0  ;;  %v404_v13 = vpop.f32.mrf.mxu1 }
  0xcf   :  { %v170_v14 = vadd.f32 %v396_v12, %v491_v11  ;;  %v202_v15 = vadd.f32 %v404_v13, %v491_v11 }
  0xd0   :  { %v161_v16 = vpop.f32.mrf.mxu0  ;;  %v193_v17 = vpop.f32.mrf.mxu1 }
  0xd1   :  { %v226_v18 = vmax.f32 %v170_v14, 0.0  ;;  %v234_v19 = vmax.f32 %v202_v15, 0.0  ;;  %v162_v20 = vadd.f32 %v491_v11, %v161_v16  ;;  %v194_v21 = vadd.f32 %v491_v11, %v193_v17 }
  0xd2   :  { %v397_v22 = vpop.f32.mrf.mxu0  ;;  %v405_v23 = vpop.f32.mrf.mxu1 }
  0xd3   :  { %v363_v24 = vpack.c.bf16 %v226_v18, %v226_v18  ;;  %v371_v25 = vpack.c.bf16 %v234_v19, %v234_v19  ;;  %v224_v26 = vmax.f32 %v162_v20, 0.0  ;;  %v232_v27 = vmax.f32 %v194_v21, 0.0 }
  0xd4   :  { %v173_v28 = vadd.f32 %v397_v22, %v491_v11  ;;  %v205_v29 = vadd.f32 %v405_v23, %v491_v11  ;;  %v164_v30 = vpop.f32.mrf.mxu0  ;;  %v196_v31 = vpop.f32.mrf.mxu1 }
  0xd5   :  { %307 = vst.msk [vmem:[%s576_s3 + $0x8] sm:$0xf] %vm304_vm1, %v363_v24  ;;  %315 = vst.msk [vmem:[%s576_s3 + $0x28] sm:$0xf] %vm304_vm1, %v371_v25  ;;  %v361_v32 = vpack.c.bf16 %v224_v26, %v224_v26  ;;  %v369_v33 = vpack.c.bf16 %v232_v27, %v232_v27  ;;  %v165_v34 = vadd.f32 %v491_v11, %v164_v30 }
  0xd6   :  { %v197_v35 = vadd.f32 %v491_v11, %v196_v31  ;;  %v227_v36 = vmax.f32 %v173_v28, 0.0  ;;  %v235_v37 = vmax.f32 %v205_v29, 0.0  ;;  %v400_v38 = vpop.f32.mrf.mxu0  ;;  %v408_v39 = vpop.f32.mrf.mxu1 }
  0xd7   :  { %305 = vst.msk [vmem:[%s576_s3] sm:$0xf] %vm304_vm1, %v361_v32  ;;  %313 = vst.msk [vmem:[%s576_s3 + $0x20] sm:$0xf] %vm304_vm1, %v369_v33  ;;  %v225_v40 = vmax.f32 %v165_v34, 0.0  ;;  %v186_v42 = vadd.f32 %v400_v38, %v491_v11  ;;  %v218_v43 = vadd.f32 %v408_v39, %v491_v11 }
  0xd8   :  { %v233_v41 = vmax.f32 %v197_v35, 0.0  ;;  %v364_v44 = vpack.c.bf16 %v227_v36, %v227_v36  ;;  %v372_v45 = vpack.c.bf16 %v235_v37, %v235_v37  ;;  %v177_v46 = vpop.f32.mrf.mxu0  ;;  %v209_v47 = vpop.f32.mrf.mxu1 }
  0xd9   :  { %v362_v48 = vpack.c.bf16 %v225_v40, %v225_v40  ;;  %v230_v50 = vmax.f32 %v186_v42, 0.0  ;;  %v238_v51 = vmax.f32 %v218_v43, 0.0  ;;  %v178_v52 = vadd.f32 %v491_v11, %v177_v46 }
  0xda   :  { %v370_v49 = vpack.c.bf16 %v233_v41, %v233_v41  ;;  %308 = vst.msk [vmem:[%s576_s3 + $0xc] sm:$0xf] %vm304_vm1, %v364_v44  ;;  %316 = vst.msk [vmem:[%s576_s3 + $0x2c] sm:$0xf] %vm304_vm1, %v372_v45  ;;  %v210_v53 = vadd.f32 %v491_v11, %v209_v47  ;;  %v401_v54 = vpop.f32.mrf.mxu0  ;;  %v409_v55 = vpop.f32.mrf.mxu1 }
  0xdb   :  { %306 = vst.msk [vmem:[%s576_s3 + $0x4] sm:$0xf] %vm304_vm1, %v362_v48  ;;  %v367_v56 = vpack.c.bf16 %v230_v50, %v230_v50  ;;  %v375_v57 = vpack.c.bf16 %v238_v51, %v238_v51  ;;  %v189_v58 = vadd.f32 %v401_v54, %v491_v11  ;;  %v221_v59 = vadd.f32 %v409_v55, %v491_v11 }
  0xdc   :  { %314 = vst.msk [vmem:[%s576_s3 + $0x24] sm:$0xf] %vm304_vm1, %v370_v49  ;;  %v228_v60 = vmax.f32 %v178_v52, 0.0  ;;  %v236_v61 = vmax.f32 %v210_v53, 0.0  ;;  %v180_v62 = vpop.f32.mrf.mxu0  ;;  %v212_v63 = vpop.f32.mrf.mxu1 }
  0xdd   :  { %311 = vst.msk [vmem:[%s576_s3 + $0x18] sm:$0xf] %vm304_vm1, %v367_v56  ;;  %319 = vst.msk [vmem:[%s576_s3 + $0x38] sm:$0xf] %vm304_vm1, %v375_v57  ;;  %v231_v0 = vmax.f32 %v189_v58, 0.0  ;;  %v239_v1 = vmax.f32 %v221_v59, 0.0  ;;  %v181_v2 = vadd.f32 %v491_v11, %v180_v62  ;;  %v213_v3 = vadd.f32 %v491_v11, %v212_v63 }
  0xde   :  { %v365_v4 = vpack.c.bf16 %v228_v60, %v228_v60  ;;  %v373_v5 = vpack.c.bf16 %v236_v61, %v236_v61 }
  0xdf   :  { %v368_v6 = vpack.c.bf16 %v231_v0, %v231_v0  ;;  %v376_v7 = vpack.c.bf16 %v239_v1, %v239_v1  ;;  %v229_v8 = vmax.f32 %v181_v2, 0.0  ;;  %v237_v9 = vmax.f32 %v213_v3, 0.0 }
  0xe0   :  { %309 = vst.msk [vmem:[%s576_s3 + $0x10] sm:$0xf] %vm304_vm1, %v365_v4  ;;  %317 = vst.msk [vmem:[%s576_s3 + $0x30] sm:$0xf] %vm304_vm1, %v373_v5 }
  0xe1   :  { %312 = vst.msk [vmem:[%s576_s3 + $0x1c] sm:$0xf] %vm304_vm1, %v368_v6  ;;  %320 = vst.msk [vmem:[%s576_s3 + $0x3c] sm:$0xf] %vm304_vm1, %v376_v7  ;;  %v366_v10 = vpack.c.bf16 %v229_v8, %v229_v8  ;;  %v374_v11 = vpack.c.bf16 %v237_v9, %v237_v9 }
  0xe3   :  { %310 = vst.msk [vmem:[%s576_s3 + $0x14] sm:$0xf] %vm304_vm1, %v366_v10  ;;  %318 = vst.msk [vmem:[%s576_s3 + $0x34] sm:$0xf] %vm304_vm1, %v374_v11 }

// kernel: _lambda_.37
= control target key start
LH: loop header
LB: loop body
LE: loop exit
PB: predicated region body
PF: predicated region fallthrough
CT: control target
= control target key end

     0   :  { %vm54_vm0 = vcmask 1043456   ;;  %v260_v0 = vmov 0.0   ;;  %vm261_vm1 = vmmov 0   ;;  %vm44_vm2 = vcmask 64512   ;;  %s321_s1 = inlined_call_operand.vmem [shape: bf16[8,32], index: 1, kind: input, shape index: {}]   ;;  %s322_s0 = inlined_call_operand.vmem [shape: bf16[48,8], index: 0, kind: input, shape index: {}]   ;;  %s323_s2 = inlined_call_operand.vmem [shape: f32[1,32], index: 2, kind: input, shape index: {}]   ;;  %s324_s3 = inlined_call_operand.vmem [shape: bf16[48,32], index: 3, kind: output, shape index: {}]  }
   0x1   :  { %229 = vmatprep.subr.bf16.mxu1 %v260_v0  ;;  %v21_v1 = vld [vmem:[%s321_s1] sm:$0xf]  ;;  %215 = vmatprep.subr.bf16.mxu0 %v260_v0  ;;  %v233_v3 = vld [vmem:[%s322_s0 + $0x8] sm:$0xff]   ;;  %v235_v5 = vld [vmem:[%s322_s0 + $0x10] sm:$0xff]   ;;  %vm175_vm3 = vcmask 257024  }
   0x2   :  { %v56_v2 = vsel %vm54_vm0, %v21_v1, 0  ;;  %221 = vmatprep.mubr.msk.bf16.mxu1 %vm261_vm1, %v260_v0  ;;  %217 = vmatprep.mubr.msk.bf16.mxu0 %vm261_vm1, %v260_v0  ;;  %v234_v4 = vld [vmem:[%s322_s0] sm:$0xff]  }
   0x3   :  { %230 = vmatpush3.bf16.msra.mxu1 %v56_v2  ;;  %216 = vmatpush3.bf16.msra.mxu0 %v56_v2  ;;  %v186_v6 = vld [vmem:[%s323_s2] ss:$0 sm:$0xff] }
   0x6   :  { %222 = vmatmul.mubr.msk.bf16.vlgmr.msra.gmra.mxu1 %vm44_vm2, %v233_v3  ;;  %218 = vmatmul.mubr.msk.bf16.vlgmr.msra.gmra.mxu0 %vm44_vm2, %v234_v4 }
   0x7   :  { %225 = vmatprep.mubr.msk.bf16.mxu1 %vm261_vm1, %v260_v0 }
   0xe   :  { %226 = vmatmul.mubr.msk.bf16.gmra.mxu1 %vm44_vm2, %v235_v5 }
  0xc6   :  { %v100_v7 = vpop.f32.mrf.mxu1  ;;  %v92_v8 = vpop.f32.mrf.mxu0 }
  0xc7   :  { %v101_v9 = vadd.f32 %v186_v6, %v100_v7  ;;  %v93_v10 = vadd.f32 %v186_v6, %v92_v8 }
  0xc8   :  { %v223_v11 = vpop.f32.mrf.mxu1  ;;  %v219_v12 = vpop.f32.mrf.mxu0 }
  0xc9   :  { %v195_v13 = vmul.f32 -1.442695, %v101_v9  ;;  %v193_v14 = vmul.f32 -1.442695, %v93_v10 }
  0xca   :  { %v103_v15 = vpop.f32.mrf.mxu1  ;;  %v95_v16 = vpop.f32.mrf.mxu0 }
  0xcb   :  { %236 = vpow2.f32 %v195_v13  ;;  %v104_v17 = vadd.f32 %v186_v6, %v103_v15  ;;  %v96_v18 = vadd.f32 %v186_v6, %v95_v16 }
  0xcc   :  { %238 = vpow2.f32 %v193_v14  ;;  %v224_v19 = vpop.f32.mrf.mxu1  ;;  %v220_v20 = vpop.f32.mrf.mxu0 }
  0xcd   :  { %v196_v21 = vmul.f32 -1.442695, %v104_v17  ;;  %v194_v22 = vmul.f32 -1.442695, %v96_v18 }
  0xce   :  { %v108_v23 = vpop.f32.mrf.mxu1 }
  0xcf   :  { %240 = vpow2.f32 %v196_v21  ;;  %v109_v24 = vadd.f32 %v186_v6, %v108_v23 }
  0xd0   :  { %242 = vpow2.f32 %v194_v22  ;;  %v227_v25 = vpop.f32.mrf.mxu1 }
  0xd1   :  { %v197_v26 = vmul.f32 -1.442695, %v109_v24 }
  0xd2   :  { %v111_v27 = vpop.f32.mrf.mxu1 }
  0xd3   :  { %244 = vpow2.f32 %v197_v26  ;;  %v112_v28 = vadd.f32 %v186_v6, %v111_v27 }
  0xd4   :  { %v228_v29 = vpop.f32.mrf.mxu1 }
  0xd5   :  { %v198_v30 = vmul.f32 -1.442695, %v112_v28 }
  0xd7   :  { %246 = vpow2.f32 %v198_v30 }
  0xd8   :  { %v237_v31 = vpop.eup %236 }
  0xd9   :  { %v239_v32 = vpop.eup %238  ;;  %v135_v33 = vadd.f32 1.0, %v237_v31 }
  0xda   :  { %v133_v34 = vadd.f32 1.0, %v239_v32 }
  0xdb   :  { %248 = vrcp.f32 %v135_v33 }
  0xdc   :  { %v241_v35 = vpop.eup %240  ;;  %250 = vrcp.f32 %v133_v34 }
  0xdd   :  { %v243_v36 = vpop.eup %242  ;;  %v136_v37 = vadd.f32 1.0, %v241_v35 }
  0xde   :  { %v134_v38 = vadd.f32 1.0, %v243_v36 }
  0xdf   :  { %252 = vrcp.f32 %v136_v37 }
  0xe0   :  { %v245_v39 = vpop.eup %244  ;;  %254 = vrcp.f32 %v134_v38 }
  0xe1   :  { %v137_v40 = vadd.f32 1.0, %v245_v39 }
  0xe3   :  { %256 = vrcp.f32 %v137_v40 }
  0xe4   :  { %v247_v41 = vpop.eup %246 }
  0xe5   :  { %v138_v42 = vadd.f32 1.0, %v247_v41 }
  0xe7   :  { %258 = vrcp.f32 %v138_v42 }
  0xe8   :  { %v249_v43 = vpop.eup %248 }
  0xe9   :  { %v251_v44 = vpop.eup %250  ;;  %v207_v45 = vpack.c.bf16 %v249_v43, %v249_v43 }
  0xea   :  { %v205_v46 = vpack.c.bf16 %v251_v44, %v251_v44 }
  0xeb   :  { %178 = vst.msk [vmem:[%s324_s3 + $0x8] sm:$0xf] %vm175_vm3, %v207_v45 }
  0xec   :  { %v253_v47 = vpop.eup %252  ;;  %176 = vst.msk [vmem:[%s324_s3] sm:$0xf] %vm175_vm3, %v205_v46 }
  0xed   :  { %v255_v48 = vpop.eup %254  ;;  %v208_v49 = vpack.c.bf16 %v253_v47, %v253_v47 }
  0xee   :  { %v206_v50 = vpack.c.bf16 %v255_v48, %v255_v48 }
  0xef   :  { %179 = vst.msk [vmem:[%s324_s3 + $0xc] sm:$0xf] %vm175_vm3, %v208_v49 }
  0xf0   :  { %v257_v51 = vpop.eup %256  ;;  %177 = vst.msk [vmem:[%s324_s3 + $0x4] sm:$0xf] %vm175_vm3, %v206_v50 }
  0xf1   :  { %v209_v52 = vpack.c.bf16 %v257_v51, %v257_v51 }
  0xf3   :  { %180 = vst.msk [vmem:[%s324_s3 + $0x10] sm:$0xf] %vm175_vm3, %v209_v52 }
  0xf4   :  { %v259_v53 = vpop.eup %258 }
  0xf5   :  { %v210_v54 = vpack.c.bf16 %v259_v53, %v259_v53 }
  0xf7   :  { %181 = vst.msk [vmem:[%s324_s3 + $0x14] sm:$0xf] %vm175_vm3, %v210_v54 }

// kernel: _lambda_.36
= control target key start
LH: loop header
LB: loop body
LE: loop exit
PB: predicated region body
PF: predicated region fallthrough
CT: control target
= control target key end

     0   :  { %v229_v0 = vmov 0.0   ;;  %vm230_vm0 = vmmov 0   ;;  %vm51_vm1 = vcmask 130048   ;;  %vm172_vm2 = vcmask 60416   ;;  %s290_s1 = inlined_call_operand.vmem [shape: bf16[16,8], index: 1, kind: input, shape index: {}]   ;;  %s291_s0 = inlined_call_operand.vmem [shape: bf16[48,16], index: 0, kind: input, shape index: {}]   ;;  %s292_s2 = inlined_call_operand.vmem [shape: f32[1,8], index: 2, kind: input, shape index: {}]   ;;  %s293_s3 = inlined_call_operand.vmem [shape: bf16[48,8], index: 3, kind: output, shape index: {}]  }
   0x1   :  { %207 = vmatprep.subr.bf16.mxu0 %v229_v0  ;;  %221 = vmatprep.subr.bf16.mxu1 %v229_v0  ;;  %v225_v1 = vld [vmem:[%s290_s1] sm:$0xff]   ;;  %v227_v3 = vld [vmem:[%s291_s0 + $0x8] sm:$0xff]   ;;  %v228_v4 = vld [vmem:[%s291_s0 + $0x10] sm:$0xff]  }
   0x2   :  { %209 = vmatprep.mubr.msk.bf16.mxu0 %vm230_vm0, %v229_v0  ;;  %213 = vmatprep.mubr.msk.bf16.mxu1 %vm230_vm0, %v229_v0  ;;  %v226_v2 = vld [vmem:[%s291_s0] sm:$0xff]  }
   0x3   :  { %208 = vmatpush3.bf16.msra.mxu0 %v225_v1  ;;  %222 = vmatpush3.bf16.msra.mxu1 %v225_v1  ;;  %v183_v5 = vld [vmem:[%s292_s2] ss:$0 sm:$0xff] }
   0x6   :  { %210 = vmatmul.mubr.msk.bf16.vlgmr.msra.gmra.mxu0 %vm51_vm1, %v226_v2  ;;  %214 = vmatmul.mubr.msk.bf16.vlgmr.msra.gmra.mxu1 %vm51_vm1, %v227_v3 }
   0x7   :  { %217 = vmatprep.mubr.msk.bf16.mxu1 %vm230_vm0, %v229_v0 }
   0xe   :  { %218 = vmatmul.mubr.msk.bf16.gmra.mxu1 %vm51_vm1, %v228_v4 }
  0xc6   :  { %v95_v6 = vpop.f32.mrf.mxu0  ;;  %v103_v7 = vpop.f32.mrf.mxu1 }
  0xc7   :  { %v96_v8 = vadd.f32 %v183_v5, %v95_v6  ;;  %v104_v9 = vadd.f32 %v183_v5, %v103_v7 }
  0xc8   :  { %v211_v10 = vpop.f32.mrf.mxu0  ;;  %v215_v11 = vpop.f32.mrf.mxu1 }
  0xc9   :  { %v118_v12 = vadd.f32 3.0, %v96_v8  ;;  %v120_v13 = vadd.f32 3.0, %v104_v9 }
  0xca   :  { %v98_v14 = vpop.f32.mrf.mxu0  ;;  %v106_v15 = vpop.f32.mrf.mxu1 }
  0xcb   :  { %v124_v16 = vmax.f32 %v118_v12, 0.0  ;;  %v126_v17 = vmax.f32 %v120_v13, 0.0  ;;  %v99_v18 = vadd.f32 %v183_v5, %v98_v14  ;;  %v107_v19 = vadd.f32 %v183_v5, %v106_v15 }
  0xcc   :  { %v216_v20 = vpop.f32.mrf.mxu1  ;;  %v212_v21 = vpop.f32.mrf.mxu0 }
  0xcd   :  { %v130_v22 = vmin.f32 %v124_v16, 6.0  ;;  %v132_v23 = vmin.f32 %v126_v17, 6.0  ;;  %v119_v24 = vadd.f32 3.0, %v99_v18  ;;  %v121_v25 = vadd.f32 3.0, %v107_v19 }
  0xce   :  { %v111_v26 = vpop.f32.mrf.mxu1 }
  0xcf   :  { %v136_v27 = vmul.f32 %v130_v22, %v96_v8  ;;  %v138_v28 = vmul.f32 %v132_v23, %v104_v9  ;;  %v125_v29 = vmax.f32 %v119_v24, 0.0  ;;  %v127_v30 = vmax.f32 %v121_v25, 0.0 }
  0xd0   :  { %v112_v31 = vadd.f32 %v183_v5, %v111_v26  ;;  %v219_v32 = vpop.f32.mrf.mxu1 }
  0xd1   :  { %v142_v33 = vmul.f32 0.16666667, %v136_v27  ;;  %v144_v34 = vmul.f32 0.16666667, %v138_v28  ;;  %v131_v35 = vmin.f32 %v125_v29, 6.0  ;;  %v133_v36 = vmin.f32 %v127_v30, 6.0 }
  0xd2   :  { %v122_v37 = vadd.f32 3.0, %v112_v31  ;;  %v114_v38 = vpop.f32.mrf.mxu1 }
  0xd3   :  { %v197_v39 = vpack.c.bf16 %v142_v33, %v142_v33  ;;  %v199_v40 = vpack.c.bf16 %v144_v34, %v144_v34  ;;  %v137_v41 = vmul.f32 %v131_v35, %v99_v18  ;;  %v139_v42 = vmul.f32 %v133_v36, %v107_v19 }
  0xd4   :  { %v128_v43 = vmax.f32 %v122_v37, 0.0  ;;  %v115_v44 = vadd.f32 %v183_v5, %v114_v38  ;;  %v220_v45 = vpop.f32.mrf.mxu1 }
  0xd5   :  { %173 = vst.msk [vmem:[%s293_s3] sm:$0xf] %vm172_vm2, %v197_v39  ;;  %175 = vst.msk [vmem:[%s293_s3 + $0x8] sm:$0xf] %vm172_vm2, %v199_v40  ;;  %v143_v46 = vmul.f32 0.16666667, %v137_v41 }
  0xd6   :  { %v145_v47 = vmul.f32 0.16666667, %v139_v42  ;;  %v134_v48 = vmin.f32 %v128_v43, 6.0  ;;  %v123_v49 = vadd.f32 3.0, %v115_v44 }
  0xd7   :  { %v198_v50 = vpack.c.bf16 %v143_v46, %v143_v46 }
  0xd8   :  { %v200_v51 = vpack.c.bf16 %v145_v47, %v145_v47  ;;  %v140_v52 = vmul.f32 %v134_v48, %v112_v31  ;;  %v129_v53 = vmax.f32 %v123_v49, 0.0 }
  0xd9   :  { %174 = vst.msk [vmem:[%s293_s3 + $0x4] sm:$0xf] %vm172_vm2, %v198_v50 }
  0xda   :  { %176 = vst.msk [vmem:[%s293_s3 + $0xc] sm:$0xf] %vm172_vm2, %v200_v51  ;;  %v146_v54 = vmul.f32 0.16666667, %v140_v52  ;;  %v135_v55 = vmin.f32 %v129_v53, 6.0 }
  0xdc   :  { %v201_v56 = vpack.c.bf16 %v146_v54, %v146_v54  ;;  %v141_v57 = vmul.f32 %v135_v55, %v115_v44 }
  0xde   :  { %177 = vst.msk [vmem:[%s293_s3 + $0x10] sm:$0xf] %vm172_vm2, %v201_v56  ;;  %v147_v58 = vmul.f32 0.16666667, %v141_v57 }
  0xe0   :  { %v202_v59 = vpack.c.bf16 %v147_v58, %v147_v58 }
  0xe2   :  { %178 = vst.msk [vmem:[%s293_s3 + $0x14] sm:$0xf] %vm172_vm2, %v202_v59 }

// kernel: _lambda_.38
= control target key start
LH: loop header
LB: loop body
LE: loop exit
PB: predicated region body
PF: predicated region fallthrough
CT: control target
= control target key end

     0   :  { %s516_s18 = smov 0   ;;  %s554_s0 = inlined_call_operand.vmem [shape: bf16[4,4,8,16], index: 0, kind: input, shape index: {}]   ;;  %s555_s1 = inlined_call_operand.vmem [shape: bf16[4,4,16], index: 1, kind: input, shape index: {}]   ;;  %s556_s2 = inlined_call_operand.vmem [shape: bf16[4,8,16], index: 2, kind: input, shape index: {}]   ;;  %s557_s3 = inlined_call_operand.vmem [shape: f32[1,1,16], index: 3, kind: input, shape index: {}]   ;;  %s558_s4 = inlined_call_operand.vmem [shape: f32[1,1,16], index: 4, kind: input, shape index: {}]   ;;  %s559_s5 = inlined_call_operand.vmem [shape: bf16[4,4,8,16], index: 5, kind: output, shape index: {}]  }
   0x1 LB: > { %s442_s19 = sadd.s32 4294967295, %s483_s18   ;;  %p446_p0 = scmp.ge.s32.totalorder %s483_s18, 1  ;;  %s483_s18 = sphi %s516_s18, %s15_s18  }
   0x2   : > { %p205_p1 = scmp.lt.s32.totalorder %s483_s18, 5 }
   0x4   : > { %p206_p2 = pnand %p446_p0, %p205_p1 }
   0x5   : > { %p241_p3 = scmp.lt.s32.totalorder (!%p206_p2), %s442_s19, 3 }
   0x6   : > { %209 = sbr.rel (%p206_p2) target bundleno = 43 (0x2b), region = 40 }
   0xb   : > { %v275_v0 = vlaneseq  ;;  %v485_v1 = vmov 1966171168   ;;  %s561_s19 = smov (!%p241_p3, %s442_s19), 3  ;;  %v453_v27 = vld [vmem:[%s557_s3] ss:$0 sm:$0xff]  ;;  %vm358_vm0 = vcmask 125952  }
   0xc   : > { %v273_v2 = vunpack.c.l.s4 %v485_v1  ;;  %s457_s20 = sshll.u32 %s561_s19, 4  ;;  %s449_s21 = sshll.u32 %s561_s19, 1  ;;  %v454_v32 = vld [vmem:[%s558_s4] ss:$0 sm:$0xff] }
   0xd   : > { %v276_v3 = vshrl.u32 %v275_v0, 7  ;;  %s245_s24 = scalar_lea.vmem %s554_s0, %s457_s20  ;;  %s249_s27 = scalar_lea.vmem %s555_s1, %s449_s21 }
   0xe   : > { %v274_v4 = vunpack.c.0.s8 %v273_v2  ;;  %s450_s28 = sshll.u32 %s561_s19, 2  ;;  %v267_v6 = vld [vmem:[%s249_s27] sm:$0x3]  ;;  %v467_v9 = vld [vmem:[%s245_s24 + $0x8] sm:$0xff]   ;;  %s258_s13 = scalar_lea.vmem %s559_s5, %s457_s20 }
   0xf   : > { %s253_s6 = scalar_lea.vmem %s556_s2, %s450_s28  ;;  %v268_v7 = vunpack.c.l.bf16 %v267_v6  ;;  %v460_v8 = vld [vmem:[%s245_s24] sm:$0xff]   ;;  %v298_v11 = vsub.s32 0, %v276_v3  ;;  %v465_v17 = vunpack.c.l.bf16 %v467_v9  ;;  %v466_v22 = vunpack.c.h.bf16 %v467_v9 }
  0x10   : > { %v277_v5 = vsub.s32 %v274_v4, %v276_v3  ;;  %v269_v12 = vld [vmem:[%s253_s6] sm:$0xf]  ;;  %v461_v13 = vunpack.c.l.bf16 %v460_v8  ;;  %v462_v16 = vunpack.c.h.bf16 %v460_v8 }
  0x11   : > { %v270_v18 = vunpack.c.l.bf16 %v269_v12 }
  0x12   : > { %v278_v10 = vrot.slane %v268_v7, %v277_v5 }
  0x14   : > { %v286_v14 = vrot.slane %v278_v10, %v277_v5  ;;  %v279_v15 = vcombine.high %v278_v10, %v278_v10 }
  0x16   : > { %v299_v19 = vrot.slane %v286_v14, %v298_v11  ;;  %v293_v20 = vrot.slane %v279_v15, %v277_v5  ;;  %v294_v21 = vcombine.high %v286_v14, %v286_v14 }
  0x18   : > { %v316_v23 = vmul.f32 %v461_v13, %v299_v19  ;;  %v303_v24 = vrot.slane %v293_v20, %v298_v11  ;;  %v307_v25 = vrot.slane %v294_v21, %v298_v11  ;;  %v295_v26 = vcombine.high %v293_v20, %v293_v20 }
  0x1a   : > { %v320_v28 = vmul.f32 %v316_v23, %v270_v18  ;;  %v317_v29 = vmul.f32 %v462_v16, %v303_v24  ;;  %v318_v30 = vmul.f32 %v465_v17, %v307_v25  ;;  %v311_v31 = vrot.slane %v295_v26, %v298_v11 }
  0x1c   : > { %v331_v33 = vmul.f32 %v453_v27, %v320_v28  ;;  %v321_v34 = vmul.f32 %v317_v29, %v270_v18  ;;  %v322_v35 = vmul.f32 %v318_v30, %v270_v18  ;;  %v319_v36 = vmul.f32 %v466_v22, %v311_v31 }
  0x1e   : > { %v342_v37 = vadd.f32 %v454_v32, %v331_v33  ;;  %v332_v38 = vmul.f32 %v453_v27, %v321_v34  ;;  %v333_v39 = vmul.f32 %v453_v27, %v322_v35  ;;  %v323_v40 = vmul.f32 %v319_v36, %v270_v18 }
  0x20   : > { %v346_v41 = vadd.f32 %v461_v13, %v342_v37  ;;  %v343_v42 = vadd.f32 %v454_v32, %v332_v38  ;;  %v344_v43 = vadd.f32 %v454_v32, %v333_v39  ;;  %v334_v44 = vmul.f32 %v453_v27, %v323_v40 }
  0x22   : > { %v350_v45 = vmax.f32 %v346_v41, 0.0  ;;  %v347_v46 = vadd.f32 %v462_v16, %v343_v42  ;;  %v348_v47 = vadd.f32 %v465_v17, %v344_v43  ;;  %v345_v48 = vadd.f32 %v454_v32, %v334_v44 }
  0x24   : > { %v354_v49 = vpack.c.bf16 %v350_v45, %v350_v45  ;;  %v351_v50 = vmax.f32 %v347_v46, 0.0  ;;  %v352_v51 = vmax.f32 %v348_v47, 0.0  ;;  %v349_v52 = vadd.f32 %v466_v22, %v345_v48 }
  0x26   : > { %359 = vst.msk [vmem:[%s258_s13] sm:$0xf] %vm358_vm0, %v354_v49  ;;  %v355_v53 = vpack.c.bf16 %v351_v50, %v351_v50  ;;  %v356_v54 = vpack.c.bf16 %v352_v51, %v352_v51  ;;  %v353_v55 = vmax.f32 %v349_v52, 0.0 }
  0x28   : > { %360 = vst.msk [vmem:[%s258_s13 + $0x4] sm:$0xf] %vm358_vm0, %v355_v53  ;;  %361 = vst.msk [vmem:[%s258_s13 + $0x8] sm:$0xf] %vm358_vm0, %v356_v54  ;;  %v357_v56 = vpack.c.bf16 %v353_v55, %v353_v55 }
  0x2a   : > { %362 = vst.msk [vmem:[%s258_s13 + $0xc] sm:$0xf] %vm358_vm0, %v357_v56 }
  0x2b PF: > { %s15_s18 = sadd.s32 1, %s483_s18  }
  0x2c   : > { %p12_p4 = scmp.ge.s32.totalorder %s15_s18, 6  }
  0x2e   :  { %14 = sbr.rel (!%p12_p4) target bundleno = 1 (0x1), region = 76 }

// kernel: _lambda_.39
= control target key start
LH: loop header
LB: loop body
LE: loop exit
PB: predicated region body
PF: predicated region fallthrough
CT: control target
= control target key end

     0   :  { %v129_v1 = vmov 0.0   ;;  %vm130_vm0 = vmmov 0   ;;  %vm32_vm1 = vcmask 130048   ;;  %s164_s0 = inlined_call_operand.vmem [shape: bf16[2,16], index: 0, kind: input, shape index: {}]   ;;  %s165_s1 = inlined_call_operand.vmem [shape: bf16[16,5], index: 1, kind: input, shape index: {}]   ;;  %s166_s2 = inlined_call_operand.vmem [shape: f32[1,5], index: 2, kind: input, shape index: {}]   ;;  %s167_s3 = inlined_call_operand.hbm [shape: f32[2,5], index: 3, kind: output, shape index: {}]  }
   0x1   :  { %v106_v0 = vld [vmem:[%s165_s1] sm:$0xff]   ;;  %97 = vmatprep.subr.bf16.mxu0 %v129_v1  ;;  %99 = vmatprep.mubr.msk.bf16.mxu0 %vm130_vm0, %v129_v1 }
   0x2   :  { %98 = vmatpush3.bf16.msra.mxu0 %v106_v0  ;;  %v16_v2 = vld [vmem:[%s164_s0] sm:$0x1] }
   0x3   :  { %8 = vsyncpa [#allocation3], 0  ;;  %v92_v3 = vld [vmem:[%s166_s2] ss:$0 sm:$0xff]  ;;  %s131_s18 = smov [#allocation2]   ;;  %vm76_vm2 = vcmask 33792  }
   0x4   :  { %s84_s19 = sshll.u32 %s131_s18, 4  ;;  %s85_s19 = int_to_ptr.vmem [resolvable:$true] %s84_s19 }
   0x5   :  { %100 = vmatmul.mubr.msk.bf16.vlgmr.msra.gmra.mxu0 %vm32_vm1, %v16_v2  ;;  %s107_s1 = scalar_lea.vmem %s85_s19, 32  ;;  %p112_p1 = scmp.lt.s32.totalorder %s85_s19, %s85_s19 }
   0x6   :  { %p108_p0 = scmp.ne.s32.totalorder %s85_s19, %s107_s1  ;;  %p113_p2 = scmp.lt.s32.totalorder %s107_s1, %s107_s1 }
   0x8   :  { %p114_p3 = por %p113_p2, %p112_p1 }
   0xa   :  { %p115_p4 = pnand %p114_p3, %p108_p0 }
  0xc5   :  { %v70_v4 = vpop.f32.mrf.mxu0 }
  0xc6   :  { %v71_v5 = vadd.f32 %v92_v3, %v70_v4 }
  0xc7   :  { %v101_v6 = vpop.f32.mrf.mxu0 }
  0xc8   :  { %77 = vst.msk [vmem:[#allocation2] sm:$0x3] %vm76_vm2, %v71_v5 }
  0xc9   :  { %v73_v7 = vpop.f32.mrf.mxu0 }
  0xca   :  { %118 = shalt.err (!%p115_p4)
}
  0xcb   :  { %87 = dma.vmem_to_hbm [thread:$0]  %s85_s19, 32, %s167_s3, [#allocation3]   ;;  %v102_v8 = vpop.f32.mrf.mxu0 }
  0xcc   :  { %127 = dma.done.wait [#allocation3], 32  }
  0xcd   :  { %128 = vsyncadd [#allocation3], 4294967264 }
  0xce   :  { %91 = vsyncpa [#allocation3], 1 }

</bundles_post_ra>
